<compile_context>
chip_gen: v5e
topology: v5e:2x2
jax: 0.10.0
libtpu: 0.0.40
codegen_flags: <defaults>
</compile_context>

<pallas_src>
import math
from functools import partial

import jax
import jax.numpy as jnp
from jax.experimental import pallas as pl
from jax.experimental.pallas import tpu as pltpu

LN_EPS = 1e-5
BN_EPS = 1e-5


# ----------------------------- kernel-side helpers ---------------------------
def _layernorm(x, g, b):
    mean = jnp.mean(x, axis=-1, keepdims=True)
    var = jnp.mean(jnp.square(x - mean), axis=-1, keepdims=True)
    return (x - mean) * jax.lax.rsqrt(var + LN_EPS) * g + b


def _ffn(x, g, b, w1, b1, w2, b2):
    y = _layernorm(x, g, b)
    h = jnp.dot(y, w1, preferred_element_type=jnp.float32) + b1
    h = h * jax.nn.sigmoid(h)                       # Swish
    return jnp.dot(h, w2, preferred_element_type=jnp.float32) + b2


def _mhsa(x, g, b, wqkv, bqkv, wo, bo, batch, seq, num_heads):
    BT, D = x.shape
    dh = D // num_heads
    y = _layernorm(x, g, b)
    # Fused QKV projection; 1/sqrt(dh) already folded into the Q columns.
    qkv = jnp.dot(y, wqkv, preferred_element_type=jnp.float32) + bqkv  # (BT,3D)
    qkv = qkv.reshape(batch, seq, 3 * D)
    out = jnp.zeros((BT, D), jnp.float32)
    for h in range(num_heads):                      # static H=4, batched over B
        lo = h * dh
        qh = qkv[:, :, lo:lo + dh]
        kh = qkv[:, :, D + lo:D + lo + dh]
        vh = qkv[:, :, 2 * D + lo:2 * D + lo + dh]
        s = jnp.einsum('bqd,bkd->bqk', qh, kh, preferred_element_type=jnp.float32)
        s = s - jnp.max(s, axis=-1, keepdims=True)
        e = jnp.exp(s)
        p = e / jnp.sum(e, axis=-1, keepdims=True)
        ctx = jnp.einsum('bqk,bkd->bqd', p, vh, preferred_element_type=jnp.float32)
        # concat(heads) @ wo  ==  sum_h ctx_h @ wo[h*dh:(h+1)*dh, :]
        out = out + jnp.dot(ctx.reshape(BT, dh), wo[lo:lo + dh, :],
                            preferred_element_type=jnp.float32)
    return out + bo


def _conv_module(x, g, b, wv, bv, wg, bg, wdw, bdw, bn_scale, bn_shift,
                 wpw2, bpw2, seq, kernel_size):
    BT, D = x.shape
    pad = (kernel_size - 1) // 2
    y = _layernorm(x, g, b)
    hv = jnp.dot(y, wv, preferred_element_type=jnp.float32) + bv
    hg = jnp.dot(y, wg, preferred_element_type=jnp.float32) + bg
    h = hv * jax.nn.sigmoid(hg)                     # GLU, lane-aligned halves
    # Depthwise 'same' conv along T: circular roll (XLU) + validity mask.
    # Flat (B*T) roll is safe because the mask zeroes every position whose
    # source index falls outside the current sequence (incl. batch crossings).
    t_idx = jax.lax.broadcasted_iota(jnp.int32, (BT, D), 0) % seq
    acc = jnp.zeros((BT, D), jnp.float32)
    for k in range(kernel_size):                    # static K=31 taps
        s = pad - k                                 # tap reads h[t - s]
        rolled = pltpu.roll(h, s % BT, axis=0) if s % BT != 0 else h
        valid = jnp.logical_and(t_idx >= s, t_idx < seq + s)
        acc = acc + jnp.where(valid, rolled, 0.0) * wdw[k]
    acc = acc + bdw
    acc = acc * bn_scale + bn_shift                 # eval-mode BatchNorm (affine)
    acc = acc * jax.nn.sigmoid(acc)                 # Swish
    return jnp.dot(acc, wpw2, preferred_element_type=jnp.float32) + bpw2


# ------------------------------ fused block kernel ---------------------------
def conformer_kernel(
        x_ref,
        f1_lng, f1_lnb, f1_w1, f1_b1, f1_w2, f1_b2,
        a_lng, a_lnb, a_wqkv, a_bqkv, a_wo, a_bo,
        c_lng, c_lnb, c_wv, c_bv, c_wg, c_bg, c_wdw, c_bdw,
        c_bns, c_bnb, c_wpw2, c_bpw2,
        f2_lng, f2_lnb, f2_w1, f2_b1, f2_w2, f2_b2,
        n_lng, n_lnb,
        o_ref, *, seq, num_heads, kernel_size):
    blk = pl.program_id(1)

    # Initialise the carried activation from x on the first block; afterwards
    # it stays resident in the revisited output block across the block axis.
    @pl.when(blk == 0)
    def _():
        o_ref[...] = x_ref[...]

    x = o_ref[...].astype(jnp.float32)              # (Bt*T, D)
    batch = x.shape[0] // seq

    x = x + 0.5 * _ffn(x, f1_lng[...], f1_lnb[...], f1_w1[...], f1_b1[...],
                       f1_w2[...], f1_b2[...])
    x = x + _mhsa(x, a_lng[...], a_lnb[...], a_wqkv[...], a_bqkv[...],
                  a_wo[...], a_bo[...], batch, seq, num_heads)
    x = x + _conv_module(x, c_lng[...], c_lnb[...], c_wv[...], c_bv[...],
                         c_wg[...], c_bg[...], c_wdw[...], c_bdw[...],
                         c_bns[...], c_bnb[...], c_wpw2[...], c_bpw2[...],
                         seq, kernel_size)
    x = x + 0.5 * _ffn(x, f2_lng[...], f2_lnb[...], f2_w1[...], f2_b1[...],
                       f2_w2[...], f2_b2[...])
    x = _layernorm(x, n_lng[...], n_lnb[...])

    o_ref[...] = x.astype(o_ref.dtype)


# --------------------------------- wrapper ------------------------------------
def conformer_forward(x, stacked_params, *, num_heads, kernel_size,
                      num_batch_tiles=1):
    B, T, D = x.shape
    num_blocks = stacked_params[0].shape[0]
    assert B % num_batch_tiles == 0
    rows = (B // num_batch_tiles) * T
    xf = x.reshape(B * T, D)

    act_spec = pl.BlockSpec((rows, D), lambda bi, blk: (bi, 0))
    param_specs = []
    for p in stacked_params:
        tail = p.shape[1:]
        param_specs.append(
            pl.BlockSpec((None,) + tail,
                         lambda bi, blk, _n=len(tail): (blk,) + (0,) * _n))

    out = pl.pallas_call(
        partial(conformer_kernel, seq=T, num_heads=num_heads,
                kernel_size=kernel_size),
        out_shape=jax.ShapeDtypeStruct((B * T, D), x.dtype),
        grid_spec=pltpu.PrefetchScalarGridSpec(
            num_scalar_prefetch=0,
            grid=(num_batch_tiles, num_blocks),
            in_specs=[act_spec] + param_specs,
            out_specs=act_spec,
        ),
        compiler_params=pltpu.CompilerParams(
            dimension_semantics=("parallel", "arbitrary")),
    )(xf, *stacked_params)
    return out.reshape(B, T, D)


# --------------------- deterministic params (PyTorch layout) ------------------
def _dense(key, shape, scale=0.02):
    return scale * jax.random.normal(key, shape, dtype=jnp.float32)


def init_block_params(key, D, ff_ratio, kernel_size):
    ks = jax.random.split(key, 9)
    F = ff_ratio * D

    def ffn_params(k):
        k1, k2 = jax.random.split(k)
        return dict(ln_g=jnp.ones((1, D), jnp.float32),
                    ln_b=jnp.zeros((1, D), jnp.float32),
                    w1=_dense(k1, (D, F)), b1=jnp.zeros((1, F), jnp.float32),
                    w2=_dense(k2, (F, D)), b2=jnp.zeros((1, D), jnp.float32))

    mhsa = dict(ln_g=jnp.ones((1, D), jnp.float32),
                ln_b=jnp.zeros((1, D), jnp.float32),
                wq=_dense(ks[2], (D, D)), bq=jnp.zeros((1, D), jnp.float32),
                wk=_dense(ks[3], (D, D)), bk=jnp.zeros((1, D), jnp.float32),
                wv=_dense(ks[4], (D, D)), bv=jnp.zeros((1, D), jnp.float32),
                wo=_dense(ks[5], (D, D)), bo=jnp.zeros((1, D), jnp.float32))
    conv = dict(ln_g=jnp.ones((1, D), jnp.float32),
                ln_b=jnp.zeros((1, D), jnp.float32),
                wpw1=_dense(ks[6], (D, 2 * D)),
                bpw1=jnp.zeros((1, 2 * D), jnp.float32),
                wdw=_dense(ks[7], (kernel_size, D)),
                bdw=jnp.zeros((1, D), jnp.float32),
                bn_g=jnp.ones((1, D), jnp.float32),
                bn_b=jnp.zeros((1, D), jnp.float32),
                bn_m=jnp.zeros((1, D), jnp.float32),
                bn_v=jnp.ones((1, D), jnp.float32),
                wpw2=_dense(ks[8], (D, D)),
                bpw2=jnp.zeros((1, D), jnp.float32))
    norm = dict(ln_g=jnp.ones((1, D), jnp.float32),
                ln_b=jnp.zeros((1, D), jnp.float32))
    return dict(ffn1=ffn_params(ks[0]), mhsa=mhsa, conv=conv,
                ffn2=ffn_params(ks[1]), norm=norm)


def prepare_params(block_params, num_heads):
    """Fold the attention scale into Q, fold eval-mode BatchNorm to an affine,
    split the GLU weight into value/gate halves, and stack every per-block
    tensor along a leading num_blocks axis for the fused kernel."""
    D = block_params[0]["mhsa"]["wq"].shape[0]
    scale = 1.0 / math.sqrt(D // num_heads)
    per_block = []
    for blk in block_params:
        f1, f2 = blk["ffn1"], blk["ffn2"]
        a, c, n = blk["mhsa"], blk["conv"], blk["norm"]
        wqkv = jnp.concatenate([a["wq"] * scale, a["wk"], a["wv"]], axis=1)
        bqkv = jnp.concatenate([a["bq"] * scale, a["bk"], a["bv"]], axis=1)
        bn_scale = c["bn_g"] * jax.lax.rsqrt(c["bn_v"] + BN_EPS)
        bn_shift = c["bn_b"] - c["bn_m"] * bn_scale
        per_block.append([
            f1["ln_g"], f1["ln_b"], f1["w1"], f1["b1"], f1["w2"], f1["b2"],
            a["ln_g"], a["ln_b"], wqkv, bqkv, a["wo"], a["bo"],
            c["ln_g"], c["ln_b"],
            c["wpw1"][:, :D], c["bpw1"][:, :D],        # GLU value half
            c["wpw1"][:, D:], c["bpw1"][:, D:],        # GLU gate half
            c["wdw"], c["bdw"], bn_scale, bn_shift, c["wpw2"], c["bpw2"],
            f2["ln_g"], f2["ln_b"], f2["w1"], f2["b1"], f2["w2"], f2["b2"],
            n["ln_g"], n["ln_b"],
        ])
    return [jnp.stack([pb[i] for pb in per_block], axis=0)
            for i in range(len(per_block[0]))]


if __name__ == "__main__":
    B, T, D = 2, 16, 32
    num_heads = 4
    kernel_size = 31
    ff_ratio = 4
    num_blocks = [2]          # single stage, two blocks, no down-sampling

    key = jax.random.PRNGKey(0)
    kx, kp = jax.random.split(key)
    x = jax.random.normal(kx, (B, T, D), dtype=jnp.float32)

    blk_keys = jax.random.split(kp, sum(num_blocks))
    raw_blocks = [init_block_params(k, D, ff_ratio, kernel_size)
                  for k in blk_keys]
    stacked = prepare_params(raw_blocks, num_heads)

    # num_batch_tiles=2 would shard the batch over v7x's two TensorCores.
    y = conformer_forward(x, stacked, num_heads=num_heads,
                          kernel_size=kernel_size, num_batch_tiles=1)
    y = jax.block_until_ready(y)
    assert y.shape == (B, T, D)
    assert bool(jnp.all(jnp.isfinite(y)))
    print("KERNEL_OK")
</pallas_src>

<mosaic_0001>
module attributes {stable_mosaic.version = 11 : i64} {
  func.func @conformer_kernel(%arg0: i32, %arg1: i32, %arg2: memref<32x32xf32, #tpu.memory_space<vmem>>, %arg3: memref<1x1x32xf32, #tpu.memory_space<vmem>>, %arg4: memref<1x1x32xf32, #tpu.memory_space<vmem>>, %arg5: memref<1x32x128xf32, #tpu.memory_space<vmem>>, %arg6: memref<1x1x128xf32, #tpu.memory_space<vmem>>, %arg7: memref<1x128x32xf32, #tpu.memory_space<vmem>>, %arg8: memref<1x1x32xf32, #tpu.memory_space<vmem>>, %arg9: memref<1x1x32xf32, #tpu.memory_space<vmem>>, %arg10: memref<1x1x32xf32, #tpu.memory_space<vmem>>, %arg11: memref<1x32x96xf32, #tpu.memory_space<vmem>>, %arg12: memref<1x1x96xf32, #tpu.memory_space<vmem>>, %arg13: memref<1x32x32xf32, #tpu.memory_space<vmem>>, %arg14: memref<1x1x32xf32, #tpu.memory_space<vmem>>, %arg15: memref<1x1x32xf32, #tpu.memory_space<vmem>>, %arg16: memref<1x1x32xf32, #tpu.memory_space<vmem>>, %arg17: memref<1x32x32xf32, #tpu.memory_space<vmem>>, %arg18: memref<1x1x32xf32, #tpu.memory_space<vmem>>, %arg19: memref<1x32x32xf32, #tpu.memory_space<vmem>>, %arg20: memref<1x1x32xf32, #tpu.memory_space<vmem>>, %arg21: memref<1x31x32xf32, #tpu.memory_space<vmem>>, %arg22: memref<1x1x32xf32, #tpu.memory_space<vmem>>, %arg23: memref<1x1x32xf32, #tpu.memory_space<vmem>>, %arg24: memref<1x1x32xf32, #tpu.memory_space<vmem>>, %arg25: memref<1x32x32xf32, #tpu.memory_space<vmem>>, %arg26: memref<1x1x32xf32, #tpu.memory_space<vmem>>, %arg27: memref<1x1x32xf32, #tpu.memory_space<vmem>>, %arg28: memref<1x1x32xf32, #tpu.memory_space<vmem>>, %arg29: memref<1x32x128xf32, #tpu.memory_space<vmem>>, %arg30: memref<1x1x128xf32, #tpu.memory_space<vmem>>, %arg31: memref<1x128x32xf32, #tpu.memory_space<vmem>>, %arg32: memref<1x1x32xf32, #tpu.memory_space<vmem>>, %arg33: memref<1x1x32xf32, #tpu.memory_space<vmem>>, %arg34: memref<1x1x32xf32, #tpu.memory_space<vmem>>, %arg35: memref<32x32xf32, #tpu.memory_space<vmem>>) attributes {dimension_semantics = [#tpu.dimension_semantics<parallel>, #tpu.dimension_semantics<arbitrary>], iteration_bounds = array<i64: 1, 2>, scalar_prefetch = 0 : i64, scratch_operands = 0 : i64, tpu.core_type = #tpu.core_type<tc>, window_params = [{transform_indices = @transform_0, window_bounds = array<i64: 32, 32>}, {transform_indices = @transform_1, window_bounds = array<i64: 1, 1, 32>}, {transform_indices = @transform_2, window_bounds = array<i64: 1, 1, 32>}, {transform_indices = @transform_3, window_bounds = array<i64: 1, 32, 128>}, {transform_indices = @transform_4, window_bounds = array<i64: 1, 1, 128>}, {transform_indices = @transform_5, window_bounds = array<i64: 1, 128, 32>}, {transform_indices = @transform_6, window_bounds = array<i64: 1, 1, 32>}, {transform_indices = @transform_7, window_bounds = array<i64: 1, 1, 32>}, {transform_indices = @transform_8, window_bounds = array<i64: 1, 1, 32>}, {transform_indices = @transform_9, window_bounds = array<i64: 1, 32, 96>}, {transform_indices = @transform_10, window_bounds = array<i64: 1, 1, 96>}, {transform_indices = @transform_11, window_bounds = array<i64: 1, 32, 32>}, {transform_indices = @transform_12, window_bounds = array<i64: 1, 1, 32>}, {transform_indices = @transform_13, window_bounds = array<i64: 1, 1, 32>}, {transform_indices = @transform_14, window_bounds = array<i64: 1, 1, 32>}, {transform_indices = @transform_15, window_bounds = array<i64: 1, 32, 32>}, {transform_indices = @transform_16, window_bounds = array<i64: 1, 1, 32>}, {transform_indices = @transform_17, window_bounds = array<i64: 1, 32, 32>}, {transform_indices = @transform_18, window_bounds = array<i64: 1, 1, 32>}, {transform_indices = @transform_19, window_bounds = array<i64: 1, 31, 32>}, {transform_indices = @transform_20, window_bounds = array<i64: 1, 1, 32>}, {transform_indices = @transform_21, window_bounds = array<i64: 1, 1, 32>}, {transform_indices = @transform_22, window_bounds = array<i64: 1, 1, 32>}, {transform_indices = @transform_23, window_bounds = array<i64: 1, 32, 32>}, {transform_indices = @transform_24, window_bounds = array<i64: 1, 1, 32>}, {transform_indices = @transform_25, window_bounds = array<i64: 1, 1, 32>}, {transform_indices = @transform_26, window_bounds = array<i64: 1, 1, 32>}, {transform_indices = @transform_27, window_bounds = array<i64: 1, 32, 128>}, {transform_indices = @transform_28, window_bounds = array<i64: 1, 1, 128>}, {transform_indices = @transform_29, window_bounds = array<i64: 1, 128, 32>}, {transform_indices = @transform_30, window_bounds = array<i64: 1, 1, 32>}, {transform_indices = @transform_31, window_bounds = array<i64: 1, 1, 32>}, {transform_indices = @transform_32, window_bounds = array<i64: 1, 1, 32>}, {transform_indices = @transform_33, window_bounds = array<i64: 32, 32>}]} {
    %c0_i32 = arith.constant 0 : i32
    %0 = arith.cmpi eq, %arg1, %c0_i32 : i32
    %1 = arith.extui %0 : i1 to i32
    %c0_i32_0 = arith.constant 0 : i32
    %2 = arith.cmpi ne, %1, %c0_i32_0 : i32
    scf.if %2 {
      %c0_243 = arith.constant 0 : index
      %c0_244 = arith.constant 0 : index
      %768 = vector.load %arg2[%c0_243, %c0_244] : memref<32x32xf32, #tpu.memory_space<vmem>>, vector<32x32xf32>
      %c0_245 = arith.constant 0 : index
      %c0_246 = arith.constant 0 : index
      %769 = vector.load %arg35[%c0_245, %c0_246] : memref<32x32xf32, #tpu.memory_space<vmem>>, vector<32x32xf32>
      tpu.vector_store %arg35[%c0_245, %c0_246], %768 {strides = array<i32>} : memref<32x32xf32, #tpu.memory_space<vmem>>, vector<32x32xf32>,
    } else {
    }
    %c0 = arith.constant 0 : index
    %c0_1 = arith.constant 0 : index
    %3 = vector.load %arg35[%c0, %c0_1] : memref<32x32xf32, #tpu.memory_space<vmem>>, vector<32x32xf32>
    %c0_2 = arith.constant 0 : index
    %c0_3 = arith.constant 0 : index
    %c0_4 = arith.constant 0 : index
    %4 = vector.load %arg3[%c0_2, %c0_3, %c0_4] : memref<1x1x32xf32, #tpu.memory_space<vmem>>, vector<1x1x32xf32>
    %5 = vector.shape_cast %4 : vector<1x1x32xf32> to vector<1x32xf32>
    %c0_5 = arith.constant 0 : index
    %c0_6 = arith.constant 0 : index
    %c0_7 = arith.constant 0 : index
    %6 = vector.load %arg4[%c0_5, %c0_6, %c0_7] : memref<1x1x32xf32, #tpu.memory_space<vmem>>, vector<1x1x32xf32>
    %7 = vector.shape_cast %6 : vector<1x1x32xf32> to vector<1x32xf32>
    %c0_8 = arith.constant 0 : index
    %c0_9 = arith.constant 0 : index
    %c0_10 = arith.constant 0 : index
    %8 = vector.load %arg5[%c0_8, %c0_9, %c0_10] : memref<1x32x128xf32, #tpu.memory_space<vmem>>, vector<1x32x128xf32>
    %9 = vector.shape_cast %8 : vector<1x32x128xf32> to vector<32x128xf32>
    %c0_11 = arith.constant 0 : index
    %c0_12 = arith.constant 0 : index
    %c0_13 = arith.constant 0 : index
    %10 = vector.load %arg6[%c0_11, %c0_12, %c0_13] : memref<1x1x128xf32, #tpu.memory_space<vmem>>, vector<1x1x128xf32>
    %11 = vector.shape_cast %10 : vector<1x1x128xf32> to vector<1x128xf32>
    %c0_14 = arith.constant 0 : index
    %c0_15 = arith.constant 0 : index
    %c0_16 = arith.constant 0 : index
    %12 = vector.load %arg7[%c0_14, %c0_15, %c0_16] : memref<1x128x32xf32, #tpu.memory_space<vmem>>, vector<1x128x32xf32>
    %13 = vector.shape_cast %12 : vector<1x128x32xf32> to vector<128x32xf32>
    %c0_17 = arith.constant 0 : index
    %c0_18 = arith.constant 0 : index
    %c0_19 = arith.constant 0 : index
    %14 = vector.load %arg8[%c0_17, %c0_18, %c0_19] : memref<1x1x32xf32, #tpu.memory_space<vmem>>, vector<1x1x32xf32>
    %15 = vector.shape_cast %14 : vector<1x1x32xf32> to vector<1x32xf32>
    %cst = arith.constant dense<0.000000e+00> : vector<32xf32>
    %16 = vector.multi_reduction <add>, %3, %cst [1] : vector<32x32xf32> to vector<32xf32>
    %17 = vector.shape_cast %16 : vector<32xf32> to vector<32x1xf32>
    %cst_20 = arith.constant 3.200000e+01 : f32
    %18 = vector.broadcast %cst_20 : f32 to vector<32x1xf32>
    %19 = arith.divf %17, %18 : vector<32x1xf32>
    %20 = vector.broadcast %19 : vector<32x1xf32> to vector<32x32xf32>
    %21 = arith.subf %3, %20 : vector<32x32xf32>
    %22 = arith.mulf %21, %21 : vector<32x32xf32>
    %cst_21 = arith.constant dense<0.000000e+00> : vector<32xf32>
    %23 = vector.multi_reduction <add>, %22, %cst_21 [1] : vector<32x32xf32> to vector<32xf32>
    %24 = vector.shape_cast %23 : vector<32xf32> to vector<32x1xf32>
    %cst_22 = arith.constant 3.200000e+01 : f32
    %25 = vector.broadcast %cst_22 : f32 to vector<32x1xf32>
    %26 = arith.divf %24, %25 : vector<32x1xf32>
    %27 = vector.broadcast %19 : vector<32x1xf32> to vector<32x32xf32>
    %28 = arith.subf %3, %27 : vector<32x32xf32>
    %cst_23 = arith.constant 9.99999974E-6 : f32
    %29 = vector.broadcast %cst_23 : f32 to vector<32x1xf32>
    %30 = arith.addf %26, %29 : vector<32x1xf32>
    %31 = math.rsqrt %30 : vector<32x1xf32>
    %32 = vector.broadcast %31 : vector<32x1xf32> to vector<32x32xf32>
    %33 = arith.mulf %28, %32 : vector<32x32xf32>
    %34 = vector.broadcast %5 : vector<1x32xf32> to vector<32x32xf32>
    %35 = arith.mulf %33, %34 : vector<32x32xf32>
    %36 = vector.broadcast %7 : vector<1x32xf32> to vector<32x32xf32>
    %37 = arith.addf %35, %36 : vector<32x32xf32>
    %cst_24 = arith.constant dense<0.000000e+00> : vector<32x128xf32>
    %38 = tpu.matmul %37, %9, %cst_24 {dimension_numbers = #tpu.dot_dimension_numbers<[1], [0], [0], [1], [0, 0, 1, 1], [], []>} : vector<32x32xf32>, vector<32x128xf32>, vector<32x128xf32> -> vector<32x128xf32>
    %39 = vector.broadcast %11 : vector<1x128xf32> to vector<32x128xf32>
    %40 = arith.addf %38, %39 : vector<32x128xf32>
    %41 = arith.negf %40 : vector<32x128xf32>
    %42 = math.exp %41 : vector<32x128xf32>
    %cst_25 = arith.constant 1.000000e+00 : f32
    %43 = vector.broadcast %cst_25 : f32 to vector<32x128xf32>
    %44 = arith.addf %43, %42 : vector<32x128xf32>
    %45 = arith.divf %43, %44 : vector<32x128xf32>
    %46 = arith.mulf %40, %45 : vector<32x128xf32>
    %cst_26 = arith.constant dense<0.000000e+00> : vector<32x32xf32>
    %47 = tpu.matmul %46, %13, %cst_26 {dimension_numbers = #tpu.dot_dimension_numbers<[1], [0], [0], [1], [0, 0, 1, 1], [], []>} : vector<32x128xf32>, vector<128x32xf32>, vector<32x32xf32> -> vector<32x32xf32>
    %48 = vector.broadcast %15 : vector<1x32xf32> to vector<32x32xf32>
    %49 = arith.addf %47, %48 : vector<32x32xf32>
    %cst_27 = arith.constant 5.000000e-01 : f32
    %50 = vector.broadcast %cst_27 : f32 to vector<32x32xf32>
    %51 = arith.mulf %50, %49 : vector<32x32xf32>
    %52 = arith.addf %3, %51 : vector<32x32xf32>
    %c0_28 = arith.constant 0 : index
    %c0_29 = arith.constant 0 : index
    %c0_30 = arith.constant 0 : index
    %53 = vector.load %arg9[%c0_28, %c0_29, %c0_30] : memref<1x1x32xf32, #tpu.memory_space<vmem>>, vector<1x1x32xf32>
    %54 = vector.shape_cast %53 : vector<1x1x32xf32> to vector<1x32xf32>
    %c0_31 = arith.constant 0 : index
    %c0_32 = arith.constant 0 : index
    %c0_33 = arith.constant 0 : index
    %55 = vector.load %arg10[%c0_31, %c0_32, %c0_33] : memref<1x1x32xf32, #tpu.memory_space<vmem>>, vector<1x1x32xf32>
    %56 = vector.shape_cast %55 : vector<1x1x32xf32> to vector<1x32xf32>
    %c0_34 = arith.constant 0 : index
    %c0_35 = arith.constant 0 : index
    %c0_36 = arith.constant 0 : index
    %57 = vector.load %arg11[%c0_34, %c0_35, %c0_36] : memref<1x32x96xf32, #tpu.memory_space<vmem>>, vector<1x32x96xf32>
    %58 = vector.shape_cast %57 : vector<1x32x96xf32> to vector<32x96xf32>
    %c0_37 = arith.constant 0 : index
    %c0_38 = arith.constant 0 : index
    %c0_39 = arith.constant 0 : index
    %59 = vector.load %arg12[%c0_37, %c0_38, %c0_39] : memref<1x1x96xf32, #tpu.memory_space<vmem>>, vector<1x1x96xf32>
    %60 = vector.shape_cast %59 : vector<1x1x96xf32> to vector<1x96xf32>
    %c0_40 = arith.constant 0 : index
    %c0_41 = arith.constant 0 : index
    %c0_42 = arith.constant 0 : index
    %61 = vector.load %arg13[%c0_40, %c0_41, %c0_42] : memref<1x32x32xf32, #tpu.memory_space<vmem>>, vector<1x32x32xf32>
    %62 = vector.shape_cast %61 : vector<1x32x32xf32> to vector<32x32xf32>
    %c0_43 = arith.constant 0 : index
    %c0_44 = arith.constant 0 : index
    %c0_45 = arith.constant 0 : index
    %63 = vector.load %arg14[%c0_43, %c0_44, %c0_45] : memref<1x1x32xf32, #tpu.memory_space<vmem>>, vector<1x1x32xf32>
    %64 = vector.shape_cast %63 : vector<1x1x32xf32> to vector<1x32xf32>
    %cst_46 = arith.constant dense<0.000000e+00> : vector<32xf32>
    %65 = vector.multi_reduction <add>, %52, %cst_46 [1] : vector<32x32xf32> to vector<32xf32>
    %66 = vector.shape_cast %65 : vector<32xf32> to vector<32x1xf32>
    %cst_47 = arith.constant 3.200000e+01 : f32
    %67 = vector.broadcast %cst_47 : f32 to vector<32x1xf32>
    %68 = arith.divf %66, %67 : vector<32x1xf32>
    %69 = vector.broadcast %68 : vector<32x1xf32> to vector<32x32xf32>
    %70 = arith.subf %52, %69 : vector<32x32xf32>
    %71 = arith.mulf %70, %70 : vector<32x32xf32>
    %cst_48 = arith.constant dense<0.000000e+00> : vector<32xf32>
    %72 = vector.multi_reduction <add>, %71, %cst_48 [1] : vector<32x32xf32> to vector<32xf32>
    %73 = vector.shape_cast %72 : vector<32xf32> to vector<32x1xf32>
    %cst_49 = arith.constant 3.200000e+01 : f32
    %74 = vector.broadcast %cst_49 : f32 to vector<32x1xf32>
    %75 = arith.divf %73, %74 : vector<32x1xf32>
    %76 = vector.broadcast %68 : vector<32x1xf32> to vector<32x32xf32>
    %77 = arith.subf %52, %76 : vector<32x32xf32>
    %cst_50 = arith.constant 9.99999974E-6 : f32
    %78 = vector.broadcast %cst_50 : f32 to vector<32x1xf32>
    %79 = arith.addf %75, %78 : vector<32x1xf32>
    %80 = math.rsqrt %79 : vector<32x1xf32>
    %81 = vector.broadcast %80 : vector<32x1xf32> to vector<32x32xf32>
    %82 = arith.mulf %77, %81 : vector<32x32xf32>
    %83 = vector.broadcast %54 : vector<1x32xf32> to vector<32x32xf32>
    %84 = arith.mulf %82, %83 : vector<32x32xf32>
    %85 = vector.broadcast %56 : vector<1x32xf32> to vector<32x32xf32>
    %86 = arith.addf %84, %85 : vector<32x32xf32>
    %cst_51 = arith.constant dense<0.000000e+00> : vector<32x96xf32>
    %87 = tpu.matmul %86, %58, %cst_51 {dimension_numbers = #tpu.dot_dimension_numbers<[1], [0], [0], [1], [0, 0, 1, 1], [], []>} : vector<32x32xf32>, vector<32x96xf32>, vector<32x96xf32> -> vector<32x96xf32>
    %88 = vector.broadcast %60 : vector<1x96xf32> to vector<32x96xf32>
    %89 = arith.addf %87, %88 : vector<32x96xf32>
    %90 = vector.shape_cast %89 : vector<32x96xf32> to vector<2x16x96xf32>
    %cst_52 = arith.constant 0.000000e+00 : f32
    %91 = vector.broadcast %cst_52 : f32 to vector<32x32xf32>
    %92 = vector.extract_strided_slice %90 {offsets = [0, 0, 0], sizes = [2, 16, 8], strides = [1, 1, 1]} : vector<2x16x96xf32> to vector<2x16x8xf32>
    %93 = vector.extract_strided_slice %90 {offsets = [0, 0, 32], sizes = [2, 16, 8], strides = [1, 1, 1]} : vector<2x16x96xf32> to vector<2x16x8xf32>
    %94 = vector.extract_strided_slice %90 {offsets = [0, 0, 64], sizes = [2, 16, 8], strides = [1, 1, 1]} : vector<2x16x96xf32> to vector<2x16x8xf32>
    "tpu.trace_start"() <{level = 10 : i32, message = "bqd,bkd->bqk"}> : () -> ()
    %cst_53 = arith.constant dense<0.000000e+00> : vector<2x16x16xf32>
    %95 = tpu.matmul %92, %93, %cst_53 {dimension_numbers = #tpu.dot_dimension_numbers<[2], [2], [1], [1], [0, 0, 0, 1, 1, 1], [0], [0]>} : vector<2x16x8xf32>, vector<2x16x8xf32>, vector<2x16x16xf32> -> vector<2x16x16xf32>
    "tpu.trace_stop"() : () -> ()
    %cst_54 = arith.constant dense<0xFF800000> : vector<2x16xf32>
    %96 = vector.multi_reduction <maximumf>, %95, %cst_54 [2] : vector<2x16x16xf32> to vector<2x16xf32>
    %97 = vector.shape_cast %96 : vector<2x16xf32> to vector<2x16x1xf32>
    %98 = vector.broadcast %97 : vector<2x16x1xf32> to vector<2x16x16xf32>
    %99 = arith.subf %95, %98 : vector<2x16x16xf32>
    %100 = math.exp %99 : vector<2x16x16xf32>
    %cst_55 = arith.constant dense<0.000000e+00> : vector<2x16xf32>
    %101 = vector.multi_reduction <add>, %100, %cst_55 [2] : vector<2x16x16xf32> to vector<2x16xf32>
    %102 = vector.shape_cast %101 : vector<2x16xf32> to vector<2x16x1xf32>
    %103 = vector.broadcast %102 : vector<2x16x1xf32> to vector<2x16x16xf32>
    %104 = arith.divf %100, %103 : vector<2x16x16xf32>
    "tpu.trace_start"() <{level = 10 : i32, message = "bqk,bkd->bqd"}> : () -> ()
    %cst_56 = arith.constant dense<0.000000e+00> : vector<2x16x8xf32>
    %105 = tpu.matmul %104, %94, %cst_56 {dimension_numbers = #tpu.dot_dimension_numbers<[2], [1], [1], [2], [0, 0, 0, 1, 1, 2], [0], [0]>} : vector<2x16x16xf32>, vector<2x16x8xf32>, vector<2x16x8xf32> -> vector<2x16x8xf32>
    "tpu.trace_stop"() : () -> ()
    %106 = vector.shape_cast %105 : vector<2x16x8xf32> to vector<32x8xf32>
    %107 = vector.extract_strided_slice %62 {offsets = [0, 0], sizes = [8, 32], strides = [1, 1]} : vector<32x32xf32> to vector<8x32xf32>
    %cst_57 = arith.constant dense<0.000000e+00> : vector<32x32xf32>
    %108 = tpu.matmul %106, %107, %cst_57 {dimension_numbers = #tpu.dot_dimension_numbers<[1], [0], [0], [1], [0, 0, 1, 1], [], []>} : vector<32x8xf32>, vector<8x32xf32>, vector<32x32xf32> -> vector<32x32xf32>
    %109 = arith.addf %91, %108 : vector<32x32xf32>
    %110 = vector.extract_strided_slice %90 {offsets = [0, 0, 8], sizes = [2, 16, 8], strides = [1, 1, 1]} : vector<2x16x96xf32> to vector<2x16x8xf32>
    %111 = vector.extract_strided_slice %90 {offsets = [0, 0, 40], sizes = [2, 16, 8], strides = [1, 1, 1]} : vector<2x16x96xf32> to vector<2x16x8xf32>
    %112 = vector.extract_strided_slice %90 {offsets = [0, 0, 72], sizes = [2, 16, 8], strides = [1, 1, 1]} : vector<2x16x96xf32> to vector<2x16x8xf32>
    "tpu.trace_start"() <{level = 10 : i32, message = "bqd,bkd->bqk"}> : () -> ()
    %cst_58 = arith.constant dense<0.000000e+00> : vector<2x16x16xf32>
    %113 = tpu.matmul %110, %111, %cst_58 {dimension_numbers = #tpu.dot_dimension_numbers<[2], [2], [1], [1], [0, 0, 0, 1, 1, 1], [0], [0]>} : vector<2x16x8xf32>, vector<2x16x8xf32>, vector<2x16x16xf32> -> vector<2x16x16xf32>
    "tpu.trace_stop"() : () -> ()
    %cst_59 = arith.constant dense<0xFF800000> : vector<2x16xf32>
    %114 = vector.multi_reduction <maximumf>, %113, %cst_59 [2] : vector<2x16x16xf32> to vector<2x16xf32>
    %115 = vector.shape_cast %114 : vector<2x16xf32> to vector<2x16x1xf32>
    %116 = vector.broadcast %115 : vector<2x16x1xf32> to vector<2x16x16xf32>
    %117 = arith.subf %113, %116 : vector<2x16x16xf32>
    %118 = math.exp %117 : vector<2x16x16xf32>
    %cst_60 = arith.constant dense<0.000000e+00> : vector<2x16xf32>
    %119 = vector.multi_reduction <add>, %118, %cst_60 [2] : vector<2x16x16xf32> to vector<2x16xf32>
    %120 = vector.shape_cast %119 : vector<2x16xf32> to vector<2x16x1xf32>
    %121 = vector.broadcast %120 : vector<2x16x1xf32> to vector<2x16x16xf32>
    %122 = arith.divf %118, %121 : vector<2x16x16xf32>
    "tpu.trace_start"() <{level = 10 : i32, message = "bqk,bkd->bqd"}> : () -> ()
    %cst_61 = arith.constant dense<0.000000e+00> : vector<2x16x8xf32>
    %123 = tpu.matmul %122, %112, %cst_61 {dimension_numbers = #tpu.dot_dimension_numbers<[2], [1], [1], [2], [0, 0, 0, 1, 1, 2], [0], [0]>} : vector<2x16x16xf32>, vector<2x16x8xf32>, vector<2x16x8xf32> -> vector<2x16x8xf32>
    "tpu.trace_stop"() : () -> ()
    %124 = vector.shape_cast %123 : vector<2x16x8xf32> to vector<32x8xf32>
    %125 = vector.extract_strided_slice %62 {offsets = [8, 0], sizes = [8, 32], strides = [1, 1]} : vector<32x32xf32> to vector<8x32xf32>
    %cst_62 = arith.constant dense<0.000000e+00> : vector<32x32xf32>
    %126 = tpu.matmul %124, %125, %cst_62 {dimension_numbers = #tpu.dot_dimension_numbers<[1], [0], [0], [1], [0, 0, 1, 1], [], []>} : vector<32x8xf32>, vector<8x32xf32>, vector<32x32xf32> -> vector<32x32xf32>
    %127 = arith.addf %109, %126 : vector<32x32xf32>
    %128 = vector.extract_strided_slice %90 {offsets = [0, 0, 16], sizes = [2, 16, 8], strides = [1, 1, 1]} : vector<2x16x96xf32> to vector<2x16x8xf32>
    %129 = vector.extract_strided_slice %90 {offsets = [0, 0, 48], sizes = [2, 16, 8], strides = [1, 1, 1]} : vector<2x16x96xf32> to vector<2x16x8xf32>
    %130 = vector.extract_strided_slice %90 {offsets = [0, 0, 80], sizes = [2, 16, 8], strides = [1, 1, 1]} : vector<2x16x96xf32> to vector<2x16x8xf32>
    "tpu.trace_start"() <{level = 10 : i32, message = "bqd,bkd->bqk"}> : () -> ()
    %cst_63 = arith.constant dense<0.000000e+00> : vector<2x16x16xf32>
    %131 = tpu.matmul %128, %129, %cst_63 {dimension_numbers = #tpu.dot_dimension_numbers<[2], [2], [1], [1], [0, 0, 0, 1, 1, 1], [0], [0]>} : vector<2x16x8xf32>, vector<2x16x8xf32>, vector<2x16x16xf32> -> vector<2x16x16xf32>
    "tpu.trace_stop"() : () -> ()
    %cst_64 = arith.constant dense<0xFF800000> : vector<2x16xf32>
    %132 = vector.multi_reduction <maximumf>, %131, %cst_64 [2] : vector<2x16x16xf32> to vector<2x16xf32>
    %133 = vector.shape_cast %132 : vector<2x16xf32> to vector<2x16x1xf32>
    %134 = vector.broadcast %133 : vector<2x16x1xf32> to vector<2x16x16xf32>
    %135 = arith.subf %131, %134 : vector<2x16x16xf32>
    %136 = math.exp %135 : vector<2x16x16xf32>
    %cst_65 = arith.constant dense<0.000000e+00> : vector<2x16xf32>
    %137 = vector.multi_reduction <add>, %136, %cst_65 [2] : vector<2x16x16xf32> to vector<2x16xf32>
    %138 = vector.shape_cast %137 : vector<2x16xf32> to vector<2x16x1xf32>
    %139 = vector.broadcast %138 : vector<2x16x1xf32> to vector<2x16x16xf32>
    %140 = arith.divf %136, %139 : vector<2x16x16xf32>
    "tpu.trace_start"() <{level = 10 : i32, message = "bqk,bkd->bqd"}> : () -> ()
    %cst_66 = arith.constant dense<0.000000e+00> : vector<2x16x8xf32>
    %141 = tpu.matmul %140, %130, %cst_66 {dimension_numbers = #tpu.dot_dimension_numbers<[2], [1], [1], [2], [0, 0, 0, 1, 1, 2], [0], [0]>} : vector<2x16x16xf32>, vector<2x16x8xf32>, vector<2x16x8xf32> -> vector<2x16x8xf32>
    "tpu.trace_stop"() : () -> ()
    %142 = vector.shape_cast %141 : vector<2x16x8xf32> to vector<32x8xf32>
    %143 = vector.extract_strided_slice %62 {offsets = [16, 0], sizes = [8, 32], strides = [1, 1]} : vector<32x32xf32> to vector<8x32xf32>
    %cst_67 = arith.constant dense<0.000000e+00> : vector<32x32xf32>
    %144 = tpu.matmul %142, %143, %cst_67 {dimension_numbers = #tpu.dot_dimension_numbers<[1], [0], [0], [1], [0, 0, 1, 1], [], []>} : vector<32x8xf32>, vector<8x32xf32>, vector<32x32xf32> -> vector<32x32xf32>
    %145 = arith.addf %127, %144 : vector<32x32xf32>
    %146 = vector.extract_strided_slice %90 {offsets = [0, 0, 24], sizes = [2, 16, 8], strides = [1, 1, 1]} : vector<2x16x96xf32> to vector<2x16x8xf32>
    %147 = vector.extract_strided_slice %90 {offsets = [0, 0, 56], sizes = [2, 16, 8], strides = [1, 1, 1]} : vector<2x16x96xf32> to vector<2x16x8xf32>
    %148 = vector.extract_strided_slice %90 {offsets = [0, 0, 88], sizes = [2, 16, 8], strides = [1, 1, 1]} : vector<2x16x96xf32> to vector<2x16x8xf32>
    "tpu.trace_start"() <{level = 10 : i32, message = "bqd,bkd->bqk"}> : () -> ()
    %cst_68 = arith.constant dense<0.000000e+00> : vector<2x16x16xf32>
    %149 = tpu.matmul %146, %147, %cst_68 {dimension_numbers = #tpu.dot_dimension_numbers<[2], [2], [1], [1], [0, 0, 0, 1, 1, 1], [0], [0]>} : vector<2x16x8xf32>, vector<2x16x8xf32>, vector<2x16x16xf32> -> vector<2x16x16xf32>
    "tpu.trace_stop"() : () -> ()
    %cst_69 = arith.constant dense<0xFF800000> : vector<2x16xf32>
    %150 = vector.multi_reduction <maximumf>, %149, %cst_69 [2] : vector<2x16x16xf32> to vector<2x16xf32>
    %151 = vector.shape_cast %150 : vector<2x16xf32> to vector<2x16x1xf32>
    %152 = vector.broadcast %151 : vector<2x16x1xf32> to vector<2x16x16xf32>
    %153 = arith.subf %149, %152 : vector<2x16x16xf32>
    %154 = math.exp %153 : vector<2x16x16xf32>
    %cst_70 = arith.constant dense<0.000000e+00> : vector<2x16xf32>
    %155 = vector.multi_reduction <add>, %154, %cst_70 [2] : vector<2x16x16xf32> to vector<2x16xf32>
    %156 = vector.shape_cast %155 : vector<2x16xf32> to vector<2x16x1xf32>
    %157 = vector.broadcast %156 : vector<2x16x1xf32> to vector<2x16x16xf32>
    %158 = arith.divf %154, %157 : vector<2x16x16xf32>
    "tpu.trace_start"() <{level = 10 : i32, message = "bqk,bkd->bqd"}> : () -> ()
    %cst_71 = arith.constant dense<0.000000e+00> : vector<2x16x8xf32>
    %159 = tpu.matmul %158, %148, %cst_71 {dimension_numbers = #tpu.dot_dimension_numbers<[2], [1], [1], [2], [0, 0, 0, 1, 1, 2], [0], [0]>} : vector<2x16x16xf32>, vector<2x16x8xf32>, vector<2x16x8xf32> -> vector<2x16x8xf32>
    "tpu.trace_stop"() : () -> ()
    %160 = vector.shape_cast %159 : vector<2x16x8xf32> to vector<32x8xf32>
    %161 = vector.extract_strided_slice %62 {offsets = [24, 0], sizes = [8, 32], strides = [1, 1]} : vector<32x32xf32> to vector<8x32xf32>
    %cst_72 = arith.constant dense<0.000000e+00> : vector<32x32xf32>
    %162 = tpu.matmul %160, %161, %cst_72 {dimension_numbers = #tpu.dot_dimension_numbers<[1], [0], [0], [1], [0, 0, 1, 1], [], []>} : vector<32x8xf32>, vector<8x32xf32>, vector<32x32xf32> -> vector<32x32xf32>
    %163 = arith.addf %145, %162 : vector<32x32xf32>
    %164 = vector.broadcast %64 : vector<1x32xf32> to vector<32x32xf32>
    %165 = arith.addf %163, %164 : vector<32x32xf32>
    %166 = arith.addf %52, %165 : vector<32x32xf32>
    %c0_73 = arith.constant 0 : index
    %c0_74 = arith.constant 0 : index
    %c0_75 = arith.constant 0 : index
    %167 = vector.load %arg15[%c0_73, %c0_74, %c0_75] : memref<1x1x32xf32, #tpu.memory_space<vmem>>, vector<1x1x32xf32>
    %168 = vector.shape_cast %167 : vector<1x1x32xf32> to vector<1x32xf32>
    %c0_76 = arith.constant 0 : index
    %c0_77 = arith.constant 0 : index
    %c0_78 = arith.constant 0 : index
    %169 = vector.load %arg16[%c0_76, %c0_77, %c0_78] : memref<1x1x32xf32, #tpu.memory_space<vmem>>, vector<1x1x32xf32>
    %170 = vector.shape_cast %169 : vector<1x1x32xf32> to vector<1x32xf32>
    %c0_79 = arith.constant 0 : index
    %c0_80 = arith.constant 0 : index
    %c0_81 = arith.constant 0 : index
    %171 = vector.load %arg17[%c0_79, %c0_80, %c0_81] : memref<1x32x32xf32, #tpu.memory_space<vmem>>, vector<1x32x32xf32>
    %172 = vector.shape_cast %171 : vector<1x32x32xf32> to vector<32x32xf32>
    %c0_82 = arith.constant 0 : index
    %c0_83 = arith.constant 0 : index
    %c0_84 = arith.constant 0 : index
    %173 = vector.load %arg18[%c0_82, %c0_83, %c0_84] : memref<1x1x32xf32, #tpu.memory_space<vmem>>, vector<1x1x32xf32>
    %174 = vector.shape_cast %173 : vector<1x1x32xf32> to vector<1x32xf32>
    %c0_85 = arith.constant 0 : index
    %c0_86 = arith.constant 0 : index
    %c0_87 = arith.constant 0 : index
    %175 = vector.load %arg19[%c0_85, %c0_86, %c0_87] : memref<1x32x32xf32, #tpu.memory_space<vmem>>, vector<1x32x32xf32>
    %176 = vector.shape_cast %175 : vector<1x32x32xf32> to vector<32x32xf32>
    %c0_88 = arith.constant 0 : index
    %c0_89 = arith.constant 0 : index
    %c0_90 = arith.constant 0 : index
    %177 = vector.load %arg20[%c0_88, %c0_89, %c0_90] : memref<1x1x32xf32, #tpu.memory_space<vmem>>, vector<1x1x32xf32>
    %178 = vector.shape_cast %177 : vector<1x1x32xf32> to vector<1x32xf32>
    %c0_91 = arith.constant 0 : index
    %c0_92 = arith.constant 0 : index
    %c0_93 = arith.constant 0 : index
    %179 = vector.load %arg21[%c0_91, %c0_92, %c0_93] : memref<1x31x32xf32, #tpu.memory_space<vmem>>, vector<1x31x32xf32>
    %180 = vector.shape_cast %179 : vector<1x31x32xf32> to vector<31x32xf32>
    %c0_94 = arith.constant 0 : index
    %c0_95 = arith.constant 0 : index
    %c0_96 = arith.constant 0 : index
    %181 = vector.load %arg22[%c0_94, %c0_95, %c0_96] : memref<1x1x32xf32, #tpu.memory_space<vmem>>, vector<1x1x32xf32>
    %182 = vector.shape_cast %181 : vector<1x1x32xf32> to vector<1x32xf32>
    %c0_97 = arith.constant 0 : index
    %c0_98 = arith.constant 0 : index
    %c0_99 = arith.constant 0 : index
    %183 = vector.load %arg23[%c0_97, %c0_98, %c0_99] : memref<1x1x32xf32, #tpu.memory_space<vmem>>, vector<1x1x32xf32>
    %184 = vector.shape_cast %183 : vector<1x1x32xf32> to vector<1x32xf32>
    %c0_100 = arith.constant 0 : index
    %c0_101 = arith.constant 0 : index
    %c0_102 = arith.constant 0 : index
    %185 = vector.load %arg24[%c0_100, %c0_101, %c0_102] : memref<1x1x32xf32, #tpu.memory_space<vmem>>, vector<1x1x32xf32>
    %186 = vector.shape_cast %185 : vector<1x1x32xf32> to vector<1x32xf32>
    %c0_103 = arith.constant 0 : index
    %c0_104 = arith.constant 0 : index
    %c0_105 = arith.constant 0 : index
    %187 = vector.load %arg25[%c0_103, %c0_104, %c0_105] : memref<1x32x32xf32, #tpu.memory_space<vmem>>, vector<1x32x32xf32>
    %188 = vector.shape_cast %187 : vector<1x32x32xf32> to vector<32x32xf32>
    %c0_106 = arith.constant 0 : index
    %c0_107 = arith.constant 0 : index
    %c0_108 = arith.constant 0 : index
    %189 = vector.load %arg26[%c0_106, %c0_107, %c0_108] : memref<1x1x32xf32, #tpu.memory_space<vmem>>, vector<1x1x32xf32>
    %190 = vector.shape_cast %189 : vector<1x1x32xf32> to vector<1x32xf32>
    %cst_109 = arith.constant dense<0.000000e+00> : vector<32xf32>
    %191 = vector.multi_reduction <add>, %166, %cst_109 [1] : vector<32x32xf32> to vector<32xf32>
    %192 = vector.shape_cast %191 : vector<32xf32> to vector<32x1xf32>
    %cst_110 = arith.constant 3.200000e+01 : f32
    %193 = vector.broadcast %cst_110 : f32 to vector<32x1xf32>
    %194 = arith.divf %192, %193 : vector<32x1xf32>
    %195 = vector.broadcast %194 : vector<32x1xf32> to vector<32x32xf32>
    %196 = arith.subf %166, %195 : vector<32x32xf32>
    %197 = arith.mulf %196, %196 : vector<32x32xf32>
    %cst_111 = arith.constant dense<0.000000e+00> : vector<32xf32>
    %198 = vector.multi_reduction <add>, %197, %cst_111 [1] : vector<32x32xf32> to vector<32xf32>
    %199 = vector.shape_cast %198 : vector<32xf32> to vector<32x1xf32>
    %cst_112 = arith.constant 3.200000e+01 : f32
    %200 = vector.broadcast %cst_112 : f32 to vector<32x1xf32>
    %201 = arith.divf %199, %200 : vector<32x1xf32>
    %202 = vector.broadcast %194 : vector<32x1xf32> to vector<32x32xf32>
    %203 = arith.subf %166, %202 : vector<32x32xf32>
    %cst_113 = arith.constant 9.99999974E-6 : f32
    %204 = vector.broadcast %cst_113 : f32 to vector<32x1xf32>
    %205 = arith.addf %201, %204 : vector<32x1xf32>
    %206 = math.rsqrt %205 : vector<32x1xf32>
    %207 = vector.broadcast %206 : vector<32x1xf32> to vector<32x32xf32>
    %208 = arith.mulf %203, %207 : vector<32x32xf32>
    %209 = vector.broadcast %168 : vector<1x32xf32> to vector<32x32xf32>
    %210 = arith.mulf %208, %209 : vector<32x32xf32>
    %211 = vector.broadcast %170 : vector<1x32xf32> to vector<32x32xf32>
    %212 = arith.addf %210, %211 : vector<32x32xf32>
    %cst_114 = arith.constant dense<0.000000e+00> : vector<32x32xf32>
    %213 = tpu.matmul %212, %172, %cst_114 {dimension_numbers = #tpu.dot_dimension_numbers<[1], [0], [0], [1], [0, 0, 1, 1], [], []>} : vector<32x32xf32>, vector<32x32xf32>, vector<32x32xf32> -> vector<32x32xf32>
    %214 = vector.broadcast %174 : vector<1x32xf32> to vector<32x32xf32>
    %215 = arith.addf %213, %214 : vector<32x32xf32>
    %cst_115 = arith.constant dense<0.000000e+00> : vector<32x32xf32>
    %216 = tpu.matmul %212, %176, %cst_115 {dimension_numbers = #tpu.dot_dimension_numbers<[1], [0], [0], [1], [0, 0, 1, 1], [], []>} : vector<32x32xf32>, vector<32x32xf32>, vector<32x32xf32> -> vector<32x32xf32>
    %217 = vector.broadcast %178 : vector<1x32xf32> to vector<32x32xf32>
    %218 = arith.addf %216, %217 : vector<32x32xf32>
    %219 = arith.negf %218 : vector<32x32xf32>
    %220 = math.exp %219 : vector<32x32xf32>
    %cst_116 = arith.constant 1.000000e+00 : f32
    %221 = vector.broadcast %cst_116 : f32 to vector<32x32xf32>
    %222 = arith.addf %221, %220 : vector<32x32xf32>
    %223 = arith.divf %221, %222 : vector<32x32xf32>
    %224 = arith.mulf %215, %223 : vector<32x32xf32>
    %225 = tpu.iota {dimensions = array<i32: 0>} : vector<32x32xi32>
    %c16_i32 = arith.constant 16 : i32
    %c0_i32_117 = arith.constant 0 : i32
    %226 = arith.cmpi eq, %c16_i32, %c0_i32_117 : i32
    %c1_i32 = arith.constant 1 : i32
    %227 = arith.select %226, %c1_i32, %c16_i32 : i32
    %228 = vector.broadcast %227 : i32 to vector<32x32xi32>
    %229 = arith.remsi %225, %228 : vector<32x32xi32>
    %c0_i32_118 = arith.constant 0 : i32
    %230 = vector.broadcast %c0_i32_118 : i32 to vector<32x32xi32>
    %231 = arith.cmpi ne, %229, %230 : vector<32x32xi32>
    %c0_i32_119 = arith.constant 0 : i32
    %232 = vector.broadcast %c0_i32_119 : i32 to vector<32x32xi32>
    %233 = arith.cmpi slt, %229, %232 : vector<32x32xi32>
    %c0_i32_120 = arith.constant 0 : i32
    %234 = arith.cmpi slt, %227, %c0_i32_120 : i32
    %235 = vector.broadcast %234 : i1 to vector<32x32xi1>
    %236 = vector.broadcast %235 : vector<32x32xi1> to vector<32x32xi1>
    %237 = arith.xori %233, %236 : vector<32x32xi1>
    %238 = arith.andi %237, %231 : vector<32x32xi1>
    %239 = vector.broadcast %227 : i32 to vector<32x32xi32>
    %240 = arith.addi %229, %239 : vector<32x32xi32>
    %241 = arith.select %238, %240, %229 : vector<32x32xi1>, vector<32x32xi32>
    %cst_121 = arith.constant 0.000000e+00 : f32
    %242 = vector.broadcast %cst_121 : f32 to vector<32x32xf32>
    %c15_i32 = arith.constant 15 : i32
    %243 = tpu.dynamic_rotate %224 by %c15_i32 dim 0 : vector<32x32xf32>, i32 -> vector<32x32xf32>
    %c15_i32_122 = arith.constant 15 : i32
    %244 = vector.broadcast %c15_i32_122 : i32 to vector<32x32xi32>
    %245 = arith.cmpi sge, %241, %244 : vector<32x32xi32>
    %c31_i32 = arith.constant 31 : i32
    %246 = vector.broadcast %c31_i32 : i32 to vector<32x32xi32>
    %247 = arith.cmpi slt, %241, %246 : vector<32x32xi32>
    %248 = arith.andi %245, %247 : vector<32x32xi1>
    %cst_123 = arith.constant 0.000000e+00 : f32
    %249 = vector.broadcast %cst_123 : f32 to vector<32x32xf32>
    %250 = arith.select %248, %243, %249 : vector<32x32xi1>, vector<32x32xf32>
    %251 = vector.extract_strided_slice %180 {offsets = [0, 0], sizes = [1, 32], strides = [1, 1]} : vector<31x32xf32> to vector<1x32xf32>
    %252 = vector.shape_cast %251 : vector<1x32xf32> to vector<32xf32>
    %253 = vector.shape_cast %252 : vector<32xf32> to vector<1x32xf32>
    %254 = vector.broadcast %253 : vector<1x32xf32> to vector<32x32xf32>
    %255 = arith.mulf %250, %254 : vector<32x32xf32>
    %256 = arith.addf %242, %255 : vector<32x32xf32>
    %c14_i32 = arith.constant 14 : i32
    %257 = tpu.dynamic_rotate %224 by %c14_i32 dim 0 : vector<32x32xf32>, i32 -> vector<32x32xf32>
    %c14_i32_124 = arith.constant 14 : i32
    %258 = vector.broadcast %c14_i32_124 : i32 to vector<32x32xi32>
    %259 = arith.cmpi sge, %241, %258 : vector<32x32xi32>
    %c30_i32 = arith.constant 30 : i32
    %260 = vector.broadcast %c30_i32 : i32 to vector<32x32xi32>
    %261 = arith.cmpi slt, %241, %260 : vector<32x32xi32>
    %262 = arith.andi %259, %261 : vector<32x32xi1>
    %cst_125 = arith.constant 0.000000e+00 : f32
    %263 = vector.broadcast %cst_125 : f32 to vector<32x32xf32>
    %264 = arith.select %262, %257, %263 : vector<32x32xi1>, vector<32x32xf32>
    %265 = vector.extract_strided_slice %180 {offsets = [1, 0], sizes = [1, 32], strides = [1, 1]} : vector<31x32xf32> to vector<1x32xf32>
    %266 = vector.shape_cast %265 : vector<1x32xf32> to vector<32xf32>
    %267 = vector.shape_cast %266 : vector<32xf32> to vector<1x32xf32>
    %268 = vector.broadcast %267 : vector<1x32xf32> to vector<32x32xf32>
    %269 = arith.mulf %264, %268 : vector<32x32xf32>
    %270 = arith.addf %256, %269 : vector<32x32xf32>
    %c13_i32 = arith.constant 13 : i32
    %271 = tpu.dynamic_rotate %224 by %c13_i32 dim 0 : vector<32x32xf32>, i32 -> vector<32x32xf32>
    %c13_i32_126 = arith.constant 13 : i32
    %272 = vector.broadcast %c13_i32_126 : i32 to vector<32x32xi32>
    %273 = arith.cmpi sge, %241, %272 : vector<32x32xi32>
    %c29_i32 = arith.constant 29 : i32
    %274 = vector.broadcast %c29_i32 : i32 to vector<32x32xi32>
    %275 = arith.cmpi slt, %241, %274 : vector<32x32xi32>
    %276 = arith.andi %273, %275 : vector<32x32xi1>
    %cst_127 = arith.constant 0.000000e+00 : f32
    %277 = vector.broadcast %cst_127 : f32 to vector<32x32xf32>
    %278 = arith.select %276, %271, %277 : vector<32x32xi1>, vector<32x32xf32>
    %279 = vector.extract_strided_slice %180 {offsets = [2, 0], sizes = [1, 32], strides = [1, 1]} : vector<31x32xf32> to vector<1x32xf32>
    %280 = vector.shape_cast %279 : vector<1x32xf32> to vector<32xf32>
    %281 = vector.shape_cast %280 : vector<32xf32> to vector<1x32xf32>
    %282 = vector.broadcast %281 : vector<1x32xf32> to vector<32x32xf32>
    %283 = arith.mulf %278, %282 : vector<32x32xf32>
    %284 = arith.addf %270, %283 : vector<32x32xf32>
    %c12_i32 = arith.constant 12 : i32
    %285 = tpu.dynamic_rotate %224 by %c12_i32 dim 0 : vector<32x32xf32>, i32 -> vector<32x32xf32>
    %c12_i32_128 = arith.constant 12 : i32
    %286 = vector.broadcast %c12_i32_128 : i32 to vector<32x32xi32>
    %287 = arith.cmpi sge, %241, %286 : vector<32x32xi32>
    %c28_i32 = arith.constant 28 : i32
    %288 = vector.broadcast %c28_i32 : i32 to vector<32x32xi32>
    %289 = arith.cmpi slt, %241, %288 : vector<32x32xi32>
    %290 = arith.andi %287, %289 : vector<32x32xi1>
    %cst_129 = arith.constant 0.000000e+00 : f32
    %291 = vector.broadcast %cst_129 : f32 to vector<32x32xf32>
    %292 = arith.select %290, %285, %291 : vector<32x32xi1>, vector<32x32xf32>
    %293 = vector.extract_strided_slice %180 {offsets = [3, 0], sizes = [1, 32], strides = [1, 1]} : vector<31x32xf32> to vector<1x32xf32>
    %294 = vector.shape_cast %293 : vector<1x32xf32> to vector<32xf32>
    %295 = vector.shape_cast %294 : vector<32xf32> to vector<1x32xf32>
    %296 = vector.broadcast %295 : vector<1x32xf32> to vector<32x32xf32>
    %297 = arith.mulf %292, %296 : vector<32x32xf32>
    %298 = arith.addf %284, %297 : vector<32x32xf32>
    %c11_i32 = arith.constant 11 : i32
    %299 = tpu.dynamic_rotate %224 by %c11_i32 dim 0 : vector<32x32xf32>, i32 -> vector<32x32xf32>
    %c11_i32_130 = arith.constant 11 : i32
    %300 = vector.broadcast %c11_i32_130 : i32 to vector<32x32xi32>
    %301 = arith.cmpi sge, %241, %300 : vector<32x32xi32>
    %c27_i32 = arith.constant 27 : i32
    %302 = vector.broadcast %c27_i32 : i32 to vector<32x32xi32>
    %303 = arith.cmpi slt, %241, %302 : vector<32x32xi32>
    %304 = arith.andi %301, %303 : vector<32x32xi1>
    %cst_131 = arith.constant 0.000000e+00 : f32
    %305 = vector.broadcast %cst_131 : f32 to vector<32x32xf32>
    %306 = arith.select %304, %299, %305 : vector<32x32xi1>, vector<32x32xf32>
    %307 = vector.extract_strided_slice %180 {offsets = [4, 0], sizes = [1, 32], strides = [1, 1]} : vector<31x32xf32> to vector<1x32xf32>
    %308 = vector.shape_cast %307 : vector<1x32xf32> to vector<32xf32>
    %309 = vector.shape_cast %308 : vector<32xf32> to vector<1x32xf32>
    %310 = vector.broadcast %309 : vector<1x32xf32> to vector<32x32xf32>
    %311 = arith.mulf %306, %310 : vector<32x32xf32>
    %312 = arith.addf %298, %311 : vector<32x32xf32>
    %c10_i32 = arith.constant 10 : i32
    %313 = tpu.dynamic_rotate %224 by %c10_i32 dim 0 : vector<32x32xf32>, i32 -> vector<32x32xf32>
    %c10_i32_132 = arith.constant 10 : i32
    %314 = vector.broadcast %c10_i32_132 : i32 to vector<32x32xi32>
    %315 = arith.cmpi sge, %241, %314 : vector<32x32xi32>
    %c26_i32 = arith.constant 26 : i32
    %316 = vector.broadcast %c26_i32 : i32 to vector<32x32xi32>
    %317 = arith.cmpi slt, %241, %316 : vector<32x32xi32>
    %318 = arith.andi %315, %317 : vector<32x32xi1>
    %cst_133 = arith.constant 0.000000e+00 : f32
    %319 = vector.broadcast %cst_133 : f32 to vector<32x32xf32>
    %320 = arith.select %318, %313, %319 : vector<32x32xi1>, vector<32x32xf32>
    %321 = vector.extract_strided_slice %180 {offsets = [5, 0], sizes = [1, 32], strides = [1, 1]} : vector<31x32xf32> to vector<1x32xf32>
    %322 = vector.shape_cast %321 : vector<1x32xf32> to vector<32xf32>
    %323 = vector.shape_cast %322 : vector<32xf32> to vector<1x32xf32>
    %324 = vector.broadcast %323 : vector<1x32xf32> to vector<32x32xf32>
    %325 = arith.mulf %320, %324 : vector<32x32xf32>
    %326 = arith.addf %312, %325 : vector<32x32xf32>
    %c9_i32 = arith.constant 9 : i32
    %327 = tpu.dynamic_rotate %224 by %c9_i32 dim 0 : vector<32x32xf32>, i32 -> vector<32x32xf32>
    %c9_i32_134 = arith.constant 9 : i32
    %328 = vector.broadcast %c9_i32_134 : i32 to vector<32x32xi32>
    %329 = arith.cmpi sge, %241, %328 : vector<32x32xi32>
    %c25_i32 = arith.constant 25 : i32
    %330 = vector.broadcast %c25_i32 : i32 to vector<32x32xi32>
    %331 = arith.cmpi slt, %241, %330 : vector<32x32xi32>
    %332 = arith.andi %329, %331 : vector<32x32xi1>
    %cst_135 = arith.constant 0.000000e+00 : f32
    %333 = vector.broadcast %cst_135 : f32 to vector<32x32xf32>
    %334 = arith.select %332, %327, %333 : vector<32x32xi1>, vector<32x32xf32>
    %335 = vector.extract_strided_slice %180 {offsets = [6, 0], sizes = [1, 32], strides = [1, 1]} : vector<31x32xf32> to vector<1x32xf32>
    %336 = vector.shape_cast %335 : vector<1x32xf32> to vector<32xf32>
    %337 = vector.shape_cast %336 : vector<32xf32> to vector<1x32xf32>
    %338 = vector.broadcast %337 : vector<1x32xf32> to vector<32x32xf32>
    %339 = arith.mulf %334, %338 : vector<32x32xf32>
    %340 = arith.addf %326, %339 : vector<32x32xf32>
    %c8_i32 = arith.constant 8 : i32
    %341 = tpu.dynamic_rotate %224 by %c8_i32 dim 0 : vector<32x32xf32>, i32 -> vector<32x32xf32>
    %c8_i32_136 = arith.constant 8 : i32
    %342 = vector.broadcast %c8_i32_136 : i32 to vector<32x32xi32>
    %343 = arith.cmpi sge, %241, %342 : vector<32x32xi32>
    %c24_i32 = arith.constant 24 : i32
    %344 = vector.broadcast %c24_i32 : i32 to vector<32x32xi32>
    %345 = arith.cmpi slt, %241, %344 : vector<32x32xi32>
    %346 = arith.andi %343, %345 : vector<32x32xi1>
    %cst_137 = arith.constant 0.000000e+00 : f32
    %347 = vector.broadcast %cst_137 : f32 to vector<32x32xf32>
    %348 = arith.select %346, %341, %347 : vector<32x32xi1>, vector<32x32xf32>
    %349 = vector.extract_strided_slice %180 {offsets = [7, 0], sizes = [1, 32], strides = [1, 1]} : vector<31x32xf32> to vector<1x32xf32>
    %350 = vector.shape_cast %349 : vector<1x32xf32> to vector<32xf32>
    %351 = vector.shape_cast %350 : vector<32xf32> to vector<1x32xf32>
    %352 = vector.broadcast %351 : vector<1x32xf32> to vector<32x32xf32>
    %353 = arith.mulf %348, %352 : vector<32x32xf32>
    %354 = arith.addf %340, %353 : vector<32x32xf32>
    %c7_i32 = arith.constant 7 : i32
    %355 = tpu.dynamic_rotate %224 by %c7_i32 dim 0 : vector<32x32xf32>, i32 -> vector<32x32xf32>
    %c7_i32_138 = arith.constant 7 : i32
    %356 = vector.broadcast %c7_i32_138 : i32 to vector<32x32xi32>
    %357 = arith.cmpi sge, %241, %356 : vector<32x32xi32>
    %c23_i32 = arith.constant 23 : i32
    %358 = vector.broadcast %c23_i32 : i32 to vector<32x32xi32>
    %359 = arith.cmpi slt, %241, %358 : vector<32x32xi32>
    %360 = arith.andi %357, %359 : vector<32x32xi1>
    %cst_139 = arith.constant 0.000000e+00 : f32
    %361 = vector.broadcast %cst_139 : f32 to vector<32x32xf32>
    %362 = arith.select %360, %355, %361 : vector<32x32xi1>, vector<32x32xf32>
    %363 = vector.extract_strided_slice %180 {offsets = [8, 0], sizes = [1, 32], strides = [1, 1]} : vector<31x32xf32> to vector<1x32xf32>
    %364 = vector.shape_cast %363 : vector<1x32xf32> to vector<32xf32>
    %365 = vector.shape_cast %364 : vector<32xf32> to vector<1x32xf32>
    %366 = vector.broadcast %365 : vector<1x32xf32> to vector<32x32xf32>
    %367 = arith.mulf %362, %366 : vector<32x32xf32>
    %368 = arith.addf %354, %367 : vector<32x32xf32>
    %c6_i32 = arith.constant 6 : i32
    %369 = tpu.dynamic_rotate %224 by %c6_i32 dim 0 : vector<32x32xf32>, i32 -> vector<32x32xf32>
    %c6_i32_140 = arith.constant 6 : i32
    %370 = vector.broadcast %c6_i32_140 : i32 to vector<32x32xi32>
    %371 = arith.cmpi sge, %241, %370 : vector<32x32xi32>
    %c22_i32 = arith.constant 22 : i32
    %372 = vector.broadcast %c22_i32 : i32 to vector<32x32xi32>
    %373 = arith.cmpi slt, %241, %372 : vector<32x32xi32>
    %374 = arith.andi %371, %373 : vector<32x32xi1>
    %cst_141 = arith.constant 0.000000e+00 : f32
    %375 = vector.broadcast %cst_141 : f32 to vector<32x32xf32>
    %376 = arith.select %374, %369, %375 : vector<32x32xi1>, vector<32x32xf32>
    %377 = vector.extract_strided_slice %180 {offsets = [9, 0], sizes = [1, 32], strides = [1, 1]} : vector<31x32xf32> to vector<1x32xf32>
    %378 = vector.shape_cast %377 : vector<1x32xf32> to vector<32xf32>
    %379 = vector.shape_cast %378 : vector<32xf32> to vector<1x32xf32>
    %380 = vector.broadcast %379 : vector<1x32xf32> to vector<32x32xf32>
    %381 = arith.mulf %376, %380 : vector<32x32xf32>
    %382 = arith.addf %368, %381 : vector<32x32xf32>
    %c5_i32 = arith.constant 5 : i32
    %383 = tpu.dynamic_rotate %224 by %c5_i32 dim 0 : vector<32x32xf32>, i32 -> vector<32x32xf32>
    %c5_i32_142 = arith.constant 5 : i32
    %384 = vector.broadcast %c5_i32_142 : i32 to vector<32x32xi32>
    %385 = arith.cmpi sge, %241, %384 : vector<32x32xi32>
    %c21_i32 = arith.constant 21 : i32
    %386 = vector.broadcast %c21_i32 : i32 to vector<32x32xi32>
    %387 = arith.cmpi slt, %241, %386 : vector<32x32xi32>
    %388 = arith.andi %385, %387 : vector<32x32xi1>
    %cst_143 = arith.constant 0.000000e+00 : f32
    %389 = vector.broadcast %cst_143 : f32 to vector<32x32xf32>
    %390 = arith.select %388, %383, %389 : vector<32x32xi1>, vector<32x32xf32>
    %391 = vector.extract_strided_slice %180 {offsets = [10, 0], sizes = [1, 32], strides = [1, 1]} : vector<31x32xf32> to vector<1x32xf32>
    %392 = vector.shape_cast %391 : vector<1x32xf32> to vector<32xf32>
    %393 = vector.shape_cast %392 : vector<32xf32> to vector<1x32xf32>
    %394 = vector.broadcast %393 : vector<1x32xf32> to vector<32x32xf32>
    %395 = arith.mulf %390, %394 : vector<32x32xf32>
    %396 = arith.addf %382, %395 : vector<32x32xf32>
    %c4_i32 = arith.constant 4 : i32
    %397 = tpu.dynamic_rotate %224 by %c4_i32 dim 0 : vector<32x32xf32>, i32 -> vector<32x32xf32>
    %c4_i32_144 = arith.constant 4 : i32
    %398 = vector.broadcast %c4_i32_144 : i32 to vector<32x32xi32>
    %399 = arith.cmpi sge, %241, %398 : vector<32x32xi32>
    %c20_i32 = arith.constant 20 : i32
    %400 = vector.broadcast %c20_i32 : i32 to vector<32x32xi32>
    %401 = arith.cmpi slt, %241, %400 : vector<32x32xi32>
    %402 = arith.andi %399, %401 : vector<32x32xi1>
    %cst_145 = arith.constant 0.000000e+00 : f32
    %403 = vector.broadcast %cst_145 : f32 to vector<32x32xf32>
    %404 = arith.select %402, %397, %403 : vector<32x32xi1>, vector<32x32xf32>
    %405 = vector.extract_strided_slice %180 {offsets = [11, 0], sizes = [1, 32], strides = [1, 1]} : vector<31x32xf32> to vector<1x32xf32>
    %406 = vector.shape_cast %405 : vector<1x32xf32> to vector<32xf32>
    %407 = vector.shape_cast %406 : vector<32xf32> to vector<1x32xf32>
    %408 = vector.broadcast %407 : vector<1x32xf32> to vector<32x32xf32>
    %409 = arith.mulf %404, %408 : vector<32x32xf32>
    %410 = arith.addf %396, %409 : vector<32x32xf32>
    %c3_i32 = arith.constant 3 : i32
    %411 = tpu.dynamic_rotate %224 by %c3_i32 dim 0 : vector<32x32xf32>, i32 -> vector<32x32xf32>
    %c3_i32_146 = arith.constant 3 : i32
    %412 = vector.broadcast %c3_i32_146 : i32 to vector<32x32xi32>
    %413 = arith.cmpi sge, %241, %412 : vector<32x32xi32>
    %c19_i32 = arith.constant 19 : i32
    %414 = vector.broadcast %c19_i32 : i32 to vector<32x32xi32>
    %415 = arith.cmpi slt, %241, %414 : vector<32x32xi32>
    %416 = arith.andi %413, %415 : vector<32x32xi1>
    %cst_147 = arith.constant 0.000000e+00 : f32
    %417 = vector.broadcast %cst_147 : f32 to vector<32x32xf32>
    %418 = arith.select %416, %411, %417 : vector<32x32xi1>, vector<32x32xf32>
    %419 = vector.extract_strided_slice %180 {offsets = [12, 0], sizes = [1, 32], strides = [1, 1]} : vector<31x32xf32> to vector<1x32xf32>
    %420 = vector.shape_cast %419 : vector<1x32xf32> to vector<32xf32>
    %421 = vector.shape_cast %420 : vector<32xf32> to vector<1x32xf32>
    %422 = vector.broadcast %421 : vector<1x32xf32> to vector<32x32xf32>
    %423 = arith.mulf %418, %422 : vector<32x32xf32>
    %424 = arith.addf %410, %423 : vector<32x32xf32>
    %c2_i32 = arith.constant 2 : i32
    %425 = tpu.dynamic_rotate %224 by %c2_i32 dim 0 : vector<32x32xf32>, i32 -> vector<32x32xf32>
    %c2_i32_148 = arith.constant 2 : i32
    %426 = vector.broadcast %c2_i32_148 : i32 to vector<32x32xi32>
    %427 = arith.cmpi sge, %241, %426 : vector<32x32xi32>
    %c18_i32 = arith.constant 18 : i32
    %428 = vector.broadcast %c18_i32 : i32 to vector<32x32xi32>
    %429 = arith.cmpi slt, %241, %428 : vector<32x32xi32>
    %430 = arith.andi %427, %429 : vector<32x32xi1>
    %cst_149 = arith.constant 0.000000e+00 : f32
    %431 = vector.broadcast %cst_149 : f32 to vector<32x32xf32>
    %432 = arith.select %430, %425, %431 : vector<32x32xi1>, vector<32x32xf32>
    %433 = vector.extract_strided_slice %180 {offsets = [13, 0], sizes = [1, 32], strides = [1, 1]} : vector<31x32xf32> to vector<1x32xf32>
    %434 = vector.shape_cast %433 : vector<1x32xf32> to vector<32xf32>
    %435 = vector.shape_cast %434 : vector<32xf32> to vector<1x32xf32>
    %436 = vector.broadcast %435 : vector<1x32xf32> to vector<32x32xf32>
    %437 = arith.mulf %432, %436 : vector<32x32xf32>
    %438 = arith.addf %424, %437 : vector<32x32xf32>
    %c1_i32_150 = arith.constant 1 : i32
    %439 = tpu.dynamic_rotate %224 by %c1_i32_150 dim 0 : vector<32x32xf32>, i32 -> vector<32x32xf32>
    %c1_i32_151 = arith.constant 1 : i32
    %440 = vector.broadcast %c1_i32_151 : i32 to vector<32x32xi32>
    %441 = arith.cmpi sge, %241, %440 : vector<32x32xi32>
    %c17_i32 = arith.constant 17 : i32
    %442 = vector.broadcast %c17_i32 : i32 to vector<32x32xi32>
    %443 = arith.cmpi slt, %241, %442 : vector<32x32xi32>
    %444 = arith.andi %441, %443 : vector<32x32xi1>
    %cst_152 = arith.constant 0.000000e+00 : f32
    %445 = vector.broadcast %cst_152 : f32 to vector<32x32xf32>
    %446 = arith.select %444, %439, %445 : vector<32x32xi1>, vector<32x32xf32>
    %447 = vector.extract_strided_slice %180 {offsets = [14, 0], sizes = [1, 32], strides = [1, 1]} : vector<31x32xf32> to vector<1x32xf32>
    %448 = vector.shape_cast %447 : vector<1x32xf32> to vector<32xf32>
    %449 = vector.shape_cast %448 : vector<32xf32> to vector<1x32xf32>
    %450 = vector.broadcast %449 : vector<1x32xf32> to vector<32x32xf32>
    %451 = arith.mulf %446, %450 : vector<32x32xf32>
    %452 = arith.addf %438, %451 : vector<32x32xf32>
    %c0_i32_153 = arith.constant 0 : i32
    %453 = vector.broadcast %c0_i32_153 : i32 to vector<32x32xi32>
    %454 = arith.cmpi sge, %241, %453 : vector<32x32xi32>
    %c16_i32_154 = arith.constant 16 : i32
    %455 = vector.broadcast %c16_i32_154 : i32 to vector<32x32xi32>
    %456 = arith.cmpi slt, %241, %455 : vector<32x32xi32>
    %457 = arith.andi %454, %456 : vector<32x32xi1>
    %cst_155 = arith.constant 0.000000e+00 : f32
    %458 = vector.broadcast %cst_155 : f32 to vector<32x32xf32>
    %459 = arith.select %457, %224, %458 : vector<32x32xi1>, vector<32x32xf32>
    %460 = vector.extract_strided_slice %180 {offsets = [15, 0], sizes = [1, 32], strides = [1, 1]} : vector<31x32xf32> to vector<1x32xf32>
    %461 = vector.shape_cast %460 : vector<1x32xf32> to vector<32xf32>
    %462 = vector.shape_cast %461 : vector<32xf32> to vector<1x32xf32>
    %463 = vector.broadcast %462 : vector<1x32xf32> to vector<32x32xf32>
    %464 = arith.mulf %459, %463 : vector<32x32xf32>
    %465 = arith.addf %452, %464 : vector<32x32xf32>
    %c31_i32_156 = arith.constant 31 : i32
    %466 = tpu.dynamic_rotate %224 by %c31_i32_156 dim 0 : vector<32x32xf32>, i32 -> vector<32x32xf32>
    %c-1_i32 = arith.constant -1 : i32
    %467 = vector.broadcast %c-1_i32 : i32 to vector<32x32xi32>
    %468 = arith.cmpi sge, %241, %467 : vector<32x32xi32>
    %c15_i32_157 = arith.constant 15 : i32
    %469 = vector.broadcast %c15_i32_157 : i32 to vector<32x32xi32>
    %470 = arith.cmpi slt, %241, %469 : vector<32x32xi32>
    %471 = arith.andi %468, %470 : vector<32x32xi1>
    %cst_158 = arith.constant 0.000000e+00 : f32
    %472 = vector.broadcast %cst_158 : f32 to vector<32x32xf32>
    %473 = arith.select %471, %466, %472 : vector<32x32xi1>, vector<32x32xf32>
    %474 = vector.extract_strided_slice %180 {offsets = [16, 0], sizes = [1, 32], strides = [1, 1]} : vector<31x32xf32> to vector<1x32xf32>
    %475 = vector.shape_cast %474 : vector<1x32xf32> to vector<32xf32>
    %476 = vector.shape_cast %475 : vector<32xf32> to vector<1x32xf32>
    %477 = vector.broadcast %476 : vector<1x32xf32> to vector<32x32xf32>
    %478 = arith.mulf %473, %477 : vector<32x32xf32>
    %479 = arith.addf %465, %478 : vector<32x32xf32>
    %c30_i32_159 = arith.constant 30 : i32
    %480 = tpu.dynamic_rotate %224 by %c30_i32_159 dim 0 : vector<32x32xf32>, i32 -> vector<32x32xf32>
    %c-2_i32 = arith.constant -2 : i32
    %481 = vector.broadcast %c-2_i32 : i32 to vector<32x32xi32>
    %482 = arith.cmpi sge, %241, %481 : vector<32x32xi32>
    %c14_i32_160 = arith.constant 14 : i32
    %483 = vector.broadcast %c14_i32_160 : i32 to vector<32x32xi32>
    %484 = arith.cmpi slt, %241, %483 : vector<32x32xi32>
    %485 = arith.andi %482, %484 : vector<32x32xi1>
    %cst_161 = arith.constant 0.000000e+00 : f32
    %486 = vector.broadcast %cst_161 : f32 to vector<32x32xf32>
    %487 = arith.select %485, %480, %486 : vector<32x32xi1>, vector<32x32xf32>
    %488 = vector.extract_strided_slice %180 {offsets = [17, 0], sizes = [1, 32], strides = [1, 1]} : vector<31x32xf32> to vector<1x32xf32>
    %489 = vector.shape_cast %488 : vector<1x32xf32> to vector<32xf32>
    %490 = vector.shape_cast %489 : vector<32xf32> to vector<1x32xf32>
    %491 = vector.broadcast %490 : vector<1x32xf32> to vector<32x32xf32>
    %492 = arith.mulf %487, %491 : vector<32x32xf32>
    %493 = arith.addf %479, %492 : vector<32x32xf32>
    %c29_i32_162 = arith.constant 29 : i32
    %494 = tpu.dynamic_rotate %224 by %c29_i32_162 dim 0 : vector<32x32xf32>, i32 -> vector<32x32xf32>
    %c-3_i32 = arith.constant -3 : i32
    %495 = vector.broadcast %c-3_i32 : i32 to vector<32x32xi32>
    %496 = arith.cmpi sge, %241, %495 : vector<32x32xi32>
    %c13_i32_163 = arith.constant 13 : i32
    %497 = vector.broadcast %c13_i32_163 : i32 to vector<32x32xi32>
    %498 = arith.cmpi slt, %241, %497 : vector<32x32xi32>
    %499 = arith.andi %496, %498 : vector<32x32xi1>
    %cst_164 = arith.constant 0.000000e+00 : f32
    %500 = vector.broadcast %cst_164 : f32 to vector<32x32xf32>
    %501 = arith.select %499, %494, %500 : vector<32x32xi1>, vector<32x32xf32>
    %502 = vector.extract_strided_slice %180 {offsets = [18, 0], sizes = [1, 32], strides = [1, 1]} : vector<31x32xf32> to vector<1x32xf32>
    %503 = vector.shape_cast %502 : vector<1x32xf32> to vector<32xf32>
    %504 = vector.shape_cast %503 : vector<32xf32> to vector<1x32xf32>
    %505 = vector.broadcast %504 : vector<1x32xf32> to vector<32x32xf32>
    %506 = arith.mulf %501, %505 : vector<32x32xf32>
    %507 = arith.addf %493, %506 : vector<32x32xf32>
    %c28_i32_165 = arith.constant 28 : i32
    %508 = tpu.dynamic_rotate %224 by %c28_i32_165 dim 0 : vector<32x32xf32>, i32 -> vector<32x32xf32>
    %c-4_i32 = arith.constant -4 : i32
    %509 = vector.broadcast %c-4_i32 : i32 to vector<32x32xi32>
    %510 = arith.cmpi sge, %241, %509 : vector<32x32xi32>
    %c12_i32_166 = arith.constant 12 : i32
    %511 = vector.broadcast %c12_i32_166 : i32 to vector<32x32xi32>
    %512 = arith.cmpi slt, %241, %511 : vector<32x32xi32>
    %513 = arith.andi %510, %512 : vector<32x32xi1>
    %cst_167 = arith.constant 0.000000e+00 : f32
    %514 = vector.broadcast %cst_167 : f32 to vector<32x32xf32>
    %515 = arith.select %513, %508, %514 : vector<32x32xi1>, vector<32x32xf32>
    %516 = vector.extract_strided_slice %180 {offsets = [19, 0], sizes = [1, 32], strides = [1, 1]} : vector<31x32xf32> to vector<1x32xf32>
    %517 = vector.shape_cast %516 : vector<1x32xf32> to vector<32xf32>
    %518 = vector.shape_cast %517 : vector<32xf32> to vector<1x32xf32>
    %519 = vector.broadcast %518 : vector<1x32xf32> to vector<32x32xf32>
    %520 = arith.mulf %515, %519 : vector<32x32xf32>
    %521 = arith.addf %507, %520 : vector<32x32xf32>
    %c27_i32_168 = arith.constant 27 : i32
    %522 = tpu.dynamic_rotate %224 by %c27_i32_168 dim 0 : vector<32x32xf32>, i32 -> vector<32x32xf32>
    %c-5_i32 = arith.constant -5 : i32
    %523 = vector.broadcast %c-5_i32 : i32 to vector<32x32xi32>
    %524 = arith.cmpi sge, %241, %523 : vector<32x32xi32>
    %c11_i32_169 = arith.constant 11 : i32
    %525 = vector.broadcast %c11_i32_169 : i32 to vector<32x32xi32>
    %526 = arith.cmpi slt, %241, %525 : vector<32x32xi32>
    %527 = arith.andi %524, %526 : vector<32x32xi1>
    %cst_170 = arith.constant 0.000000e+00 : f32
    %528 = vector.broadcast %cst_170 : f32 to vector<32x32xf32>
    %529 = arith.select %527, %522, %528 : vector<32x32xi1>, vector<32x32xf32>
    %530 = vector.extract_strided_slice %180 {offsets = [20, 0], sizes = [1, 32], strides = [1, 1]} : vector<31x32xf32> to vector<1x32xf32>
    %531 = vector.shape_cast %530 : vector<1x32xf32> to vector<32xf32>
    %532 = vector.shape_cast %531 : vector<32xf32> to vector<1x32xf32>
    %533 = vector.broadcast %532 : vector<1x32xf32> to vector<32x32xf32>
    %534 = arith.mulf %529, %533 : vector<32x32xf32>
    %535 = arith.addf %521, %534 : vector<32x32xf32>
    %c26_i32_171 = arith.constant 26 : i32
    %536 = tpu.dynamic_rotate %224 by %c26_i32_171 dim 0 : vector<32x32xf32>, i32 -> vector<32x32xf32>
    %c-6_i32 = arith.constant -6 : i32
    %537 = vector.broadcast %c-6_i32 : i32 to vector<32x32xi32>
    %538 = arith.cmpi sge, %241, %537 : vector<32x32xi32>
    %c10_i32_172 = arith.constant 10 : i32
    %539 = vector.broadcast %c10_i32_172 : i32 to vector<32x32xi32>
    %540 = arith.cmpi slt, %241, %539 : vector<32x32xi32>
    %541 = arith.andi %538, %540 : vector<32x32xi1>
    %cst_173 = arith.constant 0.000000e+00 : f32
    %542 = vector.broadcast %cst_173 : f32 to vector<32x32xf32>
    %543 = arith.select %541, %536, %542 : vector<32x32xi1>, vector<32x32xf32>
    %544 = vector.extract_strided_slice %180 {offsets = [21, 0], sizes = [1, 32], strides = [1, 1]} : vector<31x32xf32> to vector<1x32xf32>
    %545 = vector.shape_cast %544 : vector<1x32xf32> to vector<32xf32>
    %546 = vector.shape_cast %545 : vector<32xf32> to vector<1x32xf32>
    %547 = vector.broadcast %546 : vector<1x32xf32> to vector<32x32xf32>
    %548 = arith.mulf %543, %547 : vector<32x32xf32>
    %549 = arith.addf %535, %548 : vector<32x32xf32>
    %c25_i32_174 = arith.constant 25 : i32
    %550 = tpu.dynamic_rotate %224 by %c25_i32_174 dim 0 : vector<32x32xf32>, i32 -> vector<32x32xf32>
    %c-7_i32 = arith.constant -7 : i32
    %551 = vector.broadcast %c-7_i32 : i32 to vector<32x32xi32>
    %552 = arith.cmpi sge, %241, %551 : vector<32x32xi32>
    %c9_i32_175 = arith.constant 9 : i32
    %553 = vector.broadcast %c9_i32_175 : i32 to vector<32x32xi32>
    %554 = arith.cmpi slt, %241, %553 : vector<32x32xi32>
    %555 = arith.andi %552, %554 : vector<32x32xi1>
    %cst_176 = arith.constant 0.000000e+00 : f32
    %556 = vector.broadcast %cst_176 : f32 to vector<32x32xf32>
    %557 = arith.select %555, %550, %556 : vector<32x32xi1>, vector<32x32xf32>
    %558 = vector.extract_strided_slice %180 {offsets = [22, 0], sizes = [1, 32], strides = [1, 1]} : vector<31x32xf32> to vector<1x32xf32>
    %559 = vector.shape_cast %558 : vector<1x32xf32> to vector<32xf32>
    %560 = vector.shape_cast %559 : vector<32xf32> to vector<1x32xf32>
    %561 = vector.broadcast %560 : vector<1x32xf32> to vector<32x32xf32>
    %562 = arith.mulf %557, %561 : vector<32x32xf32>
    %563 = arith.addf %549, %562 : vector<32x32xf32>
    %c24_i32_177 = arith.constant 24 : i32
    %564 = tpu.dynamic_rotate %224 by %c24_i32_177 dim 0 : vector<32x32xf32>, i32 -> vector<32x32xf32>
    %c-8_i32 = arith.constant -8 : i32
    %565 = vector.broadcast %c-8_i32 : i32 to vector<32x32xi32>
    %566 = arith.cmpi sge, %241, %565 : vector<32x32xi32>
    %c8_i32_178 = arith.constant 8 : i32
    %567 = vector.broadcast %c8_i32_178 : i32 to vector<32x32xi32>
    %568 = arith.cmpi slt, %241, %567 : vector<32x32xi32>
    %569 = arith.andi %566, %568 : vector<32x32xi1>
    %cst_179 = arith.constant 0.000000e+00 : f32
    %570 = vector.broadcast %cst_179 : f32 to vector<32x32xf32>
    %571 = arith.select %569, %564, %570 : vector<32x32xi1>, vector<32x32xf32>
    %572 = vector.extract_strided_slice %180 {offsets = [23, 0], sizes = [1, 32], strides = [1, 1]} : vector<31x32xf32> to vector<1x32xf32>
    %573 = vector.shape_cast %572 : vector<1x32xf32> to vector<32xf32>
    %574 = vector.shape_cast %573 : vector<32xf32> to vector<1x32xf32>
    %575 = vector.broadcast %574 : vector<1x32xf32> to vector<32x32xf32>
    %576 = arith.mulf %571, %575 : vector<32x32xf32>
    %577 = arith.addf %563, %576 : vector<32x32xf32>
    %c23_i32_180 = arith.constant 23 : i32
    %578 = tpu.dynamic_rotate %224 by %c23_i32_180 dim 0 : vector<32x32xf32>, i32 -> vector<32x32xf32>
    %c-9_i32 = arith.constant -9 : i32
    %579 = vector.broadcast %c-9_i32 : i32 to vector<32x32xi32>
    %580 = arith.cmpi sge, %241, %579 : vector<32x32xi32>
    %c7_i32_181 = arith.constant 7 : i32
    %581 = vector.broadcast %c7_i32_181 : i32 to vector<32x32xi32>
    %582 = arith.cmpi slt, %241, %581 : vector<32x32xi32>
    %583 = arith.andi %580, %582 : vector<32x32xi1>
    %cst_182 = arith.constant 0.000000e+00 : f32
    %584 = vector.broadcast %cst_182 : f32 to vector<32x32xf32>
    %585 = arith.select %583, %578, %584 : vector<32x32xi1>, vector<32x32xf32>
    %586 = vector.extract_strided_slice %180 {offsets = [24, 0], sizes = [1, 32], strides = [1, 1]} : vector<31x32xf32> to vector<1x32xf32>
    %587 = vector.shape_cast %586 : vector<1x32xf32> to vector<32xf32>
    %588 = vector.shape_cast %587 : vector<32xf32> to vector<1x32xf32>
    %589 = vector.broadcast %588 : vector<1x32xf32> to vector<32x32xf32>
    %590 = arith.mulf %585, %589 : vector<32x32xf32>
    %591 = arith.addf %577, %590 : vector<32x32xf32>
    %c22_i32_183 = arith.constant 22 : i32
    %592 = tpu.dynamic_rotate %224 by %c22_i32_183 dim 0 : vector<32x32xf32>, i32 -> vector<32x32xf32>
    %c-10_i32 = arith.constant -10 : i32
    %593 = vector.broadcast %c-10_i32 : i32 to vector<32x32xi32>
    %594 = arith.cmpi sge, %241, %593 : vector<32x32xi32>
    %c6_i32_184 = arith.constant 6 : i32
    %595 = vector.broadcast %c6_i32_184 : i32 to vector<32x32xi32>
    %596 = arith.cmpi slt, %241, %595 : vector<32x32xi32>
    %597 = arith.andi %594, %596 : vector<32x32xi1>
    %cst_185 = arith.constant 0.000000e+00 : f32
    %598 = vector.broadcast %cst_185 : f32 to vector<32x32xf32>
    %599 = arith.select %597, %592, %598 : vector<32x32xi1>, vector<32x32xf32>
    %600 = vector.extract_strided_slice %180 {offsets = [25, 0], sizes = [1, 32], strides = [1, 1]} : vector<31x32xf32> to vector<1x32xf32>
    %601 = vector.shape_cast %600 : vector<1x32xf32> to vector<32xf32>
    %602 = vector.shape_cast %601 : vector<32xf32> to vector<1x32xf32>
    %603 = vector.broadcast %602 : vector<1x32xf32> to vector<32x32xf32>
    %604 = arith.mulf %599, %603 : vector<32x32xf32>
    %605 = arith.addf %591, %604 : vector<32x32xf32>
    %c21_i32_186 = arith.constant 21 : i32
    %606 = tpu.dynamic_rotate %224 by %c21_i32_186 dim 0 : vector<32x32xf32>, i32 -> vector<32x32xf32>
    %c-11_i32 = arith.constant -11 : i32
    %607 = vector.broadcast %c-11_i32 : i32 to vector<32x32xi32>
    %608 = arith.cmpi sge, %241, %607 : vector<32x32xi32>
    %c5_i32_187 = arith.constant 5 : i32
    %609 = vector.broadcast %c5_i32_187 : i32 to vector<32x32xi32>
    %610 = arith.cmpi slt, %241, %609 : vector<32x32xi32>
    %611 = arith.andi %608, %610 : vector<32x32xi1>
    %cst_188 = arith.constant 0.000000e+00 : f32
    %612 = vector.broadcast %cst_188 : f32 to vector<32x32xf32>
    %613 = arith.select %611, %606, %612 : vector<32x32xi1>, vector<32x32xf32>
    %614 = vector.extract_strided_slice %180 {offsets = [26, 0], sizes = [1, 32], strides = [1, 1]} : vector<31x32xf32> to vector<1x32xf32>
    %615 = vector.shape_cast %614 : vector<1x32xf32> to vector<32xf32>
    %616 = vector.shape_cast %615 : vector<32xf32> to vector<1x32xf32>
    %617 = vector.broadcast %616 : vector<1x32xf32> to vector<32x32xf32>
    %618 = arith.mulf %613, %617 : vector<32x32xf32>
    %619 = arith.addf %605, %618 : vector<32x32xf32>
    %c20_i32_189 = arith.constant 20 : i32
    %620 = tpu.dynamic_rotate %224 by %c20_i32_189 dim 0 : vector<32x32xf32>, i32 -> vector<32x32xf32>
    %c-12_i32 = arith.constant -12 : i32
    %621 = vector.broadcast %c-12_i32 : i32 to vector<32x32xi32>
    %622 = arith.cmpi sge, %241, %621 : vector<32x32xi32>
    %c4_i32_190 = arith.constant 4 : i32
    %623 = vector.broadcast %c4_i32_190 : i32 to vector<32x32xi32>
    %624 = arith.cmpi slt, %241, %623 : vector<32x32xi32>
    %625 = arith.andi %622, %624 : vector<32x32xi1>
    %cst_191 = arith.constant 0.000000e+00 : f32
    %626 = vector.broadcast %cst_191 : f32 to vector<32x32xf32>
    %627 = arith.select %625, %620, %626 : vector<32x32xi1>, vector<32x32xf32>
    %628 = vector.extract_strided_slice %180 {offsets = [27, 0], sizes = [1, 32], strides = [1, 1]} : vector<31x32xf32> to vector<1x32xf32>
    %629 = vector.shape_cast %628 : vector<1x32xf32> to vector<32xf32>
    %630 = vector.shape_cast %629 : vector<32xf32> to vector<1x32xf32>
    %631 = vector.broadcast %630 : vector<1x32xf32> to vector<32x32xf32>
    %632 = arith.mulf %627, %631 : vector<32x32xf32>
    %633 = arith.addf %619, %632 : vector<32x32xf32>
    %c19_i32_192 = arith.constant 19 : i32
    %634 = tpu.dynamic_rotate %224 by %c19_i32_192 dim 0 : vector<32x32xf32>, i32 -> vector<32x32xf32>
    %c-13_i32 = arith.constant -13 : i32
    %635 = vector.broadcast %c-13_i32 : i32 to vector<32x32xi32>
    %636 = arith.cmpi sge, %241, %635 : vector<32x32xi32>
    %c3_i32_193 = arith.constant 3 : i32
    %637 = vector.broadcast %c3_i32_193 : i32 to vector<32x32xi32>
    %638 = arith.cmpi slt, %241, %637 : vector<32x32xi32>
    %639 = arith.andi %636, %638 : vector<32x32xi1>
    %cst_194 = arith.constant 0.000000e+00 : f32
    %640 = vector.broadcast %cst_194 : f32 to vector<32x32xf32>
    %641 = arith.select %639, %634, %640 : vector<32x32xi1>, vector<32x32xf32>
    %642 = vector.extract_strided_slice %180 {offsets = [28, 0], sizes = [1, 32], strides = [1, 1]} : vector<31x32xf32> to vector<1x32xf32>
    %643 = vector.shape_cast %642 : vector<1x32xf32> to vector<32xf32>
    %644 = vector.shape_cast %643 : vector<32xf32> to vector<1x32xf32>
    %645 = vector.broadcast %644 : vector<1x32xf32> to vector<32x32xf32>
    %646 = arith.mulf %641, %645 : vector<32x32xf32>
    %647 = arith.addf %633, %646 : vector<32x32xf32>
    %c18_i32_195 = arith.constant 18 : i32
    %648 = tpu.dynamic_rotate %224 by %c18_i32_195 dim 0 : vector<32x32xf32>, i32 -> vector<32x32xf32>
    %c-14_i32 = arith.constant -14 : i32
    %649 = vector.broadcast %c-14_i32 : i32 to vector<32x32xi32>
    %650 = arith.cmpi sge, %241, %649 : vector<32x32xi32>
    %c2_i32_196 = arith.constant 2 : i32
    %651 = vector.broadcast %c2_i32_196 : i32 to vector<32x32xi32>
    %652 = arith.cmpi slt, %241, %651 : vector<32x32xi32>
    %653 = arith.andi %650, %652 : vector<32x32xi1>
    %cst_197 = arith.constant 0.000000e+00 : f32
    %654 = vector.broadcast %cst_197 : f32 to vector<32x32xf32>
    %655 = arith.select %653, %648, %654 : vector<32x32xi1>, vector<32x32xf32>
    %656 = vector.extract_strided_slice %180 {offsets = [29, 0], sizes = [1, 32], strides = [1, 1]} : vector<31x32xf32> to vector<1x32xf32>
    %657 = vector.shape_cast %656 : vector<1x32xf32> to vector<32xf32>
    %658 = vector.shape_cast %657 : vector<32xf32> to vector<1x32xf32>
    %659 = vector.broadcast %658 : vector<1x32xf32> to vector<32x32xf32>
    %660 = arith.mulf %655, %659 : vector<32x32xf32>
    %661 = arith.addf %647, %660 : vector<32x32xf32>
    %c17_i32_198 = arith.constant 17 : i32
    %662 = tpu.dynamic_rotate %224 by %c17_i32_198 dim 0 : vector<32x32xf32>, i32 -> vector<32x32xf32>
    %c-15_i32 = arith.constant -15 : i32
    %663 = vector.broadcast %c-15_i32 : i32 to vector<32x32xi32>
    %664 = arith.cmpi sge, %241, %663 : vector<32x32xi32>
    %c1_i32_199 = arith.constant 1 : i32
    %665 = vector.broadcast %c1_i32_199 : i32 to vector<32x32xi32>
    %666 = arith.cmpi slt, %241, %665 : vector<32x32xi32>
    %667 = arith.andi %664, %666 : vector<32x32xi1>
    %cst_200 = arith.constant 0.000000e+00 : f32
    %668 = vector.broadcast %cst_200 : f32 to vector<32x32xf32>
    %669 = arith.select %667, %662, %668 : vector<32x32xi1>, vector<32x32xf32>
    %670 = vector.extract_strided_slice %180 {offsets = [30, 0], sizes = [1, 32], strides = [1, 1]} : vector<31x32xf32> to vector<1x32xf32>
    %671 = vector.shape_cast %670 : vector<1x32xf32> to vector<32xf32>
    %672 = vector.shape_cast %671 : vector<32xf32> to vector<1x32xf32>
    %673 = vector.broadcast %672 : vector<1x32xf32> to vector<32x32xf32>
    %674 = arith.mulf %669, %673 : vector<32x32xf32>
    %675 = arith.addf %661, %674 : vector<32x32xf32>
    %676 = vector.broadcast %182 : vector<1x32xf32> to vector<32x32xf32>
    %677 = arith.addf %675, %676 : vector<32x32xf32>
    %678 = vector.broadcast %184 : vector<1x32xf32> to vector<32x32xf32>
    %679 = arith.mulf %677, %678 : vector<32x32xf32>
    %680 = vector.broadcast %186 : vector<1x32xf32> to vector<32x32xf32>
    %681 = arith.addf %679, %680 : vector<32x32xf32>
    %682 = arith.negf %681 : vector<32x32xf32>
    %683 = math.exp %682 : vector<32x32xf32>
    %cst_201 = arith.constant 1.000000e+00 : f32
    %684 = vector.broadcast %cst_201 : f32 to vector<32x32xf32>
    %685 = arith.addf %684, %683 : vector<32x32xf32>
    %686 = arith.divf %684, %685 : vector<32x32xf32>
    %687 = arith.mulf %681, %686 : vector<32x32xf32>
    %cst_202 = arith.constant dense<0.000000e+00> : vector<32x32xf32>
    %688 = tpu.matmul %687, %188, %cst_202 {dimension_numbers = #tpu.dot_dimension_numbers<[1], [0], [0], [1], [0, 0, 1, 1], [], []>} : vector<32x32xf32>, vector<32x32xf32>, vector<32x32xf32> -> vector<32x32xf32>
    %689 = vector.broadcast %190 : vector<1x32xf32> to vector<32x32xf32>
    %690 = arith.addf %688, %689 : vector<32x32xf32>
    %691 = arith.addf %166, %690 : vector<32x32xf32>
    %c0_203 = arith.constant 0 : index
    %c0_204 = arith.constant 0 : index
    %c0_205 = arith.constant 0 : index
    %692 = vector.load %arg27[%c0_203, %c0_204, %c0_205] : memref<1x1x32xf32, #tpu.memory_space<vmem>>, vector<1x1x32xf32>
    %693 = vector.shape_cast %692 : vector<1x1x32xf32> to vector<1x32xf32>
    %c0_206 = arith.constant 0 : index
    %c0_207 = arith.constant 0 : index
    %c0_208 = arith.constant 0 : index
    %694 = vector.load %arg28[%c0_206, %c0_207, %c0_208] : memref<1x1x32xf32, #tpu.memory_space<vmem>>, vector<1x1x32xf32>
    %695 = vector.shape_cast %694 : vector<1x1x32xf32> to vector<1x32xf32>
    %c0_209 = arith.constant 0 : index
    %c0_210 = arith.constant 0 : index
    %c0_211 = arith.constant 0 : index
    %696 = vector.load %arg29[%c0_209, %c0_210, %c0_211] : memref<1x32x128xf32, #tpu.memory_space<vmem>>, vector<1x32x128xf32>
    %697 = vector.shape_cast %696 : vector<1x32x128xf32> to vector<32x128xf32>
    %c0_212 = arith.constant 0 : index
    %c0_213 = arith.constant 0 : index
    %c0_214 = arith.constant 0 : index
    %698 = vector.load %arg30[%c0_212, %c0_213, %c0_214] : memref<1x1x128xf32, #tpu.memory_space<vmem>>, vector<1x1x128xf32>
    %699 = vector.shape_cast %698 : vector<1x1x128xf32> to vector<1x128xf32>
    %c0_215 = arith.constant 0 : index
    %c0_216 = arith.constant 0 : index
    %c0_217 = arith.constant 0 : index
    %700 = vector.load %arg31[%c0_215, %c0_216, %c0_217] : memref<1x128x32xf32, #tpu.memory_space<vmem>>, vector<1x128x32xf32>
    %701 = vector.shape_cast %700 : vector<1x128x32xf32> to vector<128x32xf32>
    %c0_218 = arith.constant 0 : index
    %c0_219 = arith.constant 0 : index
    %c0_220 = arith.constant 0 : index
    %702 = vector.load %arg32[%c0_218, %c0_219, %c0_220] : memref<1x1x32xf32, #tpu.memory_space<vmem>>, vector<1x1x32xf32>
    %703 = vector.shape_cast %702 : vector<1x1x32xf32> to vector<1x32xf32>
    %cst_221 = arith.constant dense<0.000000e+00> : vector<32xf32>
    %704 = vector.multi_reduction <add>, %691, %cst_221 [1] : vector<32x32xf32> to vector<32xf32>
    %705 = vector.shape_cast %704 : vector<32xf32> to vector<32x1xf32>
    %cst_222 = arith.constant 3.200000e+01 : f32
    %706 = vector.broadcast %cst_222 : f32 to vector<32x1xf32>
    %707 = arith.divf %705, %706 : vector<32x1xf32>
    %708 = vector.broadcast %707 : vector<32x1xf32> to vector<32x32xf32>
    %709 = arith.subf %691, %708 : vector<32x32xf32>
    %710 = arith.mulf %709, %709 : vector<32x32xf32>
    %cst_223 = arith.constant dense<0.000000e+00> : vector<32xf32>
    %711 = vector.multi_reduction <add>, %710, %cst_223 [1] : vector<32x32xf32> to vector<32xf32>
    %712 = vector.shape_cast %711 : vector<32xf32> to vector<32x1xf32>
    %cst_224 = arith.constant 3.200000e+01 : f32
    %713 = vector.broadcast %cst_224 : f32 to vector<32x1xf32>
    %714 = arith.divf %712, %713 : vector<32x1xf32>
    %715 = vector.broadcast %707 : vector<32x1xf32> to vector<32x32xf32>
    %716 = arith.subf %691, %715 : vector<32x32xf32>
    %cst_225 = arith.constant 9.99999974E-6 : f32
    %717 = vector.broadcast %cst_225 : f32 to vector<32x1xf32>
    %718 = arith.addf %714, %717 : vector<32x1xf32>
    %719 = math.rsqrt %718 : vector<32x1xf32>
    %720 = vector.broadcast %719 : vector<32x1xf32> to vector<32x32xf32>
    %721 = arith.mulf %716, %720 : vector<32x32xf32>
    %722 = vector.broadcast %693 : vector<1x32xf32> to vector<32x32xf32>
    %723 = arith.mulf %721, %722 : vector<32x32xf32>
    %724 = vector.broadcast %695 : vector<1x32xf32> to vector<32x32xf32>
    %725 = arith.addf %723, %724 : vector<32x32xf32>
    %cst_226 = arith.constant dense<0.000000e+00> : vector<32x128xf32>
    %726 = tpu.matmul %725, %697, %cst_226 {dimension_numbers = #tpu.dot_dimension_numbers<[1], [0], [0], [1], [0, 0, 1, 1], [], []>} : vector<32x32xf32>, vector<32x128xf32>, vector<32x128xf32> -> vector<32x128xf32>
    %727 = vector.broadcast %699 : vector<1x128xf32> to vector<32x128xf32>
    %728 = arith.addf %726, %727 : vector<32x128xf32>
    %729 = arith.negf %728 : vector<32x128xf32>
    %730 = math.exp %729 : vector<32x128xf32>
    %cst_227 = arith.constant 1.000000e+00 : f32
    %731 = vector.broadcast %cst_227 : f32 to vector<32x128xf32>
    %732 = arith.addf %731, %730 : vector<32x128xf32>
    %733 = arith.divf %731, %732 : vector<32x128xf32>
    %734 = arith.mulf %728, %733 : vector<32x128xf32>
    %cst_228 = arith.constant dense<0.000000e+00> : vector<32x32xf32>
    %735 = tpu.matmul %734, %701, %cst_228 {dimension_numbers = #tpu.dot_dimension_numbers<[1], [0], [0], [1], [0, 0, 1, 1], [], []>} : vector<32x128xf32>, vector<128x32xf32>, vector<32x32xf32> -> vector<32x32xf32>
    %736 = vector.broadcast %703 : vector<1x32xf32> to vector<32x32xf32>
    %737 = arith.addf %735, %736 : vector<32x32xf32>
    %cst_229 = arith.constant 5.000000e-01 : f32
    %738 = vector.broadcast %cst_229 : f32 to vector<32x32xf32>
    %739 = arith.mulf %738, %737 : vector<32x32xf32>
    %740 = arith.addf %691, %739 : vector<32x32xf32>
    %c0_230 = arith.constant 0 : index
    %c0_231 = arith.constant 0 : index
    %c0_232 = arith.constant 0 : index
    %741 = vector.load %arg33[%c0_230, %c0_231, %c0_232] : memref<1x1x32xf32, #tpu.memory_space<vmem>>, vector<1x1x32xf32>
    %742 = vector.shape_cast %741 : vector<1x1x32xf32> to vector<1x32xf32>
    %c0_233 = arith.constant 0 : index
    %c0_234 = arith.constant 0 : index
    %c0_235 = arith.constant 0 : index
    %743 = vector.load %arg34[%c0_233, %c0_234, %c0_235] : memref<1x1x32xf32, #tpu.memory_space<vmem>>, vector<1x1x32xf32>
    %744 = vector.shape_cast %743 : vector<1x1x32xf32> to vector<1x32xf32>
    %cst_236 = arith.constant dense<0.000000e+00> : vector<32xf32>
    %745 = vector.multi_reduction <add>, %740, %cst_236 [1] : vector<32x32xf32> to vector<32xf32>
    %746 = vector.shape_cast %745 : vector<32xf32> to vector<32x1xf32>
    %cst_237 = arith.constant 3.200000e+01 : f32
    %747 = vector.broadcast %cst_237 : f32 to vector<32x1xf32>
    %748 = arith.divf %746, %747 : vector<32x1xf32>
    %749 = vector.broadcast %748 : vector<32x1xf32> to vector<32x32xf32>
    %750 = arith.subf %740, %749 : vector<32x32xf32>
    %751 = arith.mulf %750, %750 : vector<32x32xf32>
    %cst_238 = arith.constant dense<0.000000e+00> : vector<32xf32>
    %752 = vector.multi_reduction <add>, %751, %cst_238 [1] : vector<32x32xf32> to vector<32xf32>
    %753 = vector.shape_cast %752 : vector<32xf32> to vector<32x1xf32>
    %cst_239 = arith.constant 3.200000e+01 : f32
    %754 = vector.broadcast %cst_239 : f32 to vector<32x1xf32>
    %755 = arith.divf %753, %754 : vector<32x1xf32>
    %756 = vector.broadcast %748 : vector<32x1xf32> to vector<32x32xf32>
    %757 = arith.subf %740, %756 : vector<32x32xf32>
    %cst_240 = arith.constant 9.99999974E-6 : f32
    %758 = vector.broadcast %cst_240 : f32 to vector<32x1xf32>
    %759 = arith.addf %755, %758 : vector<32x1xf32>
    %760 = math.rsqrt %759 : vector<32x1xf32>
    %761 = vector.broadcast %760 : vector<32x1xf32> to vector<32x32xf32>
    %762 = arith.mulf %757, %761 : vector<32x32xf32>
    %763 = vector.broadcast %742 : vector<1x32xf32> to vector<32x32xf32>
    %764 = arith.mulf %762, %763 : vector<32x32xf32>
    %765 = vector.broadcast %744 : vector<1x32xf32> to vector<32x32xf32>
    %766 = arith.addf %764, %765 : vector<32x32xf32>
    %c0_241 = arith.constant 0 : index
    %c0_242 = arith.constant 0 : index
    %767 = vector.load %arg35[%c0_241, %c0_242] : memref<32x32xf32, #tpu.memory_space<vmem>>, vector<32x32xf32>
    tpu.vector_store %arg35[%c0_241, %c0_242], %766 {strides = array<i32>} : memref<32x32xf32, #tpu.memory_space<vmem>>, vector<32x32xf32>,
    return
  }
  func.func @transform_0(%arg0: i32, %arg1: i32) -> (i32, i32) {
    %c0_i32 = arith.constant 0 : i32
    %c0_i32_0 = arith.constant 0 : i32
    return %arg0, %c0_i32 : i32, i32
  }
  func.func @transform_1(%arg0: i32, %arg1: i32) -> (i32, i32, i32) {
    %c0_i32 = arith.constant 0 : i32
    %c0_i32_0 = arith.constant 0 : i32
    %c0_i32_1 = arith.constant 0 : i32
    return %arg1, %c0_i32, %c0_i32_0 : i32, i32, i32
  }
  func.func @transform_2(%arg0: i32, %arg1: i32) -> (i32, i32, i32) {
    %c0_i32 = arith.constant 0 : i32
    %c0_i32_0 = arith.constant 0 : i32
    %c0_i32_1 = arith.constant 0 : i32
    return %arg1, %c0_i32, %c0_i32_0 : i32, i32, i32
  }
  func.func @transform_3(%arg0: i32, %arg1: i32) -> (i32, i32, i32) {
    %c0_i32 = arith.constant 0 : i32
    %c0_i32_0 = arith.constant 0 : i32
    %c0_i32_1 = arith.constant 0 : i32
    return %arg1, %c0_i32, %c0_i32_0 : i32, i32, i32
  }
  func.func @transform_4(%arg0: i32, %arg1: i32) -> (i32, i32, i32) {
    %c0_i32 = arith.constant 0 : i32
    %c0_i32_0 = arith.constant 0 : i32
    %c0_i32_1 = arith.constant 0 : i32
    return %arg1, %c0_i32, %c0_i32_0 : i32, i32, i32
  }
  func.func @transform_5(%arg0: i32, %arg1: i32) -> (i32, i32, i32) {
    %c0_i32 = arith.constant 0 : i32
    %c0_i32_0 = arith.constant 0 : i32
    %c0_i32_1 = arith.constant 0 : i32
    return %arg1, %c0_i32, %c0_i32_0 : i32, i32, i32
  }
  func.func @transform_6(%arg0: i32, %arg1: i32) -> (i32, i32, i32) {
    %c0_i32 = arith.constant 0 : i32
    %c0_i32_0 = arith.constant 0 : i32
    %c0_i32_1 = arith.constant 0 : i32
    return %arg1, %c0_i32, %c0_i32_0 : i32, i32, i32
  }
  func.func @transform_7(%arg0: i32, %arg1: i32) -> (i32, i32, i32) {
    %c0_i32 = arith.constant 0 : i32
    %c0_i32_0 = arith.constant 0 : i32
    %c0_i32_1 = arith.constant 0 : i32
    return %arg1, %c0_i32, %c0_i32_0 : i32, i32, i32
  }
  func.func @transform_8(%arg0: i32, %arg1: i32) -> (i32, i32, i32) {
    %c0_i32 = arith.constant 0 : i32
    %c0_i32_0 = arith.constant 0 : i32
    %c0_i32_1 = arith.constant 0 : i32
    return %arg1, %c0_i32, %c0_i32_0 : i32, i32, i32
  }
  func.func @transform_9(%arg0: i32, %arg1: i32) -> (i32, i32, i32) {
    %c0_i32 = arith.constant 0 : i32
    %c0_i32_0 = arith.constant 0 : i32
    %c0_i32_1 = arith.constant 0 : i32
    return %arg1, %c0_i32, %c0_i32_0 : i32, i32, i32
  }
  func.func @transform_10(%arg0: i32, %arg1: i32) -> (i32, i32, i32) {
    %c0_i32 = arith.constant 0 : i32
    %c0_i32_0 = arith.constant 0 : i32
    %c0_i32_1 = arith.constant 0 : i32
    return %arg1, %c0_i32, %c0_i32_0 : i32, i32, i32
  }
  func.func @transform_11(%arg0: i32, %arg1: i32) -> (i32, i32, i32) {
    %c0_i32 = arith.constant 0 : i32
    %c0_i32_0 = arith.constant 0 : i32
    %c0_i32_1 = arith.constant 0 : i32
    return %arg1, %c0_i32, %c0_i32_0 : i32, i32, i32
  }
  func.func @transform_12(%arg0: i32, %arg1: i32) -> (i32, i32, i32) {
    %c0_i32 = arith.constant 0 : i32
    %c0_i32_0 = arith.constant 0 : i32
    %c0_i32_1 = arith.constant 0 : i32
    return %arg1, %c0_i32, %c0_i32_0 : i32, i32, i32
  }
  func.func @transform_13(%arg0: i32, %arg1: i32) -> (i32, i32, i32) {
    %c0_i32 = arith.constant 0 : i32
    %c0_i32_0 = arith.constant 0 : i32
    %c0_i32_1 = arith.constant 0 : i32
    return %arg1, %c0_i32, %c0_i32_0 : i32, i32, i32
  }
  func.func @transform_14(%arg0: i32, %arg1: i32) -> (i32, i32, i32) {
    %c0_i32 = arith.constant 0 : i32
    %c0_i32_0 = arith.constant 0 : i32
    %c0_i32_1 = arith.constant 0 : i32
    return %arg1, %c0_i32, %c0_i32_0 : i32, i32, i32
  }
  func.func @transform_15(%arg0: i32, %arg1: i32) -> (i32, i32, i32) {
    %c0_i32 = arith.constant 0 : i32
    %c0_i32_0 = arith.constant 0 : i32
    %c0_i32_1 = arith.constant 0 : i32
    return %arg1, %c0_i32, %c0_i32_0 : i32, i32, i32
  }
  func.func @transform_16(%arg0: i32, %arg1: i32) -> (i32, i32, i32) {
    %c0_i32 = arith.constant 0 : i32
    %c0_i32_0 = arith.constant 0 : i32
    %c0_i32_1 = arith.constant 0 : i32
    return %arg1, %c0_i32, %c0_i32_0 : i32, i32, i32
  }
  func.func @transform_17(%arg0: i32, %arg1: i32) -> (i32, i32, i32) {
    %c0_i32 = arith.constant 0 : i32
    %c0_i32_0 = arith.constant 0 : i32
    %c0_i32_1 = arith.constant 0 : i32
    return %arg1, %c0_i32, %c0_i32_0 : i32, i32, i32
  }
  func.func @transform_18(%arg0: i32, %arg1: i32) -> (i32, i32, i32) {
    %c0_i32 = arith.constant 0 : i32
    %c0_i32_0 = arith.constant 0 : i32
    %c0_i32_1 = arith.constant 0 : i32
    return %arg1, %c0_i32, %c0_i32_0 : i32, i32, i32
  }
  func.func @transform_19(%arg0: i32, %arg1: i32) -> (i32, i32, i32) {
    %c0_i32 = arith.constant 0 : i32
    %c0_i32_0 = arith.constant 0 : i32
    %c0_i32_1 = arith.constant 0 : i32
    return %arg1, %c0_i32, %c0_i32_0 : i32, i32, i32
  }
  func.func @transform_20(%arg0: i32, %arg1: i32) -> (i32, i32, i32) {
    %c0_i32 = arith.constant 0 : i32
    %c0_i32_0 = arith.constant 0 : i32
    %c0_i32_1 = arith.constant 0 : i32
    return %arg1, %c0_i32, %c0_i32_0 : i32, i32, i32
  }
  func.func @transform_21(%arg0: i32, %arg1: i32) -> (i32, i32, i32) {
    %c0_i32 = arith.constant 0 : i32
    %c0_i32_0 = arith.constant 0 : i32
    %c0_i32_1 = arith.constant 0 : i32
    return %arg1, %c0_i32, %c0_i32_0 : i32, i32, i32
  }
  func.func @transform_22(%arg0: i32, %arg1: i32) -> (i32, i32, i32) {
    %c0_i32 = arith.constant 0 : i32
    %c0_i32_0 = arith.constant 0 : i32
    %c0_i32_1 = arith.constant 0 : i32
    return %arg1, %c0_i32, %c0_i32_0 : i32, i32, i32
  }
  func.func @transform_23(%arg0: i32, %arg1: i32) -> (i32, i32, i32) {
    %c0_i32 = arith.constant 0 : i32
    %c0_i32_0 = arith.constant 0 : i32
    %c0_i32_1 = arith.constant 0 : i32
    return %arg1, %c0_i32, %c0_i32_0 : i32, i32, i32
  }
  func.func @transform_24(%arg0: i32, %arg1: i32) -> (i32, i32, i32) {
    %c0_i32 = arith.constant 0 : i32
    %c0_i32_0 = arith.constant 0 : i32
    %c0_i32_1 = arith.constant 0 : i32
    return %arg1, %c0_i32, %c0_i32_0 : i32, i32, i32
  }
  func.func @transform_25(%arg0: i32, %arg1: i32) -> (i32, i32, i32) {
    %c0_i32 = arith.constant 0 : i32
    %c0_i32_0 = arith.constant 0 : i32
    %c0_i32_1 = arith.constant 0 : i32
    return %arg1, %c0_i32, %c0_i32_0 : i32, i32, i32
  }
  func.func @transform_26(%arg0: i32, %arg1: i32) -> (i32, i32, i32) {
    %c0_i32 = arith.constant 0 : i32
    %c0_i32_0 = arith.constant 0 : i32
    %c0_i32_1 = arith.constant 0 : i32
    return %arg1, %c0_i32, %c0_i32_0 : i32, i32, i32
  }
  func.func @transform_27(%arg0: i32, %arg1: i32) -> (i32, i32, i32) {
    %c0_i32 = arith.constant 0 : i32
    %c0_i32_0 = arith.constant 0 : i32
    %c0_i32_1 = arith.constant 0 : i32
    return %arg1, %c0_i32, %c0_i32_0 : i32, i32, i32
  }
  func.func @transform_28(%arg0: i32, %arg1: i32) -> (i32, i32, i32) {
    %c0_i32 = arith.constant 0 : i32
    %c0_i32_0 = arith.constant 0 : i32
    %c0_i32_1 = arith.constant 0 : i32
    return %arg1, %c0_i32, %c0_i32_0 : i32, i32, i32
  }
  func.func @transform_29(%arg0: i32, %arg1: i32) -> (i32, i32, i32) {
    %c0_i32 = arith.constant 0 : i32
    %c0_i32_0 = arith.constant 0 : i32
    %c0_i32_1 = arith.constant 0 : i32
    return %arg1, %c0_i32, %c0_i32_0 : i32, i32, i32
  }
  func.func @transform_30(%arg0: i32, %arg1: i32) -> (i32, i32, i32) {
    %c0_i32 = arith.constant 0 : i32
    %c0_i32_0 = arith.constant 0 : i32
    %c0_i32_1 = arith.constant 0 : i32
    return %arg1, %c0_i32, %c0_i32_0 : i32, i32, i32
  }
  func.func @transform_31(%arg0: i32, %arg1: i32) -> (i32, i32, i32) {
    %c0_i32 = arith.constant 0 : i32
    %c0_i32_0 = arith.constant 0 : i32
    %c0_i32_1 = arith.constant 0 : i32
    return %arg1, %c0_i32, %c0_i32_0 : i32, i32, i32
  }
  func.func @transform_32(%arg0: i32, %arg1: i32) -> (i32, i32, i32) {
    %c0_i32 = arith.constant 0 : i32
    %c0_i32_0 = arith.constant 0 : i32
    %c0_i32_1 = arith.constant 0 : i32
    return %arg1, %c0_i32, %c0_i32_0 : i32, i32, i32
  }
  func.func @transform_33(%arg0: i32, %arg1: i32) -> (i32, i32) {
    %c0_i32 = arith.constant 0 : i32
    %c0_i32_0 = arith.constant 0 : i32
    return %arg0, %c0_i32 : i32, i32
  }
}

</mosaic_0001>

<bundles_post_ra>
// kernel: tpu_custom_call.1
= control target key start
LH: loop header
LB: loop body
LE: loop exit
PB: predicated region body
PF: predicated region fallthrough
CT: control target
= control target key end

     0   :  { %s5813_s6 = smov 1   ;;  %s5814_s10 = smov 2   ;;  %s7634_s0 = inlined_call_operand.smem [shape: u32[34], index: -1, kind: input, shape index: {}] }
   0x1   :  { %s5869_s5 = sld [smem:[%s7634_s0]]   ;;  %s5815_s14 = smov 3  }
   0x2   :  { %s5874_s9 = sld [smem:[%s7634_s0 + %s5813_s6]]   ;;  %s5816_s18 = smov 4  }
   0x3   :  { %s5879_s13 = sld [smem:[%s7634_s0 + %s5814_s10]]   ;;  %s5817_s22 = smov 5  }
   0x4   :  { %s5884_s17 = sld [smem:[%s7634_s0 + %s5815_s14]]   ;;  %s5818_s26 = smov 6  }
   0x5   :  { %s5889_s21 = sld [smem:[%s7634_s0 + %s5816_s18]]   ;;  %s5819_s30 = smov 7  }
   0x6   :  { %s5894_s25 = sld [smem:[%s7634_s0 + %s5817_s22]]   ;;  %s5820_s4 = smov 8  }
   0x7   :  { %7689 = sst [smem:[#allocation5_spill]] %s5869_s5  ;;  %s5821_s10 = smov 9  }
   0x8   :  { %7690 = sst [smem:[#allocation6_spill]] %s5874_s9  ;;  %s5822_s15 = smov 10  }
   0x9   :  { %7691 = sst [smem:[#allocation7_spill]] %s5879_s13  ;;  %s5823_s20 = smov 11  }
   0xa   :  { %7692 = sst [smem:[#allocation8_spill]] %s5884_s17  ;;  %s5825_s1 = smov 13  }
   0xb   :  { %7693 = sst [smem:[#allocation9_spill]] %s5889_s21  ;;  %s5826_s7 = smov 14  }
   0xc   :  { %7694 = sst [smem:[#allocation10_spill]] %s5894_s25  ;;  %s5828_s22 = smov 16  }
   0xd   :  { %s5899_s29 = sld [smem:[%s7634_s0 + %s5818_s26]]   ;;  %s5824_s26 = smov 12  }
   0xe   :  { %s5904_s3 = sld [smem:[%s7634_s0 + %s5819_s30]]   ;;  %s5829_s28 = smov 17  }
   0xf   :  { %s5909_s8 = sld [smem:[%s7634_s0 + %s5820_s4]]  }
  0x10   :  { %s5914_s14 = sld [smem:[%s7634_s0 + %s5821_s10]]  }
  0x11   :  { %s5919_s19 = sld [smem:[%s7634_s0 + %s5822_s15]]   ;;  %s5827_s15 = smov 15  }
  0x12   :  { %s5924_s24 = sld [smem:[%s7634_s0 + %s5823_s20]]  }
  0x13   :  { %7695 = sst [smem:[#allocation11_spill]] %s5899_s29 }
  0x14   :  { %7696 = sst [smem:[#allocation12_spill]] %s5904_s3 }
  0x15   :  { %7697 = sst [smem:[#allocation13_spill]] %s5909_s8 }
  0x16   :  { %7698 = sst [smem:[#allocation14_spill]] %s5914_s14 }
  0x17   :  { %7699 = sst [smem:[#allocation15_spill]] %s5919_s19 }
  0x18   :  { %7700 = sst [smem:[#allocation16_spill]] %s5924_s24 }
  0x19   :  { %s5929_s30 = sld [smem:[%s7634_s0 + %s5824_s26]]  }
  0x1a   :  { %s5934_s6 = sld [smem:[%s7634_s0 + %s5825_s1]]  }
  0x1b   :  { %s5939_s12 = sld [smem:[%s7634_s0 + %s5826_s7]]   ;;  %s5830_s7 = smov 18  }
  0x1c   :  { %s5944_s20 = sld [smem:[%s7634_s0 + %s5827_s15]]   ;;  %s5831_s15 = smov 19  }
  0x1d   :  { %s5949_s27 = sld [smem:[%s7634_s0 + %s5828_s22]]   ;;  %s5832_s22 = smov 20  }
  0x1e   :  { %s5954_s4 = sld [smem:[%s7634_s0 + %s5829_s28]]   ;;  %s5833_s28 = smov 21  }
  0x1f   :  { %7701 = sst [smem:[#allocation17_spill]] %s5929_s30 }
  0x20   :  { %7702 = sst [smem:[#allocation18_spill]] %s5934_s6 }
  0x21   :  { %7703 = sst [smem:[#allocation19_spill]] %s5939_s12 }
  0x22   :  { %7704 = sst [smem:[#allocation20_spill]] %s5944_s20 }
  0x23   :  { %7705 = sst [smem:[#allocation21_spill]] %s5949_s27 }
  0x24   :  { %7706 = sst [smem:[#allocation22_spill]] %s5954_s4 }
  0x25   :  { %s5959_s5 = sld [smem:[%s7634_s0 + %s5830_s7]]   ;;  %s5834_s7 = smov 22  }
  0x26   :  { %s5964_s20 = sld [smem:[%s7634_s0 + %s5831_s15]]   ;;  %s5835_s15 = smov 23  }
  0x27   :  { %s5969_s27 = sld [smem:[%s7634_s0 + %s5832_s22]]   ;;  %s5836_s22 = smov 24  }
  0x28   :  { %s5974_s4 = sld [smem:[%s7634_s0 + %s5833_s28]]   ;;  %s5837_s28 = smov 25  }
  0x2b   :  { %7707 = sst [smem:[#allocation23_spill]] %s5959_s5 }
  0x2c   :  { %7708 = sst [smem:[#allocation24_spill]] %s5964_s20 }
  0x2d   :  { %7709 = sst [smem:[#allocation25_spill]] %s5969_s27 }
  0x2e   :  { %7710 = sst [smem:[#allocation26_spill]] %s5974_s4 }
  0x2f   :  { %s5979_s5 = sld [smem:[%s7634_s0 + %s5834_s7]]   ;;  %s5838_s7 = smov 26  }
  0x30   :  { %s5984_s20 = sld [smem:[%s7634_s0 + %s5835_s15]]   ;;  %s5839_s15 = smov 27  }
  0x31   :  { %s5989_s27 = sld [smem:[%s7634_s0 + %s5836_s22]]   ;;  %s5840_s22 = smov 28  }
  0x32   :  { %s5994_s4 = sld [smem:[%s7634_s0 + %s5837_s28]]   ;;  %s5841_s28 = smov 29  }
  0x35   :  { %7711 = sst [smem:[#allocation27_spill]] %s5979_s5 }
  0x36   :  { %7712 = sst [smem:[#allocation28_spill]] %s5984_s20 }
  0x37   :  { %7713 = sst [smem:[#allocation29_spill]] %s5989_s27 }
  0x38   :  { %7714 = sst [smem:[#allocation30_spill]] %s5994_s4 }
  0x39   :  { %s5999_s5 = sld [smem:[%s7634_s0 + %s5838_s7]]   ;;  %s5842_s7 = smov 30  }
  0x3a   :  { %s6004_s20 = sld [smem:[%s7634_s0 + %s5839_s15]]   ;;  %s5843_s15 = smov 31  }
  0x3b   :  { %s6009_s27 = sld [smem:[%s7634_s0 + %s5840_s22]]   ;;  %s5844_s22 = smov 32  }
  0x3c   :  { %s6014_s4 = sld [smem:[%s7634_s0 + %s5841_s28]]   ;;  %s5845_s28 = smov 33  }
  0x3f   :  { %7715 = sst [smem:[#allocation31_spill]] %s5999_s5 }
  0x40   :  { %7716 = sst [smem:[#allocation32_spill]] %s6004_s20 }
  0x41   :  { %7717 = sst [smem:[#allocation33_spill]] %s6009_s27 }
  0x42   :  { %7718 = sst [smem:[#allocation34_spill]] %s6014_s4 }
  0x43   :  { %s6019_s5 = sld [smem:[%s7634_s0 + %s5842_s7]]  }
  0x44   :  { %s6024_s20 = sld [smem:[%s7634_s0 + %s5843_s15]]  }
  0x45   :  { %s6029_s27 = sld [smem:[%s7634_s0 + %s5844_s22]]  }
  0x46   :  { %s6034_s4 = sld [smem:[%s7634_s0 + %s5845_s28]]  }
  0x49   :  { %7719 = sst [smem:[#allocation35_spill]] %s6019_s5 }
  0x4a   :  { %7720 = sst [smem:[#allocation36_spill]] %s6024_s20 }
  0x4b   :  { %7721 = sst [smem:[#allocation37_spill]] %s6029_s27 }
  0x4c   :  { %7722 = sst [smem:[#allocation38_spill]] %s6034_s4 }
  0x4d   :  { %72 = vsyncpa [#allocation3], 0  ;;  %s6036_s7 = smov 0   ;;  %s6038_s10 = smov 0  }
  0x4e   :  { %s6040_s11 = smov 0  }
  0x4f LB: > { %7723 = sst [smem:[#allocation39_spill]] %s5803_s7  ;;  %s87_s15 = sadd.s32 1, %s5807_s10  ;;  %s5811_s11 = sphi %s6040_s11, %s78_s11   ;;  %s5807_s10 = sphi %s6038_s10, %s7938_s10   ;;  %s5803_s7 = sphi %s6036_s7, %s7937_s7  }
  0x50   : > { %7724 = sst [smem:[#allocation40_spill]] %s5807_s10  ;;  %p88_p0 = scmp.ge.s32.totalorder %s87_s15, 2 }
  0x51   : > { %7725 = sst [smem:[#allocation41_spill]] %s5811_s11  ;;  %p5301_p1 = scmp.ge.s32.totalorder %s5811_s11, 1 }
  0x52   : > { %p1211_p2 = scmp.lt.s32.totalorder %s5811_s11, 3  ;;  %s7940_s15 = smov (%p88_p0, %s87_s15), 0 }
  0x53   : > { %7726 = sst [smem:[#allocation42_spill]] %s7940_s15 }
  0x54   : > { %p1212_p3 = pnand %p5301_p1, %p1211_p2 }
  0x56   : > { %1215 = sbr.rel (%p1212_p3) target bundleno = 4350 (0x10fe), region = 152 }
  0x5b   : > { %s7730_s17 = sld [smem:[#allocation8_spill]]  ;;  %p1412_p4 = scmp.lt.s32.totalorder %s5803_s7, 1 }
  0x5c   : > { %s7731_s25 = sld [smem:[#allocation10_spill]] }
  0x5d   : > { %s7735_s14 = sld [smem:[#allocation14_spill]] }
  0x5e   : > { %s7737_s24 = sld [smem:[#allocation16_spill]] }
  0x5f   : > { %s6059_s16 = scalar_select %p1412_p4, %s5803_s7, 1 }
  0x60   : > { %s7741_s22 = sld [smem:[#allocation20_spill]] }
  0x61   : > { %s5431_s28 = sshll.u32 %s6059_s16, 5  ;;  %s7743_s1 = sld [smem:[#allocation22_spill]] }
  0x62   : > { %s6069_s15 = scalar_lea.vmem %s7730_s17, %s5431_s28  ;;  %s7746_s10 = sld [smem:[#allocation24_spill]] }
  0x63   : > { %7745 = sst [smem:[#allocation43_spill]] %s6069_s15  ;;  %s5432_s11 = sshll.u32 %s6059_s16, 7 }
  0x64   : > { %s7747_s4 = sld [smem:[#allocation25_spill]]  ;;  %s6073_s7 = scalar_lea.vmem %s7731_s25, %s5432_s11 }
  0x65   : > { %7748 = sst [smem:[#allocation44_spill]] %s6073_s7  ;;  %s6082_s21 = scalar_lea.vmem %s7735_s14, %s5431_s28 }
  0x66   : > { %s7749_s27 = sld [smem:[#allocation26_spill]]  ;;  %s6087_s25 = scalar_lea.vmem %s7737_s24, %s5431_s28 }
  0x67   : > { %s7750_s23 = sld [smem:[#allocation27_spill]]  ;;  %s6096_s14 = scalar_lea.vmem %s7741_s22, %s5431_s28 }
  0x68   : > { %s7751_s9 = sld [smem:[#allocation28_spill]]  ;;  %s6101_s24 = scalar_lea.vmem %s7743_s1, %s5431_s28 }
  0x69   : > { %s7752_s2 = sld [smem:[#allocation29_spill]]  ;;  %s6106_s18 = scalar_lea.vmem %s7746_s10, %s5431_s28 }
  0x6a   : > { %7753 = sst [smem:[#allocation45_spill]] %s6082_s21  ;;  %s1485_s30 = scalar_lea.vmem %s7747_s4, %s6059_s16 }
  0x6b   : > { %s7754_s17 = sld [smem:[#allocation30_spill]] }
  0x6c   : > { %s7755_s5 = sld [smem:[#allocation31_spill]]  ;;  %s1488_s3 = scalar_lea.vmem %s7749_s27, %s6059_s16 }
  0x6d   : > { %7756 = sst [smem:[#allocation46_spill]] %s6087_s25  ;;  %s1491_s6 = scalar_lea.vmem %s7750_s23, %s6059_s16 }
  0x6e   : > { %s7757_s7 = sld [smem:[#allocation32_spill]]  ;;  %s6115_s8 = scalar_lea.vmem %s7751_s9, %s5431_s28 }
  0x6f   : > { %s7758_s29 = sld [smem:[#allocation33_spill]]  ;;  %s1499_s12 = scalar_lea.vmem %s7752_s2, %s6059_s16 }
  0x70   : > { %s7759_s13 = sld [smem:[#allocation34_spill]] }
  0x71   : > { %s7760_s20 = sld [smem:[#allocation35_spill]]  ;;  %s1502_s22 = scalar_lea.vmem %s7754_s17, %s6059_s16 }
  0x72   : > { %7761 = sst [smem:[#allocation47_spill]] %s6096_s14  ;;  %s1505_s14 = scalar_lea.vmem %s7755_s5, %s6059_s16 }
  0x73   : > { %s7762_s21 = sld [smem:[#allocation36_spill]] }
  0x74   : > { %s7763_s19 = sld [smem:[#allocation37_spill]]  ;;  %s6124_s15 = scalar_lea.vmem %s7757_s7, %s5431_s28 }
  0x75   : > { %7764 = sst [smem:[#allocation48_spill]] %s6101_s24  ;;  %s1513_s26 = scalar_lea.vmem %s7758_s29, %s6059_s16 }
  0x76   : > { %7765 = sst [smem:[#allocation49_spill]] %s6106_s18  ;;  %s6129_s1 = scalar_lea.vmem %s7759_s13, %s5432_s11 }
  0x77   : > { %s1521_s24 = scalar_lea.vmem %s7760_s20, %s6059_s16  ;;  %s7766_s10 = sld [smem:[#allocation39_spill]] }
  0x79   : > { %s1524_s0 = scalar_lea.vmem %s7762_s21, %s6059_s16 }
  0x7a   : > { %s1527_s25 = scalar_lea.vmem %s7763_s19, %s6059_s16 }
  0x7d   : > { %p5322_p5 = scmp.ne.s32.totalorder %s7766_s10, 0 }
  0x7e   : > { %s7767_s18 = sld [smem:[#allocation5_spill]] (!%p5322_p5) }
  0x7f   : > { %1532 = sbr.rel (%p5322_p5) target bundleno = 137 (0x89), region = 156 }
  0x84   : > { %v1533_v0 = vld [vmem:[%s7767_s18] sm:$0xff]  ;;  %vm1537_vm0 = vcmask 261120   ;;  %v1534_v1 = vld [vmem:[%s7767_s18 + $0x8] sm:$0xff]  ;;  %v1535_v2 = vld [vmem:[%s7767_s18 + $0x10] sm:$0xff] }
  0x85   : > { %1538 = vst.msk [vmem:[#allocation2] sm:$0xff] %vm1537_vm0, %v1533_v0  ;;  %v1536_v3 = vld [vmem:[%s7767_s18 + $0x18] sm:$0xff] }
  0x86   : > { %1539 = vst.msk [vmem:[#allocation2 + $0x8] sm:$0xff] %vm1537_vm0, %v1534_v1 }
  0x87   : > { %1540 = vst.msk [vmem:[#allocation2 + $0x10] sm:$0xff] %vm1537_vm0, %v1535_v2 }
  0x88   : > { %1541 = vst.msk [vmem:[#allocation2 + $0x18] sm:$0xff] %vm1537_vm0, %v1536_v3 }
  0x89 PF: > { %vm7667_vm1 = vcmask 261120   ;;  %v5846_v12 = vmov 32.0   ;;  %s7769_s5 = sld [smem:[#allocation43_spill]] }
  0x8a   : > { %5587 = vrcp.f32 %v5846_v12  ;;  %s7770_s9 = sld [smem:[#allocation6_spill]] }
  0x8b   : > { %s7771_s13 = sld [smem:[#allocation7_spill]] }
  0x8c   : > { %v6144_v5 = vld [vmem:[#allocation2] sm:$0xff]  ;;  %s7774_s29 = sld [smem:[#allocation44_spill]] }
  0x8d   : > { %v1571_v8 = vsel %vm7667_vm1, %v6144_v5, 0.0  ;;  %v6152_v9 = vld [vmem:[#allocation2 + $0x8] sm:$0xff]  ;;  %s7775_s19 = sld [smem:[#allocation9_spill]] }
  0x8e   : > { %v6142_v4 = vld [vmem:[#allocation2 + $0x10] sm:$0xff]  ;;  %1572 = vadd.xlane.f32.xlu0 %v1571_v8  ;;  %v1574_v11 = vsel %vm7667_vm1, %v6152_v9, 0.0  ;;  %s7777_s27 = sld [smem:[#allocation11_spill]] }
  0x8f   : > { %v6146_v6 = vld [vmem:[#allocation2 + $0x18] sm:$0xff]  ;;  %v1577_v7 = vsel %vm7667_vm1, %v6142_v4, 0.0  ;;  %v1550_v40 = vld [vmem:[%s7769_s5 + $0x10] sm:$0xff]  ;;  %v1549_v41 = vld [vmem:[%s7769_s5 + $0x8] sm:$0xff]  ;;  %s7779_s7 = sld [smem:[#allocation45_spill]] }
  0x90   : > { %1578 = vadd.xlane.f32.xlu1 %v1577_v7  ;;  %v1580_v10 = vsel %vm7667_vm1, %v6146_v6, 0.0  ;;  %v5588_v13 = vpop.eup %5587  ;;  %v1551_v39 = vld [vmem:[%s7769_s5 + $0x18] sm:$0xff]  ;;  %v1548_v42 = vld [vmem:[%s7769_s5] sm:$0xff]  ;;  %s7772_s17 = scalar_lea.vmem %s7770_s9, %s6059_s16  ;;  %s7780_s11 = sld [smem:[#allocation12_spill]] }
  0x91   : > { %v1584_v14 = vmul.f32 32.0, %v5588_v13  ;;  %vm1588_vm2 = vweird.f32 %v5588_v13  ;;  %1707 = vmatpush.msra.mxu0 %v1551_v39  ;;  %v5565_v8 = vld [vmem:[%s7772_s17] ss:$0 sm:$0xff]  ;;  %s7773_s21 = scalar_lea.vmem %s7771_s13, %s6059_s16  ;;  %s7781_s23 = sld [smem:[#allocation13_spill]] }
  0x92   : > { %s7784_s10 = sld [smem:[#allocation15_spill]]  ;;  %s5847_s9 = smov 96  }
  0x93   : > { %v1585_v15 = vsub.f32 1.0, %v1584_v14  ;;  %1708 = vmatpush.msra.mxu0 %v1550_v40  ;;  %v1567_v40 = vld [vmem:[%s7774_s29 + $0x70] sm:$0xff]  ;;  %s7776_s20 = scalar_lea.vmem %s7775_s19, %s6059_s16  ;;  %s5848_s13 = smov 88  }
  0x94   : > { %s7778_s4 = scalar_lea.vmem %s7777_s27, %s6059_s16  ;;  %s5849_s17 = smov 120  }
  0x95   : > { %v1586_v16 = vmul.f32 %v5588_v13, %v1585_v15  ;;  %1709 = vmatpush.msra.mxu0 %v1549_v41  ;;  %v1566_v41 = vld [vmem:[%s7774_s29 + $0x68] sm:$0xff]  ;;  %s5852_s19 = smov 112   ;;  %s7786_s27 = sld [smem:[#allocation46_spill]] }
  0x96   : > { %1575 = vadd.xlane.f32.xlu0 %v1574_v11  ;;  %s7782_s28 = scalar_lea.vmem %s7780_s11, %s6059_s16  ;;  %s5856_s11 = smov 104  }
  0x97   : > { %v1587_v17 = vadd.f32 %v5588_v13, %v1586_v16  ;;  %1710 = vmatpush.msra.mxu0 %v1548_v42  ;;  %v1565_v42 = vld [vmem:[%s7774_s29 + $0x60] sm:$0xff]  ;;  %s7783_s2 = scalar_lea.vmem %s7781_s23, %s6059_s16  ;;  %s5857_s23 = smov 40  }
  0x98   : > { %1581 = vadd.xlane.f32.xlu1 %v1580_v10  ;;  %s7785_s5 = scalar_lea.vmem %s7784_s10, %s6059_s16  ;;  %s7793_s10 = sld [smem:[#allocation47_spill]] }
  0x99   : > { %v6158_v18 = vsel %vm1588_vm2, %v5588_v13, %v1587_v17  ;;  %v5566_v13 = vld [vmem:[%s7773_s21] ss:$0 sm:$0xff]  ;;  %s5850_s21 = smov 64  }
  0x9a   : > { %7768 = vst [vmem:[#allocation50_spill] sm:$0xff] %v6158_v18 }
 0x101   : > { %v1573_v20 = vpop.xlane.xlu0 %1572 }
 0x102   : > { %v1590_v22 = vmul.f32 %v6158_v18, %v1573_v20 }
 0x103   : > { %v1579_v19 = vpop.xlane.xlu1 %1578 }
 0x104   : > { %v1592_v21 = vmul.f32 %v6158_v18, %v1579_v19  ;;  %v6166_v24 = vsub.f32 %v6144_v5, %v1590_v22 }
 0x106   : > { %v6163_v23 = vsub.f32 %v6142_v4, %v1592_v21  ;;  %v1598_v26 = vmul.f32 %v6166_v24, %v6166_v24 }
 0x108   : > { %v1600_v25 = vmul.f32 %v6163_v23, %v6163_v23  ;;  %v1602_v28 = vsel %vm7667_vm1, %v1598_v26, 0.0 }
 0x109   : > { %1603 = vadd.xlane.f32.xlu2 %v1602_v28  ;;  %v1576_v30 = vpop.xlane.xlu0 %1575 }
 0x10a   : > { %v1608_v27 = vsel %vm7667_vm1, %v1600_v25, 0.0  ;;  %v1591_v32 = vmul.f32 %v6158_v18, %v1576_v30 }
 0x10b   : > { %v1582_v29 = vpop.xlane.xlu1 %1581  ;;  %1609 = vadd.xlane.f32.xlu0 %v1608_v27 }
 0x10c   : > { %v1593_v31 = vmul.f32 %v6158_v18, %v1582_v29  ;;  %v6180_v34 = vsub.f32 %v6152_v9, %v1591_v32 }
 0x10e   : > { %v6177_v33 = vsub.f32 %v6146_v6, %v1593_v31  ;;  %v1599_v36 = vmul.f32 %v6180_v34, %v6180_v34 }
 0x110   : > { %v1601_v35 = vmul.f32 %v6177_v33, %v6177_v33  ;;  %v1605_v38 = vsel %vm7667_vm1, %v1599_v36, 0.0 }
 0x111   : > { %1606 = vadd.xlane.f32.xlu2 %v1605_v38 }
 0x112   : > { %v1611_v37 = vsel %vm7667_vm1, %v1601_v35, 0.0 }
 0x113   : > { %1612 = vadd.xlane.f32.xlu1 %v1611_v37 }
 0x17c   : > { %v1604_v43 = vpop.xlane.xlu2 %1603 }
 0x17d   : > { %v1614_v45 = vmul.f32 %v1604_v43, %v6158_v18  ;;  %v1563_v43 = vld [vmem:[%s7774_s29 + $0x50] sm:$0xff] }
 0x17e   : > { %v1610_v44 = vpop.xlane.xlu0 %1609 }
 0x17f   : > { %v1616_v46 = vmul.f32 %v1610_v44, %v6158_v18  ;;  %v1618_v47 = vadd.f32 1e-05, %v1614_v45  ;;  %v1562_v44 = vld [vmem:[%s7774_s29 + $0x48] sm:$0xff]  ;;  %v1561_v45 = vld [vmem:[%s7774_s29 + $0x40] sm:$0xff] }
 0x181   : > { %v1620_v48 = vadd.f32 1e-05, %v1616_v46  ;;  %5589 = vrsqrt.f32 %v1618_v47  ;;  %vm1628_vm4 = vweird.f32 %v1618_v47  ;;  %v1560_v46 = vld [vmem:[%s7774_s29 + $0x38] sm:$0xff] }
 0x183   : > { %5591 = vrsqrt.f32 %v1620_v48  ;;  %vm1648_vm6 = vweird.f32 %v1620_v48 }
 0x184   : > { %v1607_v50 = vpop.xlane.xlu2 %1606 }
 0x185   : > { %v1615_v52 = vmul.f32 %v1607_v50, %v6158_v18  ;;  %v1556_v50 = vld [vmem:[%s7774_s29 + $0x18] sm:$0xff] }
 0x186   : > { %v1613_v49 = vpop.xlane.xlu1 %1612 }
 0x187   : > { %v1617_v51 = vmul.f32 %v1613_v49, %v6158_v18  ;;  %v5590_v53 = vpop.eup %5589  ;;  %v1619_v55 = vadd.f32 1e-05, %v1615_v52  ;;  %v1557_v49 = vld [vmem:[%s7774_s29 + $0x20] sm:$0xff]  ;;  %v1555_v52 = vld [vmem:[%s7774_s29 + $0x10] sm:$0xff] }
 0x188   : > { %v1623_v57 = vmul.f32 %v5590_v53, %v1618_v47  ;;  %vm1629_vm3 = vweird.f32 %v5590_v53  ;;  %v1559_v47 = vld [vmem:[%s7774_s29 + $0x30] sm:$0xff] }
 0x189   : > { %v1621_v54 = vadd.f32 1e-05, %v1617_v51  ;;  %v5592_v56 = vpop.eup %5591  ;;  %vm1630_vm5 = vmor %vm1628_vm4, %vm1629_vm3  ;;  %vm1638_vm10 = vweird.f32 %v1619_v55  ;;  %v5567_v51 = vld [vmem:[%s7776_s20] ss:$0 sm:$0xff]  ;;  %s5853_s20 = smov 56  }
 0x18a   : > { %v1643_v58 = vmul.f32 %v5592_v56, %v1620_v48  ;;  %v1624_v59 = vmul.f32 %v5590_v53, %v1623_v57  ;;  %vm1649_vm7 = vweird.f32 %v5592_v56  ;;  %v1558_v48 = vld [vmem:[%s7774_s29 + $0x28] sm:$0xff] }
 0x18b   : > { %5593 = vrsqrt.f32 %v1621_v54  ;;  %vm1650_vm9 = vmor %vm1648_vm6, %vm1649_vm7  ;;  %vm1658_vm12 = vweird.f32 %v1621_v54 }
 0x18c   : > { %5595 = vrsqrt.f32 %v1619_v55  ;;  %v1625_v60 = vmul.f32 0.5, %v1624_v59  ;;  %v1644_v61 = vmul.f32 %v5592_v56, %v1643_v58 }
 0x18e   : > { %v1626_v62 = vsub.f32 1.5, %v1625_v60  ;;  %v1645_v2 = vmul.f32 0.5, %v1644_v61 }
 0x190   : > { %v1627_v1 = vmul.f32 %v5590_v53, %v1626_v62  ;;  %v1646_v14 = vsub.f32 1.5, %v1645_v2 }
 0x191   : > { %v5594_v63 = vpop.eup %5593 }
 0x192   : > { %v5596_v0 = vpop.eup %5595  ;;  %v1653_v3 = vmul.f32 %v5594_v63, %v1621_v54  ;;  %v1631_v10 = vsel %vm1630_vm5, %v5590_v53, %v1627_v1  ;;  %v1647_v21 = vmul.f32 %v5592_v56, %v1646_v14  ;;  %vm1659_vm13 = vweird.f32 %v5594_v63  ;;  %v1554_v53 = vld [vmem:[%s7774_s29 + $0x8] sm:$0xff] }
 0x193   : > { %v1633_v7 = vmul.f32 %v5596_v0, %v1619_v55  ;;  %v1662_v12 = vmul.f32 %v1631_v10, %v6166_v24  ;;  %vm1639_vm8 = vweird.f32 %v5596_v0  ;;  %vm1660_vm14 = vmor %vm1658_vm12, %vm1659_vm13 }
 0x194   : > { %v1654_v15 = vmul.f32 %v5594_v63, %v1653_v3  ;;  %vm1640_vm11 = vmor %vm1638_vm10, %vm1639_vm8  ;;  %v1651_v27 = vsel %vm1650_vm9, %v5592_v56, %v1647_v21  ;;  %v1553_v56 = vld [vmem:[%s7774_s29] sm:$0xff] }
 0x195   : > { %v1634_v11 = vmul.f32 %v5596_v0, %v1633_v7  ;;  %v1669_v17 = vmul.f32 %v5565_v8, %v1662_v12  ;;  %v1664_v31 = vmul.f32 %v1651_v27, %v6163_v23  ;;  %v1568_v23 = vld [vmem:[%s7774_s29 + $0x78] sm:$0xff] }
 0x196   : > { %v1655_v22 = vmul.f32 0.5, %v1654_v15  ;;  %1807 = vmatpush.msra.mxu1 %v1568_v23 }
 0x197   : > { %v1635_v16 = vmul.f32 0.5, %v1634_v11  ;;  %v1676_v20 = vadd.f32 %v5566_v13, %v1669_v17  ;;  %v1671_v35 = vmul.f32 %v5565_v8, %v1664_v31 }
 0x198   : > { %v1656_v28 = vsub.f32 1.5, %v1655_v22  ;;  %1808 = vmatpush.msra.mxu1 %v1567_v40 }
 0x199   : > { %v1636_v19 = vsub.f32 1.5, %v1635_v16  ;;  %5323 = vmatmul.msk.f32.vlgmr.msra.gmra.mxu0 %vm7667_vm1, %v1676_v20 }
 0x19a   : > { %v1657_v32 = vmul.f32 %v5594_v63, %v1656_v28  ;;  %1809 = vmatpush.msra.mxu1 %v1566_v41 }
 0x19b   : > { %v1637_v25 = vmul.f32 %v5596_v0, %v1636_v19 }
 0x19c   : > { %v1661_v36 = vsel %vm1660_vm14, %v5594_v63, %v1657_v32  ;;  %1810 = vmatpush.msra.mxu1 %v1565_v42 }
 0x19d   : > { %v1641_v24 = vsel %vm1640_vm11, %v5596_v0, %v1637_v25  ;;  %v1665_v37 = vmul.f32 %v1661_v36, %v6177_v33  ;;  %v1564_v33 = vld [vmem:[%s7774_s29 + $0x58] sm:$0xff]  ;;  %s5851_s29 = smov 80  }
 0x19e   : > { %v1663_v26 = vmul.f32 %v1641_v24, %v6180_v34  ;;  %v1678_v34 = vadd.f32 %v5566_v13, %v1671_v35  ;;  %1811 = vmatpush.msra.mxu1 %v1564_v33 }
 0x19f   : > { %v1672_v38 = vmul.f32 %v5565_v8, %v1665_v37 }
 0x1a0   : > { %v1670_v29 = vmul.f32 %v5565_v8, %v1663_v26  ;;  %1812 = vmatpush.msra.mxu1 %v1563_v43 }
 0x1a1   : > { %v1679_v39 = vadd.f32 %v5566_v13, %v1672_v38 }
 0x1a2   : > { %v1677_v30 = vadd.f32 %v5566_v13, %v1670_v29  ;;  %1813 = vmatpush.msra.mxu1 %v1562_v44 }
 0x1a4   : > { %5324 = vmatmul.msk.f32.gmra.mxu0 %vm7667_vm1, %v1677_v30  ;;  %1814 = vmatpush.msra.mxu1 %v1561_v45 }
 0x1a6   : > { %1815 = vmatpush.msra.mxu1 %v1560_v46 }
 0x1a8   : > { %1816 = vmatpush.msra.mxu1 %v1559_v47 }
 0x1aa   : > { %1817 = vmatpush.msra.mxu1 %v1558_v48 }
 0x1ac   : > { %5325 = vmatmul.msk.f32.gmra.mxu0 %vm7667_vm1, %v1678_v34  ;;  %1818 = vmatpush.msra.mxu1 %v1557_v49 }
 0x1ae   : > { %1819 = vmatpush.msra.mxu1 %v1556_v50 }
 0x1b0   : > { %1820 = vmatpush.msra.mxu1 %v1555_v52 }
 0x1b2   : > { %1821 = vmatpush.msra.mxu1 %v1554_v53 }
 0x1b4   : > { %5326 = vmatmul.msk.f32.gmra.mxu0 %vm7667_vm1, %v1679_v39  ;;  %1822 = vmatpush.msra.mxu1 %v1553_v56 }
 0x216   : > { %v1712_v54 = vpop.f32.mrf.mxu0 }
 0x217   : > { %v1713_v55 = vadd.f32 %v5567_v51, %v1712_v54 }
 0x219   : > { %v5327_v57 = vmul.f32 -1.442695, %v1713_v55 }
 0x21b   : > { %5597 = vpow2.f32 %v5327_v57 }
 0x221   : > { %v1715_v58 = vpop.f32.mrf.mxu0  ;;  %v5598_v60 = vpop.eup %5597 }
 0x222   : > { %v1716_v59 = vadd.f32 %v5567_v51, %v1715_v58  ;;  %v1736_v61 = vadd.f32 1.0, %v5598_v60  ;;  %v5568_v60 = vld [vmem:[%s7778_s4] ss:$0 sm:$0xff]  ;;  %s5854_s4 = smov 72  }
 0x224   : > { %v5328_v62 = vmul.f32 -1.442695, %v1716_v59  ;;  %5599 = vrcp.f32 %v1736_v61  ;;  %v1751_v11 = vand.u32 2147483648, %v1736_v61  ;;  %v1749_v14 = vand.u32 2147483647, %v1736_v61 }
 0x225   : > { %vm1745_vm0 = vweird.f32 %v1736_v61 }
 0x226   : > { %5601 = vpow2.f32 %v5328_v62  ;;  %v1752_v20 = vor.u32 1.1754944e-38, %v1751_v11  ;;  %vm1750_vm3 = vcmp.eq.f32.partialorder %v1749_v14, 8.507059e+37 }
 0x229   : > { %v1718_v63 = vpop.f32.mrf.mxu0 }
 0x22a   : > { %v6229_v0 = vadd.f32 %v5567_v51, %v1718_v63  ;;  %v5600_v1 = vpop.eup %5599 }
 0x22b   : > { %v1741_v7 = vmul.f32 %v5600_v1, %v1736_v61  ;;  %vm1746_vm15 = vweird.f32 %v5600_v1 }
 0x22c   : > { %v5329_v2 = vmul.f32 -1.442695, %v6229_v0  ;;  %v5602_v3 = vpop.eup %5601  ;;  %vm1747_vm2 = vmor %vm1745_vm0, %vm1746_vm15 }
 0x22d   : > { %v1737_v8 = vadd.f32 1.0, %v5602_v3  ;;  %v1742_v10 = vsub.f32 1.0, %v1741_v7 }
 0x22e   : > { %5603 = vpow2.f32 %v5329_v2 }
 0x22f   : > { %5605 = vrcp.f32 %v1737_v8  ;;  %v1743_v13 = vmul.f32 %v5600_v1, %v1742_v10  ;;  %v1766_v29 = vand.u32 2147483648, %v1737_v8  ;;  %v1764_v31 = vand.u32 2147483647, %v1737_v8 }
 0x230   : > { %vm1760_vm5 = vweird.f32 %v1737_v8 }
 0x231   : > { %v1721_v12 = vpop.f32.mrf.mxu0  ;;  %v1744_v16 = vadd.f32 %v5600_v1, %v1743_v13  ;;  %v1767_v37 = vor.u32 1.1754944e-38, %v1766_v29  ;;  %vm1765_vm7 = vcmp.eq.f32.partialorder %v1764_v31, 8.507059e+37 }
 0x232   : > { %v6232_v15 = vadd.f32 %v5567_v51, %v1721_v12 }
 0x233   : > { %v1748_v22 = vsel %vm1747_vm2, %v5600_v1, %v1744_v16 }
 0x234   : > { %v5604_v17 = vpop.eup %5603  ;;  %v5330_v19 = vmul.f32 -1.442695, %v6232_v15  ;;  %v1753_v24 = vsel %vm1750_vm3, %v1752_v20, %v1748_v22 }
 0x235   : > { %v1738_v21 = vadd.f32 1.0, %v5604_v17  ;;  %v5606_v25 = vpop.eup %5605  ;;  %v1800_v26 = vmul.f32 %v1753_v24, %v1713_v55 }
 0x236   : > { %5607 = vpow2.f32 %v5330_v19  ;;  %v1756_v27 = vmul.f32 %v5606_v25, %v1737_v8  ;;  %vm1761_vm4 = vweird.f32 %v5606_v25 }
 0x237   : > { %5609 = vrcp.f32 %v1738_v21  ;;  %1823 = vmatmul.f32.vlgmr.msra.gmra.mxu1 %v1800_v26  ;;  %vm1762_vm6 = vmor %vm1760_vm5, %vm1761_vm4  ;;  %v1781_v42 = vand.u32 2147483648, %v1738_v21  ;;  %v1779_v43 = vand.u32 2147483647, %v1738_v21  ;;  %vm1775_vm9 = vweird.f32 %v1738_v21 }
 0x238   : > { %v1757_v28 = vsub.f32 1.0, %v1756_v27 }
 0x239   : > { %v1782_v46 = vor.u32 1.1754944e-38, %v1781_v42  ;;  %vm1780_vm11 = vcmp.eq.f32.partialorder %v1779_v43, 8.507059e+37  ;;  %v1846_v42 = vld [vmem:[%s7779_s7] sm:$0xff] }
 0x23a   : > { %v1758_v30 = vmul.f32 %v5606_v25, %v1757_v28 }
 0x23c   : > { %v5608_v32 = vpop.eup %5607  ;;  %v1759_v34 = vadd.f32 %v5606_v25, %v1758_v30 }
 0x23d   : > { %v5610_v35 = vpop.eup %5609  ;;  %v1739_v36 = vadd.f32 1.0, %v5608_v32 }
 0x23e   : > { %v1771_v38 = vmul.f32 %v5610_v35, %v1738_v21  ;;  %v1763_v39 = vsel %vm1762_vm6, %v5606_v25, %v1759_v34  ;;  %vm1776_vm8 = vweird.f32 %v5610_v35 }
 0x23f   : > { %5611 = vrcp.f32 %v1739_v36  ;;  %v1768_v23 = vsel %vm1765_vm7, %v1767_v37, %v1763_v39  ;;  %vm1777_vm10 = vmor %vm1775_vm9, %vm1776_vm8  ;;  %v1796_v52 = vand.u32 2147483648, %v1739_v36  ;;  %v1794_v54 = vand.u32 2147483647, %v1739_v36 }
 0x240   : > { %v1772_v40 = vsub.f32 1.0, %v1771_v38  ;;  %v1801_v41 = vmul.f32 %v1768_v23, %v1716_v59  ;;  %vm1790_vm13 = vweird.f32 %v1739_v36  ;;  %v1849_v23 = vld [vmem:[%s7779_s7 + $0x18] sm:$0xff] }
 0x241   : > { %v1797_v56 = vor.u32 1.1754944e-38, %v1796_v52  ;;  %vm1795_vm15 = vcmp.eq.f32.partialorder %v1794_v54, 8.507059e+37  ;;  %1985 = vmatpush.msrb.mxu1 %v1849_v23  ;;  %5441 = vmatpush.msra.mxu2 %v1849_v23 }
 0x242   : > { %v1773_v33 = vmul.f32 %v5610_v35, %v1772_v40  ;;  %1826 = vmatmul.f32.gmra.mxu1 %v1801_v41  ;;  %v1848_v40 = vld [vmem:[%s7779_s7 + $0x10] sm:$0xff]  ;;  %v1847_v41 = vld [vmem:[%s7779_s7 + $0x8] sm:$0xff]  ;;  %s5855_s7 = smov 48  }
 0x243   : > { %1986 = vmatpush.msrb.mxu1 %v1848_v40  ;;  %5442 = vmatpush.msra.mxu2 %v1848_v40  ;;  %v5571_v40 = vld [vmem:[%s7785_s5] ss:$0 sm:$0xff]  ;;  %s7794_s5 = sld [smem:[#allocation48_spill]] }
 0x244   : > { %v1774_v44 = vadd.f32 %v5610_v35, %v1773_v33 }
 0x245   : > { %v5612_v45 = vpop.eup %5611  ;;  %1987 = vmatpush.msrb.mxu1 %v1847_v41  ;;  %5443 = vmatpush.msra.mxu2 %v1847_v41 }
 0x246   : > { %v1778_v47 = vsel %vm1777_vm10, %v5610_v35, %v1774_v44  ;;  %v1786_v48 = vmul.f32 %v5612_v45, %v1739_v36  ;;  %vm1791_vm12 = vweird.f32 %v5612_v45 }
 0x247   : > { %v1783_v49 = vsel %vm1780_vm11, %v1782_v46, %v1778_v47  ;;  %vm1792_vm14 = vmor %vm1790_vm13, %vm1791_vm12  ;;  %1988 = vmatpush.msrb.mxu1 %v1846_v42  ;;  %5444 = vmatpush.msra.mxu2 %v1846_v42  ;;  %vm2008_vm13 = vcmask 64512  }
 0x248   : > { %v1802_v50 = vmul.f32 %v1783_v49, %v6229_v0  ;;  %v1787_v51 = vsub.f32 1.0, %v1786_v48 }
 0x24a   : > { %v1788_v53 = vmul.f32 %v5612_v45, %v1787_v51  ;;  %1829 = vmatmul.f32.gmra.mxu1 %v1802_v50 }
 0x24c   : > { %v1789_v55 = vadd.f32 %v5612_v45, %v1788_v53 }
 0x24e   : > { %v1793_v57 = vsel %vm1792_vm14, %v5612_v45, %v1789_v55  ;;  %vm2077_vm14 = vcmask 130048  }
 0x24f   : > { %v1798_v58 = vsel %vm1795_vm15, %v1797_v56, %v1793_v57 }
 0x250   : > { %v1803_v59 = vmul.f32 %v1798_v58, %v6232_v15  ;;  %v5569_v58 = vld [vmem:[%s7782_s28] ss:$0 sm:$0xff]  ;;  %s7787_s28 = sld [smem:[#allocation17_spill]] }
 0x252   : > { %1832 = vmatmul.f32.gmra.mxu1 %v1803_v59 }
 0x2b4   : > { %v1824_v61 = vpop.f32.mrf.mxu1 }
 0x2b5   : > { %v1825_v62 = vadd.f32 %v5568_v60, %v1824_v61 }
 0x2b7   : > { %v1836_v63 = vmul.f32 0.5, %v1825_v62  ;;  %v5570_v62 = vld [vmem:[%s7783_s2] ss:$0 sm:$0xff]  ;;  %s7788_s2 = scalar_lea.vmem %s7787_s28, %s6059_s16 }
 0x2b9   : > { %v6241_v0 = vadd.f32 %v1836_v63, %v6144_v5 }
 0x2bb   : > { %v1856_v1 = vsel %vm7667_vm1, %v6241_v0, 0.0 }
 0x2bc   : > { %1857 = vadd.xlane.f32.xlu1 %v1856_v1 }
 0x2bf   : > { %v1827_v2 = vpop.f32.mrf.mxu1 }
 0x2c0   : > { %v1828_v3 = vadd.f32 %v5568_v60, %v1827_v2 }
 0x2c2   : > { %v1837_v7 = vmul.f32 0.5, %v1828_v3 }
 0x2c4   : > { %v6246_v8 = vadd.f32 %v1837_v7, %v6152_v9 }
 0x2c6   : > { %v1859_v10 = vsel %vm7667_vm1, %v6246_v8, 0.0 }
 0x2c7   : > { %1860 = vadd.xlane.f32.xlu2 %v1859_v10  ;;  %v1830_v11 = vpop.f32.mrf.mxu1 }
 0x2c8   : > { %v1831_v12 = vadd.f32 %v5568_v60, %v1830_v11 }
 0x2ca   : > { %v1838_v13 = vmul.f32 0.5, %v1831_v12 }
 0x2cc   : > { %v6251_v5 = vadd.f32 %v1838_v13, %v6142_v4 }
 0x2ce   : > { %v1862_v14 = vsel %vm7667_vm1, %v6251_v5, 0.0 }
 0x2cf   : > { %v1833_v15 = vpop.f32.mrf.mxu1  ;;  %1863 = vadd.xlane.f32.xlu0 %v1862_v14 }
 0x2d0   : > { %v1834_v16 = vadd.f32 %v5568_v60, %v1833_v15 }
 0x2d2   : > { %v1839_v17 = vmul.f32 0.5, %v1834_v16 }
 0x2d4   : > { %v6256_v9 = vadd.f32 %v1839_v17, %v6146_v6 }
 0x2d6   : > { %v1865_v19 = vsel %vm7667_vm1, %v6256_v9, 0.0 }
 0x2d7   : > { %1866 = vadd.xlane.f32.xlu2 %v1865_v19 }
 0x32f   : > { %v1858_v20 = vpop.xlane.xlu1 %1857 }
 0x330   : > { %v1868_v21 = vmul.f32 %v1858_v20, %v6158_v18 }
 0x332   : > { %v1872_v4 = vsub.f32 %v6241_v0, %v1868_v21 }
 0x334   : > { %v1876_v22 = vmul.f32 %v1872_v4, %v1872_v4 }
 0x336   : > { %v1880_v25 = vsel %vm7667_vm1, %v1876_v22, 0.0 }
 0x337   : > { %1881 = vadd.xlane.f32.xlu2 %v1880_v25 }
 0x33a   : > { %v1861_v24 = vpop.xlane.xlu2 %1860 }
 0x33b   : > { %v1869_v26 = vmul.f32 %v1861_v24, %v6158_v18 }
 0x33d   : > { %v6265_v27 = vsub.f32 %v6246_v8, %v1869_v26 }
 0x33f   : > { %v1877_v6 = vmul.f32 %v6265_v27, %v6265_v27 }
 0x341   : > { %v1883_v28 = vsel %vm7667_vm1, %v1877_v6, 0.0 }
 0x342   : > { %1884 = vadd.xlane.f32.xlu0 %v1883_v28  ;;  %v1864_v29 = vpop.xlane.xlu0 %1863 }
 0x343   : > { %v1870_v30 = vmul.f32 %v1864_v29, %v6158_v18 }
 0x345   : > { %v6272_v31 = vsub.f32 %v6251_v5, %v1870_v30 }
 0x347   : > { %v1878_v32 = vmul.f32 %v6272_v31, %v6272_v31 }
 0x349   : > { %v1886_v35 = vsel %vm7667_vm1, %v1878_v32, 0.0 }
 0x34a   : > { %v1867_v36 = vpop.xlane.xlu2 %1866  ;;  %1887 = vadd.xlane.f32.xlu1 %v1886_v35 }
 0x34b   : > { %v1871_v34 = vmul.f32 %v1867_v36, %v6158_v18 }
 0x34d   : > { %v6279_v37 = vsub.f32 %v6256_v9, %v1871_v34 }
 0x34f   : > { %v1879_v38 = vmul.f32 %v6279_v37, %v6279_v37 }
 0x351   : > { %v1889_v39 = vsel %vm7667_vm1, %v1879_v38, 0.0 }
 0x352   : > { %1890 = vadd.xlane.f32.xlu0 %v1889_v39 }
 0x3aa   : > { %v1882_v33 = vpop.xlane.xlu2 %1881 }
 0x3ab   : > { %v1892_v43 = vmul.f32 %v1882_v33, %v6158_v18 }
 0x3ad   : > { %v1896_v44 = vadd.f32 1e-05, %v1892_v43 }
 0x3af   : > { %5613 = vrsqrt.f32 %v1896_v44  ;;  %vm1906_vm2 = vweird.f32 %v1896_v44 }
 0x3b5   : > { %v1885_v45 = vpop.xlane.xlu0 %1884  ;;  %v5614_v46 = vpop.eup %5613 }
 0x3b6   : > { %v1893_v47 = vmul.f32 %v1885_v45, %v6158_v18  ;;  %v1901_v48 = vmul.f32 %v5614_v46, %v1896_v44  ;;  %vm1907_vm0 = vweird.f32 %v5614_v46 }
 0x3b7   : > { %vm1908_vm3 = vmor %vm1906_vm2, %vm1907_vm0 }
 0x3b8   : > { %v1897_v49 = vadd.f32 1e-05, %v1893_v47  ;;  %v1902_v50 = vmul.f32 %v5614_v46, %v1901_v48 }
 0x3ba   : > { %5615 = vrsqrt.f32 %v1897_v49  ;;  %v1903_v51 = vmul.f32 0.5, %v1902_v50  ;;  %vm1916_vm5 = vweird.f32 %v1897_v49 }
 0x3bc   : > { %v1904_v52 = vsub.f32 1.5, %v1903_v51 }
 0x3bd   : > { %v1888_v53 = vpop.xlane.xlu1 %1887 }
 0x3be   : > { %v1894_v54 = vmul.f32 %v1888_v53, %v6158_v18  ;;  %v1905_v55 = vmul.f32 %v5614_v46, %v1904_v52 }
 0x3c0   : > { %v5616_v56 = vpop.eup %5615  ;;  %v1898_v57 = vadd.f32 1e-05, %v1894_v54  ;;  %v1909_v59 = vsel %vm1908_vm3, %v5614_v46, %v1905_v55 }
 0x3c1   : > { %v1911_v60 = vmul.f32 %v5616_v56, %v1897_v49  ;;  %v1940_v61 = vmul.f32 %v1909_v59, %v1872_v4  ;;  %vm1917_vm4 = vweird.f32 %v5616_v56 }
 0x3c2   : > { %5617 = vrsqrt.f32 %v1898_v57  ;;  %vm1918_vm6 = vmor %vm1916_vm5, %vm1917_vm4  ;;  %vm1926_vm8 = vweird.f32 %v1898_v57 }
 0x3c3   : > { %v1912_v63 = vmul.f32 %v5616_v56, %v1911_v60  ;;  %v1947_v1 = vmul.f32 %v5569_v58, %v1940_v61 }
 0x3c5   : > { %v1913_v2 = vmul.f32 0.5, %v1912_v63  ;;  %v1891_v3 = vpop.xlane.xlu0 %1890  ;;  %v1954_v10 = vadd.f32 %v5570_v62, %v1947_v1 }
 0x3c6   : > { %v1895_v7 = vmul.f32 %v1891_v3, %v6158_v18 }
 0x3c7   : > { %v1914_v11 = vsub.f32 1.5, %v1913_v2  ;;  %5331 = vmatmul.msk.f32.vlgmr.msrb.gmra.mxu1 %vm7667_vm1, %v1954_v10 }
 0x3c8   : > { %v5618_v12 = vpop.eup %5617  ;;  %v1899_v13 = vadd.f32 1e-05, %v1895_v7 }
 0x3c9   : > { %v1915_v14 = vmul.f32 %v5616_v56, %v1914_v11  ;;  %v1921_v15 = vmul.f32 %v5618_v12, %v1898_v57  ;;  %vm1927_vm7 = vweird.f32 %v5618_v12 }
 0x3ca   : > { %5619 = vrsqrt.f32 %v1899_v13  ;;  %vm1928_vm9 = vmor %vm1926_vm8, %vm1927_vm7  ;;  %vm1936_vm11 = vweird.f32 %v1899_v13 }
 0x3cb   : > { %v1919_v16 = vsel %vm1918_vm6, %v5616_v56, %v1915_v14  ;;  %v1922_v17 = vmul.f32 %v5618_v12, %v1921_v15 }
 0x3cc   : > { %v1941_v19 = vmul.f32 %v1919_v16, %v6265_v27 }
 0x3cd   : > { %v1923_v20 = vmul.f32 0.5, %v1922_v17 }
 0x3ce   : > { %v1948_v21 = vmul.f32 %v5569_v58, %v1941_v19 }
 0x3cf   : > { %v1924_v4 = vsub.f32 1.5, %v1923_v20 }
 0x3d0   : > { %v5620_v22 = vpop.eup %5619  ;;  %v1955_v25 = vadd.f32 %v5570_v62, %v1948_v21 }
 0x3d1   : > { %v1925_v24 = vmul.f32 %v5618_v12, %v1924_v4  ;;  %v1931_v26 = vmul.f32 %v5620_v22, %v1899_v13  ;;  %vm1937_vm10 = vweird.f32 %v5620_v22 }
 0x3d2   : > { %5332 = vmatmul.msk.f32.vlgmr.msra.gmra.mxu2 %vm7667_vm1, %v1955_v25  ;;  %vm1938_vm12 = vmor %vm1936_vm11, %vm1937_vm10 }
 0x3d3   : > { %v1929_v6 = vsel %vm1928_vm9, %v5618_v12, %v1925_v24  ;;  %v1932_v28 = vmul.f32 %v5620_v22, %v1931_v26 }
 0x3d4   : > { %v1942_v29 = vmul.f32 %v1929_v6, %v6272_v31 }
 0x3d5   : > { %v1933_v30 = vmul.f32 0.5, %v1932_v28 }
 0x3d6   : > { %v1949_v27 = vmul.f32 %v5569_v58, %v1942_v29 }
 0x3d7   : > { %v1934_v32 = vsub.f32 1.5, %v1933_v30 }
 0x3d8   : > { %v1956_v35 = vadd.f32 %v5570_v62, %v1949_v27 }
 0x3d9   : > { %v1935_v36 = vmul.f32 %v5620_v22, %v1934_v32 }
 0x3da   : > { %5333 = vmatmul.msk.f32.gmra.mxu2 %vm7667_vm1, %v1956_v35 }
 0x3db   : > { %v1939_v34 = vsel %vm1938_vm12, %v5620_v22, %v1935_v36 }
 0x3dc   : > { %v1943_v38 = vmul.f32 %v1939_v34, %v6279_v37 }
 0x3de   : > { %v1950_v39 = vmul.f32 %v5569_v58, %v1943_v38 }
 0x3e0   : > { %v1957_v23 = vadd.f32 %v5570_v62, %v1950_v39 }
 0x3e2   : > { %5334 = vmatmul.msk.f32.gmra.mxu2 %vm7667_vm1, %v1957_v23 }
 0x444   : > { %v1990_v31 = vpop.f32.mrf.mxu1 }
 0x445   : > { %v6308_v41 = vadd.f32 %v5571_v40, %v1990_v31 }
 0x447   : > { %2004 = vrot.lane.b32.xlu2 %v6308_v41, %s5847_s9 }
 0x455   : > { %v1993_v42 = vpop.f32.mrf.mxu2 }
 0x456   : > { %v6311_v33 = vadd.f32 %v5571_v40, %v1993_v42 }
 0x458   : > { %2006 = vrot.lane.b32.xlu1 %v6311_v33, %s5847_s9  ;;  %v6354_v3 = vpack.i.bf16 %v6308_v41, %v6311_v33 }
 0x45d   : > { %v1996_v43 = vpop.f32.mrf.mxu2 }
 0x45e   : > { %v6314_v44 = vadd.f32 %v5571_v40, %v1996_v43 }
 0x460   : > { %2042 = vrot.lane.b32.xlu2 %v6314_v44, %s5847_s9  ;;  %2250 = vrot.lane.b32.xlu1 %v6311_v33, %s5848_s13 }
 0x465   : > { %v1999_v37 = vpop.f32.mrf.mxu2 }
 0x466   : > { %v6319_v45 = vadd.f32 %v5571_v40, %v1999_v37 }
 0x468   : > { %2244 = vrot.lane.b32.xlu2 %v6308_v41, %s5849_s17  ;;  %2246 = vrot.lane.b32.xlu1 %v6311_v33, %s5849_s17  ;;  %v6375_v24 = vpack.i.bf16 %v6314_v44, %v6319_v45 }
 0x469   : > { %2044 = vrot.lane.b32.xlu0 %v6319_v45, %s5847_s9  ;;  %s7795_s9 = sld [smem:[#allocation18_spill]] }
 0x471   : > { %2248 = vrot.lane.b32.xlu0 %v6308_v41, %s5848_s13 }
 0x4a1   : > { %v2005_v47 = vpop.permute.xlu2 %2004 }
 0x4ba   : > { %v2043_v49 = vpop.permute.xlu2 %2042 }
 0x4c2   : > { %v2245_v52 = vpop.permute.xlu2 %2244 }
 0x4ca   : > { %v2007_v46 = vpop.permute.xlu1 %2006 }
 0x4cb   : > { %5335 = vmatpush.xpose.msk.msrb.mxu0 %vm2008_vm13, %v2007_v46  ;;  %5445 = vmatpush.xpose.msk.msra.mxu3 %vm2008_vm13, %v2007_v46 }
 0x4cf   : > { %5336 = vmatpush.xpose.msk.msrb.mxu0 %vm2008_vm13, %v2005_v47  ;;  %5446 = vmatpush.xpose.msk.msra.mxu3 %vm2008_vm13, %v2005_v47 }
 0x4d2   : > { %5337 = vmatmul.msk.f32.vlgmr.msrb.gmra.mxu0 %vm2008_vm13, %v6308_v41  ;;  %5338 = vmatmul.msk.f32.vlgmr.msra.gmra.mxu3 %vm2008_vm13, %v6311_v33  ;;  %v2251_v50 = vpop.permute.xlu1 %2250 }
 0x4da   : > { %v2247_v53 = vpop.permute.xlu1 %2246 }
 0x4db   : > { %v2045_v48 = vpop.permute.xlu0 %2044 }
 0x4dc   : > { %5339 = vmatpush.xpose.msk.msrb.mxu3 %vm2008_vm13, %v2045_v48 }
 0x4e0   : > { %5340 = vmatpush.xpose.msk.msrb.mxu3 %vm2008_vm13, %v2043_v49 }
 0x4e3   : > { %5341 = vmatmul.msk.f32.vlgmr.msrb.gmra.mxu3 %vm2008_vm13, %v6314_v44  ;;  %v2249_v51 = vpop.permute.xlu0 %2248 }
 0x4e4   : > { %5347 = vmatpush.xpose.msk.msra.mxu3 %vm2008_vm13, %v2251_v50 }
 0x4e8   : > { %5348 = vmatpush.xpose.msk.msra.mxu3 %vm2008_vm13, %v2249_v51 }
 0x4eb   : > { %5342 = vmatmul.msk.f32.gmra.mxu3 %vm2008_vm13, %v6319_v45 }
 0x4f3   : > { %5349 = vmatmul.msk.f32.vlgmr.msra.gmra.mxu3 %vm2008_vm13, %v2245_v52 }
 0x4fb   : > { %5350 = vmatmul.msk.f32.gmra.mxu3 %vm2008_vm13, %v2247_v53 }
 0x54f   : > { %v2034_v54 = vpop.f32.mrf.mxu0 }
 0x550   : > { %v2078_v55 = vsel %vm2077_vm14, %v2034_v54, -inf }
 0x551   : > { %2079 = vmax.xlane.f32.xlu0 %v2078_v55 }
 0x555   : > { %v2037_v56 = vpop.f32.mrf.mxu3 }
 0x556   : > { %v2081_v57 = vsel %vm2077_vm14, %v2037_v56, -inf }
 0x557   : > { %2082 = vmax.xlane.f32.xlu2 %v2081_v57 }
 0x566   : > { %v2071_v58 = vpop.f32.mrf.mxu3 }
 0x567   : > { %v2084_v59 = vsel %vm2077_vm14, %v2071_v58, -inf }
 0x568   : > { %2085 = vmax.xlane.f32.xlu1 %v2084_v59 }
 0x56e   : > { %v2074_v60 = vpop.f32.mrf.mxu3 }
 0x56f   : > { %v2087_v61 = vsel %vm2077_vm14, %v2074_v60, -inf }
 0x570   : > { %2088 = vmax.xlane.f32.xlu0 %v2087_v61 }
 0x576   : > { %v2277_v62 = vpop.f32.mrf.mxu3 }
 0x577   : > { %v2322_v63 = vsel %vm2077_vm14, %v2277_v62, -inf }
 0x578   : > { %2323 = vmax.xlane.f32.xlu2 %v2322_v63 }
 0x57e   : > { %v2280_v1 = vpop.f32.mrf.mxu3 }
 0x57f   : > { %v2325_v2 = vsel %vm2077_vm14, %v2280_v1, -inf }
 0x580   : > { %2326 = vmax.xlane.f32.xlu1 %v2325_v2 }
 0x584   : > { %5526 = vrot.lane.b32.xlu0 %v6354_v3, %s5850_s21 }
 0x5c4   : > { %v2080_v7 = vpop.xlane.xlu0 %2079 }
 0x5c5   : > { %v2090_v10 = vsub.f32 %v2034_v54, %v2080_v7 }
 0x5c7   : > { %v2094_v11 = vmul.f32 1.442695, %v2090_v10 }
 0x5c9   : > { %5621 = vpow2.f32 %v2094_v11 }
 0x5ca   : > { %v2083_v12 = vpop.xlane.xlu2 %2082 }
 0x5cb   : > { %v2091_v13 = vsub.f32 %v2037_v56, %v2083_v12 }
 0x5cd   : > { %v2096_v14 = vmul.f32 1.442695, %v2091_v13 }
 0x5cf   : > { %v6357_v15 = vpop.eup %5621  ;;  %5623 = vpow2.f32 %v2096_v14 }
 0x5d0   : > { %v2102_v16 = vsel %vm2077_vm14, %v6357_v15, 0.0 }
 0x5d1   : > { %2103 = vadd.xlane.f32.xlu0 %v2102_v16 }
 0x5d5   : > { %v6361_v17 = vpop.eup %5623 }
 0x5d6   : > { %v2105_v19 = vsel %vm2077_vm14, %v6361_v17, 0.0 }
 0x5d7   : > { %2106 = vadd.xlane.f32.xlu2 %v2105_v19 }
 0x5db   : > { %v2086_v20 = vpop.xlane.xlu1 %2085 }
 0x5dc   : > { %v2092_v21 = vsub.f32 %v2071_v58, %v2086_v20 }
 0x5de   : > { %v2098_v4 = vmul.f32 1.442695, %v2092_v21 }
 0x5e0   : > { %5625 = vpow2.f32 %v2098_v4 }
 0x5e3   : > { %v2089_v26 = vpop.xlane.xlu0 %2088 }
 0x5e4   : > { %v2093_v30 = vsub.f32 %v2074_v60, %v2089_v26 }
 0x5e5   : > { %2287 = vrot.lane.b32.xlu0 %v6314_v44, %s5848_s13 }
 0x5e6   : > { %v6367_v22 = vpop.eup %5625  ;;  %v2100_v27 = vmul.f32 1.442695, %v2093_v30 }
 0x5e7   : > { %v2108_v25 = vsel %vm2077_vm14, %v6367_v22, 0.0 }
 0x5e8   : > { %2109 = vadd.xlane.f32.xlu1 %v2108_v25  ;;  %5627 = vpow2.f32 %v2100_v27 }
 0x5eb   : > { %v2324_v32 = vpop.xlane.xlu2 %2323 }
 0x5ec   : > { %v2334_v35 = vsub.f32 %v2277_v62, %v2324_v32 }
 0x5ed   : > { %2283 = vrot.lane.b32.xlu0 %v6314_v44, %s5849_s17 }
 0x5ee   : > { %v2338_v36 = vmul.f32 1.442695, %v2334_v35  ;;  %v6386_v34 = vpop.eup %5627 }
 0x5ef   : > { %5531 = vrot.lane.b32.xlu2 %v6375_v24, %s5850_s21  ;;  %v2111_v39 = vsel %vm2077_vm14, %v6386_v34, 0.0 }
 0x5f0   : > { %5629 = vpow2.f32 %v2338_v36 }
 0x5f3   : > { %v2327_v38 = vpop.xlane.xlu1 %2326 }
 0x5f4   : > { %v2335_v23 = vsub.f32 %v2280_v1, %v2327_v38 }
 0x5f5   : > { %2285 = vrot.lane.b32.xlu0 %v6319_v45, %s5849_s17  ;;  %s7797_s17 = scalar_lea.vmem %s7795_s9, %s6059_s16 }
 0x5f6   : > { %v5527_v6 = vpop.permute.xlu0 %5526  ;;  %v6390_v40 = vpop.eup %5629  ;;  %v2340_v31 = vmul.f32 1.442695, %v2335_v23 }
 0x5f7   : > { %v5528_v28 = vunpack.i.l.bf16 %v5527_v6  ;;  %v5529_v29 = vunpack.i.h.bf16 %v5527_v6  ;;  %v2346_v42 = vsel %vm2077_vm14, %v6390_v40, 0.0 }
 0x5f8   : > { %5631 = vpow2.f32 %v2340_v31 }
 0x5f9   : > { %2200 = vmatpush.msra.mxu0 %v5528_v28 }
 0x5fb   : > { %2201 = vmatpush.msra.mxu0 %v5529_v29 }
 0x5fd   : > { %2576 = vrot.lane.b32.xlu0 %v6311_v33, %s5851_s29 }
 0x5fe   : > { %v6394_v43 = vpop.eup %5631 }
 0x5ff   : > { %v2349_v37 = vsel %vm2077_vm14, %v6394_v43, 0.0 }
 0x601   : > { %2289 = vrot.lane.b32.xlu1 %v6319_v45, %s5848_s13  ;;  %s7796_s13 = sld [smem:[#allocation19_spill]] }
 0x605   : > { %2570 = vrot.lane.b32.xlu0 %v6308_v41, %s5852_s19 }
 0x607   : > { %s7798_s21 = scalar_lea.vmem %s7796_s13, %s6059_s16 }
 0x618   : > { %2112 = vadd.xlane.f32.xlu2 %v2111_v39 }
 0x620   : > { %2347 = vadd.xlane.f32.xlu2 %v2346_v42 }
 0x62b   : > { %2350 = vadd.xlane.f32.xlu1 %v2349_v37 }
 0x638   : > { %5536 = vrot.lane.b32.xlu2 %v6354_v3, %s5853_s20 }
 0x640   : > { %2574 = vrot.lane.b32.xlu2 %v6308_v41, %s5851_s29 }
 0x644   : > { %v2104_v46 = vpop.xlane.xlu0 %2103 }
 0x645   : > { %5633 = vrcp.f32 %v2104_v46  ;;  %v2125_v51 = vand.u32 2147483648, %v2104_v46  ;;  %v2123_v53 = vand.u32 2147483647, %v2104_v46  ;;  %vm2119_vm0 = vweird.f32 %v2104_v46 }
 0x647   : > { %v2126_v58 = vor.u32 1.1754944e-38, %v2125_v51  ;;  %vm2124_vm3 = vcmp.eq.f32.partialorder %v2123_v53, 8.507059e+37 }
 0x648   : > { %2572 = vrot.lane.b32.xlu2 %v6311_v33, %s5852_s19 }
 0x64a   : > { %v2107_v47 = vpop.xlane.xlu2 %2106 }
 0x64b   : > { %v5634_v48 = vpop.eup %5633  ;;  %5635 = vrcp.f32 %v2107_v47  ;;  %v2140_v63 = vand.u32 2147483648, %v2107_v47  ;;  %v2138_v10 = vand.u32 2147483647, %v2107_v47  ;;  %vm2134_vm5 = vweird.f32 %v2107_v47 }
 0x64c   : > { %v2115_v49 = vmul.f32 %v5634_v48, %v2104_v46  ;;  %vm2120_vm15 = vweird.f32 %v5634_v48 }
 0x64d   : > { %vm2121_vm2 = vmor %vm2119_vm0, %vm2120_vm15  ;;  %v2141_v12 = vor.u32 1.1754944e-38, %v2140_v63  ;;  %vm2139_vm7 = vcmp.eq.f32.partialorder %v2138_v10, 8.507059e+37 }
 0x64e   : > { %v2116_v50 = vsub.f32 1.0, %v2115_v49 }
 0x650   : > { %v2117_v52 = vmul.f32 %v5634_v48, %v2116_v50 }
 0x651   : > { %v5636_v54 = vpop.eup %5635 }
 0x652   : > { %v2118_v55 = vadd.f32 %v5634_v48, %v2117_v52  ;;  %v2130_v56 = vmul.f32 %v5636_v54, %v2107_v47  ;;  %v5532_v57 = vpop.permute.xlu2 %5531  ;;  %vm2135_vm4 = vweird.f32 %v5636_v54 }
 0x653   : > { %v5533_v59 = vunpack.i.l.bf16 %v5532_v57  ;;  %v5534_v1 = vunpack.i.h.bf16 %v5532_v57  ;;  %vm2136_vm6 = vmor %vm2134_vm5, %vm2135_vm4 }
 0x654   : > { %v2122_v60 = vsel %vm2121_vm2, %v5634_v48, %v2118_v55  ;;  %v2131_v61 = vsub.f32 1.0, %v2130_v56 }
 0x655   : > { %v2127_v62 = vsel %vm2124_vm3, %v2126_v58, %v2122_v60  ;;  %2235 = vmatpush.msrb.mxu2 %v5533_v59 }
 0x656   : > { %v2132_v2 = vmul.f32 %v5636_v54, %v2131_v61  ;;  %v2128_v7 = vmul.f32 %v6357_v15, %v2127_v62 }
 0x657   : > { %2236 = vmatpush.msrb.mxu2 %v5534_v1  ;;  %v2288_v32 = vpop.permute.xlu0 %2287 }
 0x658   : > { %5343 = vmatmul.msk.f32.vlgmr.msra.gmra.mxu0 %vm2077_vm14, %v2128_v7  ;;  %v2133_v11 = vadd.f32 %v5636_v54, %v2132_v2 }
 0x65a   : > { %v2137_v13 = vsel %vm2136_vm6, %v5636_v54, %v2133_v11 }
 0x65b   : > { %v2110_v14 = vpop.xlane.xlu1 %2109  ;;  %v2142_v16 = vsel %vm2139_vm7, %v2141_v12, %v2137_v13 }
 0x65c   : > { %5637 = vrcp.f32 %v2110_v14  ;;  %v2143_v19 = vmul.f32 %v6361_v17, %v2142_v16  ;;  %v2155_v4 = vand.u32 2147483648, %v2110_v14  ;;  %v2153_v26 = vand.u32 2147483647, %v2110_v14 }
 0x65d   : > { %vm2149_vm9 = vweird.f32 %v2110_v14 }
 0x65e   : > { %v2156_v28 = vor.u32 1.1754944e-38, %v2155_v4  ;;  %vm2154_vm11 = vcmp.eq.f32.partialorder %v2153_v26, 8.507059e+37 }
 0x65f   : > { %v2284_v35 = vpop.permute.xlu0 %2283 }
 0x660   : > { %5344 = vmatmul.msk.f32.gmra.mxu0 %vm2077_vm14, %v2143_v19 }
 0x662   : > { %v5638_v20 = vpop.eup %5637 }
 0x663   : > { %v2145_v15 = vmul.f32 %v5638_v20, %v2110_v14  ;;  %vm2150_vm8 = vweird.f32 %v5638_v20 }
 0x664   : > { %vm2151_vm10 = vmor %vm2149_vm9, %vm2150_vm8 }
 0x665   : > { %v2146_v21 = vsub.f32 1.0, %v2145_v15 }
 0x667   : > { %v2147_v25 = vmul.f32 %v5638_v20, %v2146_v21  ;;  %v2286_v36 = vpop.permute.xlu0 %2285 }
 0x669   : > { %v2148_v6 = vadd.f32 %v5638_v20, %v2147_v25 }
 0x66b   : > { %v2152_v29 = vsel %vm2151_vm10, %v5638_v20, %v2148_v6 }
 0x66c   : > { %v2157_v30 = vsel %vm2154_vm11, %v2156_v28, %v2152_v29 }
 0x66d   : > { %v2158_v27 = vmul.f32 %v6367_v22, %v2157_v30 }
 0x66f   : > { %5345 = vmatmul.msk.f32.vlgmr.msrb.gmra.mxu2 %vm2077_vm14, %v2158_v27  ;;  %v2577_v62 = vpop.permute.xlu0 %2576 }
 0x673   : > { %v2290_v17 = vpop.permute.xlu1 %2289 }
 0x674   : > { %5351 = vmatpush.xpose.msk.msrb.mxu0 %vm2008_vm13, %v2290_v17 }
 0x677   : > { %v2571_v26 = vpop.permute.xlu0 %2570 }
 0x678   : > { %5352 = vmatpush.xpose.msk.msrb.mxu0 %vm2008_vm13, %v2288_v32 }
 0x67b   : > { %5353 = vmatmul.msk.f32.vlgmr.msrb.gmra.mxu0 %vm2008_vm13, %v2284_v35  ;;  %v1852_v35 = vld [vmem:[%s7786_s27 + $0x8] sm:$0xff] }
 0x67c   : > { %2515 = vmatpush.msra.mxu1 %v1852_v35 }
 0x683   : > { %5354 = vmatmul.msk.f32.gmra.mxu0 %vm2008_vm13, %v2286_v36 }
 0x68b   : > { %v2113_v38 = vpop.xlane.xlu2 %2112 }
 0x68c   : > { %5639 = vrcp.f32 %v2113_v38  ;;  %v2170_v42 = vand.u32 2147483648, %v2113_v38  ;;  %v2168_v46 = vand.u32 2147483647, %v2113_v38  ;;  %vm2164_vm15 = vweird.f32 %v2113_v38 }
 0x68e   : > { %v2171_v49 = vor.u32 1.1754944e-38, %v2170_v42  ;;  %vm2169_vm2 = vcmp.eq.f32.partialorder %v2168_v46, 8.507059e+37 }
 0x692   : > { %v5640_v39 = vpop.eup %5639 }
 0x693   : > { %v2160_v23 = vmul.f32 %v5640_v39, %v2113_v38  ;;  %v2348_v31 = vpop.xlane.xlu2 %2347  ;;  %vm2165_vm12 = vweird.f32 %v5640_v39 }
 0x694   : > { %5641 = vrcp.f32 %v2348_v31  ;;  %vm2166_vm0 = vmor %vm2164_vm15, %vm2165_vm12  ;;  %v2369_v57 = vand.u32 2147483648, %v2348_v31  ;;  %v2367_v61 = vand.u32 2147483647, %v2348_v31  ;;  %vm2363_vm4 = vweird.f32 %v2348_v31 }
 0x695   : > { %v2161_v22 = vsub.f32 1.0, %v2160_v23 }
 0x696   : > { %v2370_v1 = vor.u32 1.1754944e-38, %v2369_v57  ;;  %vm2368_vm6 = vcmp.eq.f32.partialorder %v2367_v61, 8.507059e+37 }
 0x697   : > { %v2162_v37 = vmul.f32 %v5640_v39, %v2161_v22 }
 0x699   : > { %v2163_v47 = vadd.f32 %v5640_v39, %v2162_v37 }
 0x69a   : > { %v5642_v48 = vpop.eup %5641 }
 0x69b   : > { %v2359_v50 = vmul.f32 %v5642_v48, %v2348_v31  ;;  %v5537_v51 = vpop.permute.xlu2 %5536  ;;  %v2167_v52 = vsel %vm2166_vm0, %v5640_v39, %v2163_v47  ;;  %vm2364_vm3 = vweird.f32 %v5642_v48 }
 0x69c   : > { %v5538_v53 = vunpack.i.l.bf16 %v5537_v51  ;;  %v2172_v54 = vsel %vm2169_vm2, %v2171_v49, %v2167_v52  ;;  %v5539_v58 = vunpack.i.h.bf16 %v5537_v51  ;;  %vm2365_vm5 = vmor %vm2363_vm4, %vm2364_vm3 }
 0x69d   : > { %v2360_v55 = vsub.f32 1.0, %v2359_v50  ;;  %v2173_v56 = vmul.f32 %v6386_v34, %v2172_v54 }
 0x69e   : > { %v2351_v59 = vpop.xlane.xlu1 %2350  ;;  %2444 = vmatpush.msra.mxu2 %v5538_v53 }
 0x69f   : > { %v2361_v60 = vmul.f32 %v5642_v48, %v2360_v55  ;;  %5643 = vrcp.f32 %v2351_v59  ;;  %5346 = vmatmul.msk.f32.gmra.mxu2 %vm2077_vm14, %v2173_v56  ;;  %v2384_v14 = vand.u32 2147483648, %v2351_v59  ;;  %v2382_v19 = vand.u32 2147483647, %v2351_v59 }
 0x6a0   : > { %2445 = vmatpush.msra.mxu2 %v5539_v58  ;;  %vm2378_vm8 = vweird.f32 %v2351_v59 }
 0x6a1   : > { %v2362_v63 = vadd.f32 %v5642_v48, %v2361_v60  ;;  %v2385_v15 = vor.u32 1.1754944e-38, %v2384_v14  ;;  %vm2383_vm10 = vcmp.eq.f32.partialorder %v2382_v19, 8.507059e+37 }
 0x6a2   : > { %5367 = vmatpush.xpose.msk.msrb.mxu2 %vm2008_vm13, %v2577_v62 }
 0x6a3   : > { %v2366_v2 = vsel %vm2365_vm5, %v5642_v48, %v2362_v63  ;;  %v2575_v34 = vpop.permute.xlu2 %2574 }
 0x6a4   : > { %v2371_v7 = vsel %vm2368_vm6, %v2370_v1, %v2366_v2 }
 0x6a5   : > { %v5644_v10 = vpop.eup %5643  ;;  %v2372_v11 = vmul.f32 %v6390_v40, %v2371_v7  ;;  %v1851_v40 = vld [vmem:[%s7786_s27] sm:$0xff] }
 0x6a6   : > { %5368 = vmatpush.xpose.msk.msrb.mxu2 %vm2008_vm13, %v2575_v34  ;;  %v2374_v12 = vmul.f32 %v5644_v10, %v2351_v59  ;;  %vm2379_vm7 = vweird.f32 %v5644_v10  ;;  %2556 = vmatpush.msra.mxu0 %v1851_v40 }
 0x6a7   : > { %5355 = vmatmul.msk.f32.vlgmr.msra.gmra.mxu2 %vm2077_vm14, %v2372_v11  ;;  %vm2380_vm9 = vmor %vm2378_vm8, %vm2379_vm7 }
 0x6a8   : > { %v2375_v13 = vsub.f32 1.0, %v2374_v12 }
 0x6aa   : > { %v2376_v16 = vmul.f32 %v5644_v10, %v2375_v13 }
 0x6ab   : > { %v2573_v6 = vpop.permute.xlu2 %2572 }
 0x6ac   : > { %v2377_v20 = vadd.f32 %v5644_v10, %v2376_v16 }
 0x6ae   : > { %v2381_v21 = vsel %vm2380_vm9, %v5644_v10, %v2377_v20 }
 0x6af   : > { %v2386_v4 = vsel %vm2383_vm10, %v2385_v15, %v2381_v21 }
 0x6b0   : > { %v2387_v25 = vmul.f32 %v6394_v43, %v2386_v4 }
 0x6b2   : > { %5356 = vmatmul.msk.f32.gmra.mxu2 %vm2077_vm14, %v2387_v25 }
 0x6ba   : > { %5369 = vmatmul.msk.f32.vlgmr.msrb.gmra.mxu2 %vm2008_vm13, %v2571_v26 }
 0x6c2   : > { %5370 = vmatmul.msk.f32.gmra.mxu2 %vm2008_vm13, %v2573_v6 }
 0x6d5   : > { %v2203_v28 = vpop.f32.mrf.mxu0 }
 0x6d6   : > { %5363 = vmatmul.msk.f32.vlgmr.msra.gmra.mxu0 %vm2008_vm13, %v2203_v28 }
 0x6dd   : > { %v2206_v29 = vpop.f32.mrf.mxu0 }
 0x6de   : > { %5364 = vmatmul.msk.f32.gmra.mxu0 %vm2008_vm13, %v2206_v29 }
 0x6f2   : > { %v2238_v30 = vpop.f32.mrf.mxu2 }
 0x6f3   : > { %5365 = vmatmul.msk.f32.gmra.mxu0 %vm2008_vm13, %v2238_v30 }
 0x6f8   : > { %v2316_v43 = vpop.f32.mrf.mxu0 }
 0x6f9   : > { %v2328_v27 = vsel %vm2077_vm14, %v2316_v43, -inf }
 0x6fa   : > { %2329 = vmax.xlane.f32.xlu0 %v2328_v27 }
 0x700   : > { %v2319_v32 = vpop.f32.mrf.mxu0 }
 0x701   : > { %v2331_v17 = vsel %vm2077_vm14, %v2319_v32, -inf }
 0x702   : > { %2332 = vmax.xlane.f32.xlu2 %v2331_v17 }
 0x70e   : > { %5541 = vrot.lane.b32.xlu0 %v6375_v24, %s5853_s20  ;;  %s7801_s20 = sld [smem:[#allocation21_spill]] }
 0x716   : > { %2609 = vrot.lane.b32.xlu0 %v6314_v44, %s5852_s19 }
 0x71a   : > { %2613 = vrot.lane.b32.xlu2 %v6314_v44, %s5851_s29 }
 0x71e   : > { %2611 = vrot.lane.b32.xlu0 %v6319_v45, %s5852_s19 }
 0x722   : > { %v2241_v36 = vpop.f32.mrf.mxu2 }
 0x723   : > { %5366 = vmatmul.msk.f32.gmra.mxu0 %vm2008_vm13, %v2241_v36 }
 0x726   : > { %2865 = vrot.lane.b32.xlu0 %v6311_v33, %s5854_s4 }
 0x72a   : > { %v2447_v38 = vpop.f32.mrf.mxu2 }
 0x72b   : > { %5359 = vmatmul.msk.f32.vlgmr.msra.gmra.mxu1 %vm2008_vm13, %v2447_v38 }
 0x72e   : > { %5546 = vrot.lane.b32.xlu0 %v6354_v3, %s5855_s7 }
 0x735   : > { %v2450_v39 = vpop.f32.mrf.mxu2 }
 0x736   : > { %5360 = vmatmul.msk.f32.gmra.mxu1 %vm2008_vm13, %v2450_v39  ;;  %2863 = vrot.lane.b32.xlu0 %v6308_v41, %s5854_s4 }
 0x73d   : > { %v2603_v23 = vpop.f32.mrf.mxu2 }
 0x73e   : > { %2859 = vrot.lane.b32.xlu0 %v6308_v41, %s5856_s11  ;;  %v2648_v31 = vsel %vm2077_vm14, %v2603_v23, -inf }
 0x73f   : > { %2649 = vmax.xlane.f32.xlu1 %v2648_v31 }
 0x745   : > { %v2606_v22 = vpop.f32.mrf.mxu2 }
 0x746   : > { %2861 = vrot.lane.b32.xlu0 %v6311_v33, %s5856_s11  ;;  %v2651_v42 = vsel %vm2077_vm14, %v2606_v22, -inf }
 0x747   : > { %2652 = vmax.xlane.f32.xlu1 %v2651_v42 }
 0x74e   : > { %2898 = vrot.lane.b32.xlu0 %v6314_v44, %s5856_s11 }
 0x753   : > { %v6488_v42 = vpop.f32.mrf.mxu0 }
 0x756   : > { %2900 = vrot.lane.b32.xlu0 %v6319_v45, %s5856_s11 }
 0x76d   : > { %v2330_v37 = vpop.xlane.xlu0 %2329 }
 0x76e   : > { %v2336_v46 = vsub.f32 %v2316_v43, %v2330_v37 }
 0x770   : > { %v2342_v47 = vmul.f32 1.442695, %v2336_v46 }
 0x772   : > { %5645 = vpow2.f32 %v2342_v47  ;;  %v6494_v47 = vpop.f32.mrf.mxu0 }
 0x775   : > { %v2333_v48 = vpop.xlane.xlu2 %2332 }
 0x776   : > { %v2337_v49 = vsub.f32 %v2319_v32, %v2333_v48 }
 0x778   : > { %v6454_v41 = vpop.eup %5645  ;;  %v2344_v50 = vmul.f32 1.442695, %v2337_v49 }
 0x779   : > { %v2352_v51 = vsel %vm2077_vm14, %v6454_v41, 0.0 }
 0x77a   : > { %5647 = vpow2.f32 %v2344_v50  ;;  %2353 = vadd.xlane.f32.xlu1 %v2352_v51  ;;  %v6498_v48 = vpop.f32.mrf.mxu0 }
 0x77d   : > { %v2614_v46 = vpop.permute.xlu2 %2613 }
 0x780   : > { %v6458_v33 = vpop.eup %5647  ;;  %v5542_v52 = vpop.permute.xlu0 %5541 }
 0x781   : > { %v5543_v53 = vunpack.i.l.bf16 %v5542_v52  ;;  %v2355_v54 = vsel %vm2077_vm14, %v6458_v33, 0.0  ;;  %v5544_v55 = vunpack.i.h.bf16 %v5542_v52 }
 0x782   : > { %2356 = vadd.xlane.f32.xlu1 %v2355_v54 }
 0x783   : > { %2479 = vmatpush.msrb.mxu3 %v5543_v53 }
 0x785   : > { %2480 = vmatpush.msrb.mxu3 %v5544_v55 }
 0x788   : > { %v6462_v56 = vpop.permute.xlu0 %2609 }
 0x790   : > { %v6464_v57 = vpop.permute.xlu0 %2611 }
 0x798   : > { %v2866_v58 = vpop.permute.xlu0 %2865 }
 0x799   : > { %5383 = vmatpush.xpose.msk.msrb.mxu0 %vm2008_vm13, %v2866_v58 }
 0x79b   : > { %2615 = vrot.lane.b32.xlu1 %v6319_v45, %s5851_s29  ;;  %s7799_s29 = sld [smem:[#allocation23_spill]] }
 0x7a0   : > { %v5547_v59 = vpop.permute.xlu0 %5546  ;;  %v6500_v49 = vpop.f32.mrf.mxu0 }
 0x7a1   : > { %v5548_v60 = vunpack.i.l.bf16 %v5547_v59  ;;  %v5549_v61 = vunpack.i.h.bf16 %v5547_v59  ;;  %s7800_s19 = scalar_lea.vmem %s7799_s29, %s6059_s16 }
 0x7a3   : > { %2770 = vmatpush.msra.mxu2 %v5548_v60 }
 0x7a5   : > { %2771 = vmatpush.msra.mxu2 %v5549_v61 }
 0x7a8   : > { %v2864_v62 = vpop.permute.xlu0 %2863 }
 0x7a9   : > { %5384 = vmatpush.xpose.msk.msrb.mxu0 %vm2008_vm13, %v2864_v62 }
 0x7b0   : > { %v2860_v63 = vpop.permute.xlu0 %2859 }
 0x7b1   : > { %5385 = vmatmul.msk.f32.vlgmr.msrb.gmra.mxu0 %vm2008_vm13, %v2860_v63 }
 0x7b2   : > { %v2650_v1 = vpop.xlane.xlu1 %2649 }
 0x7b3   : > { %v2660_v2 = vsub.f32 %v2603_v23, %v2650_v1 }
 0x7b5   : > { %v2664_v34 = vmul.f32 1.442695, %v2660_v2 }
 0x7b7   : > { %5649 = vpow2.f32 %v2664_v34 }
 0x7b8   : > { %v2862_v7 = vpop.permute.xlu0 %2861 }
 0x7b9   : > { %5386 = vmatmul.msk.f32.gmra.mxu0 %vm2008_vm13, %v2862_v7 }
 0x7ba   : > { %v2653_v10 = vpop.xlane.xlu1 %2652 }
 0x7bb   : > { %v2661_v11 = vsub.f32 %v2606_v22, %v2653_v10 }
 0x7bd   : > { %v2666_v12 = vmul.f32 1.442695, %v2661_v11  ;;  %v6472_v13 = vpop.eup %5649 }
 0x7be   : > { %v2672_v14 = vsel %vm2077_vm14, %v6472_v13, 0.0 }
 0x7bf   : > { %5651 = vpow2.f32 %v2666_v12 }
 0x7c5   : > { %v6476_v16 = vpop.eup %5651  ;;  %2673 = vadd.xlane.f32.xlu1 %v2672_v14 }
 0x7c6   : > { %v2675_v19 = vsel %vm2077_vm14, %v6476_v16, 0.0 }
 0x7c7   : > { %2676 = vadd.xlane.f32.xlu2 %v2675_v19 }
 0x7de   : > { %2904 = vrot.lane.b32.xlu1 %v6319_v45, %s5854_s4 }
 0x7df   : > { %2902 = vrot.lane.b32.xlu2 %v6314_v44, %s5854_s4  ;;  %s7803_s4 = scalar_lea.vmem %s7801_s20, %s6059_s16  ;;  %s7931_s16 = sld [smem:[#allocation41_spill]] }
 0x7ed   : > { %v2354_v20 = vpop.xlane.xlu1 %2353 }
 0x7ee   : > { %5653 = vrcp.f32 %v2354_v20  ;;  %v2399_v40 = vand.u32 2147483648, %v2354_v20  ;;  %v2397_v6 = vand.u32 2147483647, %v2354_v20  ;;  %vm2393_vm12 = vweird.f32 %v2354_v20 }
 0x7f0   : > { %v2400_v30 = vor.u32 1.1754944e-38, %v2399_v40  ;;  %vm2398_vm0 = vcmp.eq.f32.partialorder %v2397_v6, 8.507059e+37 }
 0x7f4   : > { %v5654_v15 = vpop.eup %5653 }
 0x7f5   : > { %v2389_v21 = vmul.f32 %v5654_v15, %v2354_v20  ;;  %v2357_v4 = vpop.xlane.xlu1 %2356  ;;  %vm2394_vm11 = vweird.f32 %v5654_v15 }
 0x7f6   : > { %5655 = vrcp.f32 %v2357_v4  ;;  %vm2395_vm15 = vmor %vm2393_vm12, %vm2394_vm11  ;;  %v2414_v17 = vand.u32 2147483648, %v2357_v4  ;;  %v2412_v36 = vand.u32 2147483647, %v2357_v4  ;;  %vm2408_vm3 = vweird.f32 %v2357_v4 }
 0x7f7   : > { %v2390_v25 = vsub.f32 1.0, %v2389_v21 }
 0x7f8   : > { %v2415_v39 = vor.u32 1.1754944e-38, %v2414_v17  ;;  %vm2413_vm5 = vcmp.eq.f32.partialorder %v2412_v36, 8.507059e+37 }
 0x7f9   : > { %v2391_v26 = vmul.f32 %v5654_v15, %v2390_v25 }
 0x7fb   : > { %v2392_v28 = vadd.f32 %v5654_v15, %v2391_v26 }
 0x7fc   : > { %v5656_v29 = vpop.eup %5655 }
 0x7fd   : > { %v2396_v45 = vsel %vm2395_vm15, %v5654_v15, %v2392_v28  ;;  %v2404_v43 = vmul.f32 %v5656_v29, %v2357_v4  ;;  %vm2409_vm2 = vweird.f32 %v5656_v29  ;;  %v2899_v4 = vpop.permute.xlu0 %2898 }
 0x7fe   : > { %v2401_v44 = vsel %vm2398_vm0, %v2400_v30, %v2396_v45  ;;  %vm2410_vm4 = vmor %vm2408_vm3, %vm2409_vm2  ;;  %v1853_v45 = vld [vmem:[%s7786_s27 + $0x10] sm:$0xff] }
 0x7ff   : > { %v2405_v27 = vsub.f32 1.0, %v2404_v43  ;;  %v2402_v32 = vmul.f32 %v6454_v41, %v2401_v44  ;;  %2841 = vmatpush.msrb.mxu1 %v1853_v45 }
 0x801   : > { %v2406_v35 = vmul.f32 %v5656_v29, %v2405_v27  ;;  %5357 = vmatmul.msk.f32.vlgmr.msrb.gmra.mxu3 %vm2077_vm14, %v2402_v32 }
 0x803   : > { %v2407_v38 = vadd.f32 %v5656_v29, %v2406_v35 }
 0x805   : > { %v2411_v23 = vsel %vm2410_vm4, %v5656_v29, %v2407_v38 }
 0x806   : > { %v2416_v31 = vsel %vm2413_vm5, %v2415_v39, %v2411_v23 }
 0x807   : > { %v2417_v22 = vmul.f32 %v6458_v33, %v2416_v31 }
 0x809   : > { %5358 = vmatmul.msk.f32.gmra.mxu3 %vm2077_vm14, %v2417_v22 }
 0x80d   : > { %v2616_v37 = vpop.permute.xlu1 %2615 }
 0x80e   : > { %5371 = vmatpush.xpose.msk.msra.mxu3 %vm2008_vm13, %v2616_v37 }
 0x812   : > { %5372 = vmatpush.xpose.msk.msra.mxu3 %vm2008_vm13, %v2614_v46 }
 0x815   : > { %5373 = vmatmul.msk.f32.vlgmr.msra.gmra.mxu3 %vm2008_vm13, %v6462_v56 }
 0x81d   : > { %5374 = vmatmul.msk.f32.gmra.mxu3 %vm2008_vm13, %v6464_v57 }
 0x82e   : > { %v6502_v41 = vpop.f32.mrf.mxu0 }
 0x82f   : > { %v2937_v50 = vsel %vm2077_vm14, %v6502_v41, -inf }
 0x830   : > { %2938 = vmax.xlane.f32.xlu2 %v2937_v50 }
 0x836   : > { %v2895_v6 = vpop.f32.mrf.mxu0 }
 0x837   : > { %v2940_v29 = vsel %vm2077_vm14, %v2895_v6, -inf }
 0x838   : > { %v2674_v51 = vpop.xlane.xlu1 %2673 }
 0x839   : > { %5657 = vrcp.f32 %v2674_v51  ;;  %v2695_v57 = vand.u32 2147483648, %v2674_v51  ;;  %v2693_v59 = vand.u32 2147483647, %v2674_v51  ;;  %vm2689_vm7 = vweird.f32 %v2674_v51 }
 0x83a   : > { %v2677_v33 = vpop.xlane.xlu2 %2676 }
 0x83b   : > { %5659 = vrcp.f32 %v2677_v33  ;;  %v2696_v63 = vor.u32 1.1754944e-38, %v2695_v57  ;;  %vm2694_vm9 = vcmp.eq.f32.partialorder %v2693_v59, 8.507059e+37  ;;  %v2710_v7 = vand.u32 2147483648, %v2677_v33 }
 0x83c   : > { %vm2704_vm11 = vweird.f32 %v2677_v33  ;;  %v2708_v11 = vand.u32 2147483647, %v2677_v33 }
 0x83d   : > { %v2711_v14 = vor.u32 1.1754944e-38, %v2710_v7 }
 0x83e   : > { %vm2709_vm15 = vcmp.eq.f32.partialorder %v2708_v11, 8.507059e+37 }
 0x83f   : > { %v5658_v52 = vpop.eup %5657 }
 0x840   : > { %v2685_v53 = vmul.f32 %v5658_v52, %v2674_v51  ;;  %vm2690_vm6 = vweird.f32 %v5658_v52 }
 0x841   : > { %v5660_v54 = vpop.eup %5659  ;;  %vm2691_vm8 = vmor %vm2689_vm7, %vm2690_vm6 }
 0x842   : > { %v2686_v55 = vsub.f32 1.0, %v2685_v53  ;;  %v2700_v56 = vmul.f32 %v5660_v54, %v2677_v33  ;;  %vm2705_vm10 = vweird.f32 %v5660_v54  ;;  %v2903_v21 = vpop.permute.xlu2 %2902 }
 0x843   : > { %vm2706_vm12 = vmor %vm2704_vm11, %vm2705_vm10 }
 0x844   : > { %v2687_v58 = vmul.f32 %v5658_v52, %v2686_v55  ;;  %v2701_v60 = vsub.f32 1.0, %v2700_v56 }
 0x846   : > { %v2688_v61 = vadd.f32 %v5658_v52, %v2687_v58  ;;  %v2702_v62 = vmul.f32 %v5660_v54, %v2701_v60 }
 0x848   : > { %v2692_v1 = vsel %vm2691_vm8, %v5658_v52, %v2688_v61  ;;  %v2703_v2 = vadd.f32 %v5660_v54, %v2702_v62 }
 0x849   : > { %v2697_v34 = vsel %vm2694_vm9, %v2696_v63, %v2692_v1 }
 0x84a   : > { %v2698_v10 = vmul.f32 %v6472_v13, %v2697_v34  ;;  %v2707_v12 = vsel %vm2706_vm12, %v5660_v54, %v2703_v2  ;;  %v2901_v13 = vpop.permute.xlu0 %2900 }
 0x84b   : > { %v2712_v19 = vsel %vm2709_vm15, %v2711_v14, %v2707_v12 }
 0x84c   : > { %5375 = vmatmul.msk.f32.vlgmr.msra.gmra.mxu2 %vm2077_vm14, %v2698_v10  ;;  %v2713_v15 = vmul.f32 %v6476_v16, %v2712_v19 }
 0x850   : > { %v2905_v20 = vpop.permute.xlu1 %2904 }
 0x851   : > { %5387 = vmatpush.xpose.msk.msrb.mxu2 %vm2008_vm13, %v2905_v20 }
 0x854   : > { %5376 = vmatmul.msk.f32.gmra.mxu2 %vm2077_vm14, %v2713_v15 }
 0x855   : > { %5388 = vmatpush.xpose.msk.msrb.mxu2 %vm2008_vm13, %v2903_v21 }
 0x85c   : > { %5389 = vmatmul.msk.f32.vlgmr.msrb.gmra.mxu2 %vm2008_vm13, %v2899_v4 }
 0x864   : > { %5390 = vmatmul.msk.f32.gmra.mxu2 %vm2008_vm13, %v2901_v13 }
 0x884   : > { %v2482_v25 = vpop.f32.mrf.mxu3 }
 0x885   : > { %5361 = vmatmul.msk.f32.gmra.mxu1 %vm2008_vm13, %v2482_v25 }
 0x88c   : > { %v2485_v40 = vpop.f32.mrf.mxu3 }
 0x88d   : > { %5362 = vmatmul.msk.f32.gmra.mxu1 %vm2008_vm13, %v2485_v40 }
 0x898   : > { %v2642_v26 = vpop.f32.mrf.mxu3 }
 0x899   : > { %v2654_v16 = vsel %vm2077_vm14, %v2642_v26, -inf }
 0x89a   : > { %2655 = vmax.xlane.f32.xlu0 %v2654_v16 }
 0x8a0   : > { %v2645_v28 = vpop.f32.mrf.mxu3 }
 0x8a1   : > { %v2657_v30 = vsel %vm2077_vm14, %v2645_v28, -inf }
 0x8a2   : > { %2941 = vmax.xlane.f32.xlu0 %v2940_v29  ;;  %2658 = vmax.xlane.f32.xlu1 %v2657_v30 }
 0x8a3   : > { %v2939_v27 = vpop.xlane.xlu2 %2938 }
 0x8a4   : > { %v2949_v32 = vsub.f32 %v6502_v41, %v2939_v27 }
 0x8a6   : > { %v2953_v36 = vmul.f32 1.442695, %v2949_v32 }
 0x8a8   : > { %5661 = vpow2.f32 %v2953_v36 }
 0x8ae   : > { %v6525_v23 = vpop.eup %5661 }
 0x8af   : > { %v2961_v31 = vsel %vm2077_vm14, %v6525_v23, 0.0 }
 0x8cf   : > { %v2773_v43 = vpop.f32.mrf.mxu2 }
 0x8d0   : > { %5379 = vmatmul.msk.f32.vlgmr.msrb.gmra.mxu1 %vm2008_vm13, %v2773_v43 }
 0x8d7   : > { %v2776_v44 = vpop.f32.mrf.mxu2 }
 0x8d8   : > { %5380 = vmatmul.msk.f32.gmra.mxu1 %vm2008_vm13, %v2776_v44 }
 0x8df   : > { %v2931_v17 = vpop.f32.mrf.mxu2 }
 0x8e0   : > { %v2943_v35 = vsel %vm2077_vm14, %v2931_v17, -inf }
 0x8e1   : > { %2944 = vmax.xlane.f32.xlu1 %v2943_v35 }
 0x8e7   : > { %v2934_v38 = vpop.f32.mrf.mxu2 }
 0x8e8   : > { %v2946_v39 = vsel %vm2077_vm14, %v2934_v38, -inf }
 0x8e9   : > { %2947 = vmax.xlane.f32.xlu2 %v2946_v39 }
 0x8f1   : > { %2962 = vadd.xlane.f32.xlu2 %v2961_v31 }
 0x909   : > { %5556 = vrot.lane.b32.xlu2 %v6354_v3, %s5857_s23 }
 0x90d   : > { %v2656_v22 = vpop.xlane.xlu0 %2655 }
 0x90e   : > { %v2662_v37 = vsub.f32 %v2642_v26, %v2656_v22 }
 0x910   : > { %v2668_v46 = vmul.f32 1.442695, %v2662_v37 }
 0x912   : > { %5663 = vpow2.f32 %v2668_v46 }
 0x915   : > { %v2659_v41 = vpop.xlane.xlu1 %2658  ;;  %v2942_v50 = vpop.xlane.xlu0 %2941 }
 0x916   : > { %v2663_v51 = vsub.f32 %v2645_v28, %v2659_v41  ;;  %v2950_v53 = vsub.f32 %v2895_v6, %v2942_v50 }
 0x918   : > { %v6530_v33 = vpop.eup %5663  ;;  %v2670_v52 = vmul.f32 1.442695, %v2663_v51  ;;  %v2955_v55 = vmul.f32 1.442695, %v2950_v53 }
 0x919   : > { %v2678_v54 = vsel %vm2077_vm14, %v6530_v33, 0.0 }
 0x91a   : > { %2679 = vadd.xlane.f32.xlu0 %v2678_v54  ;;  %5665 = vpow2.f32 %v2670_v52 }
 0x91b   : > { %5667 = vpow2.f32 %v2955_v55 }
 0x920   : > { %v6534_v56 = vpop.eup %5665 }
 0x921   : > { %v2681_v3 = vsel %vm2077_vm14, %v6534_v56, 0.0  ;;  %v6538_v57 = vpop.eup %5667 }
 0x922   : > { %2682 = vadd.xlane.f32.xlu1 %v2681_v3  ;;  %v2964_v58 = vsel %vm2077_vm14, %v6538_v57, 0.0 }
 0x92a   : > { %2965 = vadd.xlane.f32.xlu1 %v2964_v58 }
 0x92e   : > { %5551 = vrot.lane.b32.xlu0 %v6375_v24, %s5855_s7 }
 0x936   : > { %5561 = vrot.lane.b32.xlu0 %v6375_v24, %s5857_s23 }
 0x954   : > { %v2945_v59 = vpop.xlane.xlu1 %2944 }
 0x955   : > { %v2951_v60 = vsub.f32 %v2931_v17, %v2945_v59 }
 0x957   : > { %v2957_v61 = vmul.f32 1.442695, %v2951_v60 }
 0x959   : > { %5669 = vpow2.f32 %v2957_v61 }
 0x95c   : > { %v2948_v62 = vpop.xlane.xlu2 %2947 }
 0x95d   : > { %v2952_v63 = vsub.f32 %v2934_v38, %v2948_v62 }
 0x95f   : > { %v6545_v1 = vpop.eup %5669  ;;  %v2959_v2 = vmul.f32 1.442695, %v2952_v63 }
 0x960   : > { %v2967_v34 = vsel %vm2077_vm14, %v6545_v1, 0.0 }
 0x961   : > { %5671 = vpow2.f32 %v2959_v2  ;;  %2968 = vadd.xlane.f32.xlu1 %v2967_v34 }
 0x964   : > { %v6553_v11 = vpop.xlane.xlu2 %2962 }
 0x965   : > { %v2984_v58 = vand.u32 2147483648, %v6553_v11  ;;  %vm2978_vm10 = vweird.f32 %v6553_v11  ;;  %v2982_v60 = vand.u32 2147483647, %v6553_v11 }
 0x967   : > { %v6549_v7 = vpop.eup %5671  ;;  %v2985_v2 = vor.u32 1.1754944e-38, %v2984_v58  ;;  %vm2983_vm12 = vcmp.eq.f32.partialorder %v2982_v60, 8.507059e+37 }
 0x968   : > { %v2970_v10 = vsel %vm2077_vm14, %v6549_v7, 0.0 }
 0x969   : > { %2971 = vadd.xlane.f32.xlu1 %v2970_v10 }
 0x96c   : > { %v5557_v32 = vpop.permute.xlu2 %5556 }
 0x96d   : > { %v5558_v37 = vunpack.i.l.bf16 %v5557_v32  ;;  %v5559_v51 = vunpack.i.h.bf16 %v5557_v32 }
 0x98d   : > { %v2680_v24 = vpop.xlane.xlu0 %2679 }
 0x98e   : > { %5673 = vrcp.f32 %v2680_v24  ;;  %v2725_v13 = vand.u32 2147483648, %v2680_v24  ;;  %vm2719_vm2 = vweird.f32 %v2680_v24  ;;  %v2723_v25 = vand.u32 2147483647, %v2680_v24 }
 0x98f   : > { %5675 = vrcp.f32 %v6553_v11 }
 0x990   : > { %v2726_v29 = vor.u32 1.1754944e-38, %v2725_v13  ;;  %vm2724_vm4 = vcmp.eq.f32.partialorder %v2723_v25, 8.507059e+37 }
 0x994   : > { %v5674_v12 = vpop.eup %5673 }
 0x995   : > { %v2715_v14 = vmul.f32 %v5674_v12, %v2680_v24  ;;  %v2683_v19 = vpop.xlane.xlu1 %2682  ;;  %vm2720_vm0 = vweird.f32 %v5674_v12  ;;  %v6556_v21 = vpop.eup %5675 }
 0x996   : > { %5677 = vrcp.f32 %v2683_v19  ;;  %vm2721_vm3 = vmor %vm2719_vm2, %vm2720_vm0  ;;  %v2974_v26 = vmul.f32 %v6556_v21, %v6553_v11  ;;  %v2740_v35 = vand.u32 2147483648, %v2683_v19  ;;  %vm2734_vm6 = vweird.f32 %v2683_v19 }
 0x997   : > { %v2716_v20 = vsub.f32 1.0, %v2715_v14  ;;  %v2738_v31 = vand.u32 2147483647, %v2683_v19  ;;  %vm2979_vm9 = vweird.f32 %v6556_v21 }
 0x998   : > { %v2975_v27 = vsub.f32 1.0, %v2974_v26  ;;  %v2741_v52 = vor.u32 1.1754944e-38, %v2740_v35  ;;  %vm2980_vm11 = vmor %vm2978_vm10, %vm2979_vm9 }
 0x999   : > { %v2717_v15 = vmul.f32 %v5674_v12, %v2716_v20  ;;  %vm2739_vm8 = vcmp.eq.f32.partialorder %v2738_v31, 8.507059e+37  ;;  %v1854_v31 = vld [vmem:[%s7786_s27 + $0x18] sm:$0xff]  ;;  %s7802_s27 = sld [smem:[#allocation49_spill]] }
 0x99a   : > { %v2976_v46 = vmul.f32 %v6556_v21, %v2975_v27  ;;  %3130 = vmatpush.msra.mxu2 %v1854_v31 }
 0x99b   : > { %v2718_v4 = vadd.f32 %v5674_v12, %v2717_v15 }
 0x99c   : > { %v5678_v40 = vpop.eup %5677  ;;  %v2977_v55 = vadd.f32 %v6556_v21, %v2976_v46 }
 0x99d   : > { %v2722_v16 = vsel %vm2721_vm3, %v5674_v12, %v2718_v4  ;;  %v2730_v6 = vmul.f32 %v5678_v40, %v2683_v19  ;;  %v2966_v28 = vpop.xlane.xlu1 %2965  ;;  %vm2735_vm5 = vweird.f32 %v5678_v40 }
 0x99e   : > { %5679 = vrcp.f32 %v2966_v28  ;;  %v2727_v43 = vsel %vm2724_vm4, %v2726_v29, %v2722_v16  ;;  %vm2736_vm7 = vmor %vm2734_vm6, %vm2735_vm5  ;;  %v2981_v62 = vsel %vm2980_vm11, %v6556_v21, %v2977_v55  ;;  %v2999_v24 = vand.u32 2147483648, %v2966_v28 }
 0x99f   : > { %v2731_v30 = vsub.f32 1.0, %v2730_v6  ;;  %v2728_v38 = vmul.f32 %v6530_v33, %v2727_v43  ;;  %v2986_v34 = vsel %vm2983_vm12, %v2985_v2, %v2981_v62  ;;  %vm2993_vm0 = vweird.f32 %v2966_v28 }
 0x9a0   : > { %v5552_v45 = vpop.permute.xlu0 %5551  ;;  %v2987_v12 = vmul.f32 %v6525_v23, %v2986_v34  ;;  %v2997_v14 = vand.u32 2147483647, %v2966_v28  ;;  %v3000_v11 = vor.u32 1.1754944e-38, %v2999_v24 }
 0x9a1   : > { %v5553_v44 = vunpack.i.l.bf16 %v5552_v45  ;;  %v2732_v17 = vmul.f32 %v5678_v40, %v2731_v30  ;;  %v5554_v36 = vunpack.i.h.bf16 %v5552_v45 }
 0x9a2   : > { %vm2998_vm3 = vcmp.eq.f32.partialorder %v2997_v14, 8.507059e+37 }
 0x9a3   : > { %2805 = vmatpush.msrb.mxu3 %v5553_v44  ;;  %v2733_v39 = vadd.f32 %v5678_v40, %v2732_v17 }
 0x9a4   : > { %v5680_v22 = vpop.eup %5679 }
 0x9a5   : > { %2806 = vmatpush.msrb.mxu3 %v5554_v36  ;;  %v2989_v41 = vmul.f32 %v5680_v22, %v2966_v28  ;;  %v2737_v50 = vsel %vm2736_vm7, %v5678_v40, %v2733_v39  ;;  %vm2994_vm15 = vweird.f32 %v5680_v22 }
 0x9a6   : > { %5377 = vmatmul.msk.f32.vlgmr.msrb.gmra.mxu3 %vm2077_vm14, %v2728_v38  ;;  %v2742_v33 = vsel %vm2739_vm8, %v2741_v52, %v2737_v50  ;;  %vm2995_vm2 = vmor %vm2993_vm0, %vm2994_vm15  ;;  %v2517_v50 = vpop.f32.mrf.mxu1 }
 0x9a7   : > { %3059 = vmatpush.msra.mxu3 %v5558_v37  ;;  %v2990_v3 = vsub.f32 1.0, %v2989_v41  ;;  %v2743_v61 = vmul.f32 %v6534_v56, %v2742_v33  ;;  %v2559_v33 = vadd.f32 %v6488_v42, %v2517_v50  ;;  %v3161_v50 = vld [vmem:[%s7793_s10] sm:$0xff] }
 0x9a8   : > { %v5562_v53 = vpop.permute.xlu0 %5561 }
 0x9a9   : > { %v5563_v54 = vunpack.i.l.bf16 %v5562_v53  ;;  %3060 = vmatpush.msra.mxu3 %v5559_v51  ;;  %v5564_v59 = vunpack.i.h.bf16 %v5562_v53  ;;  %v2991_v63 = vmul.f32 %v5680_v22, %v2990_v3  ;;  %v5572_v3 = vld [vmem:[%s7788_s2] ss:$0 sm:$0xff] }
 0x9ab   : > { %3094 = vmatpush.msra.mxu0 %v5563_v54  ;;  %v2992_v10 = vadd.f32 %v5680_v22, %v2991_v63 }
 0x9ad   : > { %3095 = vmatpush.msra.mxu0 %v5564_v59  ;;  %v2996_v56 = vsel %vm2995_vm2, %v5680_v22, %v2992_v10 }
 0x9ae   : > { %5378 = vmatmul.msk.f32.gmra.mxu3 %vm2077_vm14, %v2743_v61  ;;  %v3001_v19 = vsel %vm2998_vm3, %v3000_v11, %v2996_v56  ;;  %v2520_v51 = vpop.f32.mrf.mxu1 }
 0x9af   : > { %v3002_v20 = vmul.f32 %v6538_v57, %v3001_v19  ;;  %v2562_v62 = vadd.f32 %v6494_v47, %v2520_v51  ;;  %v3166_v51 = vld [vmem:[%s7794_s5] sm:$0xff] }
 0x9b6   : > { %5391 = vmatmul.msk.f32.vlgmr.msra.gmra.mxu3 %vm2077_vm14, %v2987_v12  ;;  %v2523_v52 = vpop.f32.mrf.mxu1 }
 0x9b7   : > { %v2565_v47 = vadd.f32 %v6498_v48, %v2523_v52 }
 0x9be   : > { %5392 = vmatmul.msk.f32.gmra.mxu3 %vm2077_vm14, %v3002_v20  ;;  %v2526_v53 = vpop.f32.mrf.mxu1 }
 0x9c6   : > { %v2843_v54 = vpop.f32.mrf.mxu1 }
 0x9c7   : > { %v2855_v55 = vadd.f32 %v2843_v54, %v2559_v33 }
 0x9ce   : > { %v2846_v61 = vpop.f32.mrf.mxu1 }
 0x9cf   : > { %v2856_v2 = vadd.f32 %v2846_v61, %v2562_v62 }
 0x9d4   : > { %v2969_v15 = vpop.xlane.xlu1 %2968 }
 0x9d5   : > { %5681 = vrcp.f32 %v2969_v15  ;;  %v3014_v23 = vand.u32 2147483648, %v2969_v15  ;;  %v3012_v26 = vand.u32 2147483647, %v2969_v15  ;;  %vm3008_vm5 = vweird.f32 %v2969_v15 }
 0x9d7   : > { %v3015_v28 = vor.u32 1.1754944e-38, %v3014_v23  ;;  %vm3013_vm7 = vcmp.eq.f32.partialorder %v3012_v26, 8.507059e+37 }
 0x9db   : > { %v5682_v21 = vpop.eup %5681 }
 0x9dc   : > { %v3004_v4 = vmul.f32 %v5682_v21, %v2969_v15  ;;  %v2972_v13 = vpop.xlane.xlu1 %2971  ;;  %vm3009_vm4 = vweird.f32 %v5682_v21 }
 0x9dd   : > { %5683 = vrcp.f32 %v2972_v13  ;;  %vm3010_vm6 = vmor %vm3008_vm5, %vm3009_vm4  ;;  %v3029_v44 = vand.u32 2147483648, %v2972_v13  ;;  %v3027_v32 = vand.u32 2147483647, %v2972_v13  ;;  %vm3023_vm9 = vweird.f32 %v2972_v13 }
 0x9de   : > { %v3005_v25 = vsub.f32 1.0, %v3004_v4 }
 0x9df   : > { %v3030_v35 = vor.u32 1.1754944e-38, %v3029_v44  ;;  %vm3028_vm11 = vcmp.eq.f32.partialorder %v3027_v32, 8.507059e+37 }
 0x9e0   : > { %v3006_v40 = vmul.f32 %v5682_v21, %v3005_v25 }
 0x9e2   : > { %v3007_v16 = vadd.f32 %v5682_v21, %v3006_v40 }
 0x9e3   : > { %v5684_v6 = vpop.eup %5683 }
 0x9e4   : > { %v3011_v29 = vsel %vm3010_vm6, %v5682_v21, %v3007_v16  ;;  %v3019_v57 = vmul.f32 %v5684_v6, %v2972_v13  ;;  %vm3024_vm8 = vweird.f32 %v5684_v6  ;;  %v2568_v21 = vadd.f32 %v6500_v49, %v2526_v53 }
 0x9e5   : > { %v3016_v30 = vsel %vm3013_vm7, %v3015_v28, %v3011_v29  ;;  %vm3025_vm10 = vmor %vm3023_vm9, %vm3024_vm8 }
 0x9e6   : > { %v3020_v45 = vsub.f32 1.0, %v3019_v57  ;;  %v3017_v43 = vmul.f32 %v6545_v1, %v3016_v30 }
 0x9e8   : > { %v3021_v27 = vmul.f32 %v5684_v6, %v3020_v45  ;;  %5393 = vmatmul.msk.f32.vlgmr.msra.gmra.mxu0 %vm2077_vm14, %v3017_v43 }
 0x9ea   : > { %v3022_v17 = vadd.f32 %v5684_v6, %v3021_v27 }
 0x9ec   : > { %v3026_v36 = vsel %vm3025_vm10, %v5684_v6, %v3022_v17 }
 0x9ed   : > { %v3031_v38 = vsel %vm3028_vm11, %v3030_v35, %v3026_v36 }
 0x9ee   : > { %v3032_v39 = vmul.f32 %v6549_v7, %v3031_v38 }
 0x9f0   : > { %5394 = vmatmul.msk.f32.gmra.mxu0 %vm2077_vm14, %v3032_v39 }
 0xa29   : > { %v2808_v1 = vpop.f32.mrf.mxu3 }
 0xa2a   : > { %5381 = vmatmul.msk.f32.gmra.mxu1 %vm2008_vm13, %v2808_v1  ;;  %v3164_v1 = vld [vmem:[%s7793_s10 + $0x18] sm:$0xff] }
 0xa2b   : > { %3312 = vmatpush.msrb.mxu3 %v3164_v1 }
 0xa31   : > { %v2811_v22 = vpop.f32.mrf.mxu3 }
 0xa32   : > { %5382 = vmatmul.msk.f32.gmra.mxu1 %vm2008_vm13, %v2811_v22  ;;  %v3169_v22 = vld [vmem:[%s7794_s5 + $0x18] sm:$0xff] }
 0xa33   : > { %3344 = vmatpush.msra.mxu1 %v3169_v22 }
 0xa39   : > { %v3062_v37 = vpop.f32.mrf.mxu3 }
 0xa3a   : > { %5395 = vmatmul.msk.f32.vlgmr.msra.gmra.mxu2 %vm2008_vm13, %v3062_v37  ;;  %v3163_v37 = vld [vmem:[%s7793_s10 + $0x10] sm:$0xff] }
 0xa3b   : > { %3313 = vmatpush.msrb.mxu3 %v3163_v37 }
 0xa41   : > { %v3065_v46 = vpop.f32.mrf.mxu3 }
 0xa42   : > { %5396 = vmatmul.msk.f32.gmra.mxu2 %vm2008_vm13, %v3065_v46  ;;  %v3168_v46 = vld [vmem:[%s7794_s5 + $0x10] sm:$0xff] }
 0xa43   : > { %3345 = vmatpush.msra.mxu1 %v3168_v46 }
 0xa65   : > { %v3097_v41 = vpop.f32.mrf.mxu0 }
 0xa66   : > { %5397 = vmatmul.msk.f32.gmra.mxu2 %vm2008_vm13, %v3097_v41  ;;  %v3162_v41 = vld [vmem:[%s7793_s10 + $0x8] sm:$0xff] }
 0xa67   : > { %3314 = vmatpush.msrb.mxu3 %v3162_v41 }
 0xa69   : > { %3315 = vmatpush.msrb.mxu3 %v3161_v50 }
 0xa6d   : > { %v3100_v7 = vpop.f32.mrf.mxu0 }
 0xa6e   : > { %5398 = vmatmul.msk.f32.gmra.mxu2 %vm2008_vm13, %v3100_v7  ;;  %v3167_v7 = vld [vmem:[%s7794_s5 + $0x8] sm:$0xff] }
 0xa6f   : > { %3346 = vmatpush.msra.mxu1 %v3167_v7 }
 0xa71   : > { %3347 = vmatpush.msra.mxu1 %v3166_v51 }
 0xaa7   : > { %v2849_v56 = vpop.f32.mrf.mxu1 }
 0xaaf   : > { %v2852_v15 = vpop.f32.mrf.mxu1 }
 0xab0   : > { %v2858_v13 = vadd.f32 %v2852_v15, %v2568_v21 }
 0xabd   : > { %v3132_v58 = vpop.f32.mrf.mxu2 }
 0xabe   : > { %v3144_v59 = vadd.f32 %v3132_v58, %v2855_v55 }
 0xac0   : > { %v3151_v60 = vadd.f32 %v5572_v3, %v3144_v59 }
 0xac2   : > { %v6592_v63 = vadd.f32 %v3151_v60, %v6241_v0  ;;  %v2857_v0 = vadd.f32 %v2849_v56, %v2565_v47  ;;  %v5574_v47 = vld [vmem:[%s7798_s21] ss:$0 sm:$0xff] }
 0xac4   : > { %7789 = vst [vmem:[#allocation51_spill] sm:$0xff] %v6592_v63  ;;  %v3183_v34 = vsel %vm7667_vm1, %v6592_v63, 0.0 }
 0xac5   : > { %3184 = vadd.xlane.f32.xlu1 %v3183_v34  ;;  %v3135_v10 = vpop.f32.mrf.mxu2 }
 0xac6   : > { %v3145_v24 = vadd.f32 %v3135_v10, %v2856_v2 }
 0xac8   : > { %v3152_v42 = vadd.f32 %v5572_v3, %v3145_v24  ;;  %v5573_v24 = vld [vmem:[%s7797_s17] ss:$0 sm:$0xff] }
 0xaca   : > { %v6597_v12 = vadd.f32 %v3152_v42, %v6246_v8 }
 0xacc   : > { %7790 = vst [vmem:[#allocation52_spill] sm:$0xff] %v6597_v12  ;;  %v3186_v14 = vsel %vm7667_vm1, %v6597_v12, 0.0 }
 0xacd   : > { %3187 = vadd.xlane.f32.xlu2 %v3186_v14 }
 0xae9   : > { %v3138_v11 = vpop.f32.mrf.mxu2 }
 0xaea   : > { %v3146_v19 = vadd.f32 %v3138_v11, %v2857_v0 }
 0xaec   : > { %v3153_v20 = vadd.f32 %v5572_v3, %v3146_v19 }
 0xaee   : > { %v6604_v4 = vadd.f32 %v3153_v20, %v6251_v5 }
 0xaf0   : > { %7791 = vst [vmem:[#allocation53_spill] sm:$0xff] %v6604_v4  ;;  %v3189_v8 = vsel %vm7667_vm1, %v6604_v4, 0.0 }
 0xaf1   : > { %3190 = vadd.xlane.f32.xlu0 %v3189_v8  ;;  %v3141_v25 = vpop.f32.mrf.mxu2 }
 0xaf2   : > { %v3147_v23 = vadd.f32 %v3141_v25, %v2858_v13 }
 0xaf4   : > { %v3154_v40 = vadd.f32 %v5572_v3, %v3147_v23 }
 0xaf6   : > { %v6609_v48 = vadd.f32 %v3154_v40, %v6256_v9 }
 0xaf8   : > { %7792 = vst [vmem:[#allocation54_spill] sm:$0xff] %v6609_v48  ;;  %v3192_v26 = vsel %vm7667_vm1, %v6609_v48, 0.0 }
 0xaf9   : > { %3193 = vadd.xlane.f32.xlu1 %v3192_v26 }
 0xb38   : > { %v3185_v16 = vpop.xlane.xlu1 %3184 }
 0xb39   : > { %v3195_v49 = vmul.f32 %v3185_v16, %v6158_v18 }
 0xb3b   : > { %v3199_v5 = vsub.f32 %v6592_v63, %v3195_v49 }
 0xb3d   : > { %v3203_v6 = vmul.f32 %v3199_v5, %v3199_v5 }
 0xb3f   : > { %v3207_v28 = vsel %vm7667_vm1, %v3203_v6, 0.0 }
 0xb40   : > { %v3188_v29 = vpop.xlane.xlu2 %3187  ;;  %3208 = vadd.xlane.f32.xlu1 %v3207_v28 }
 0xb41   : > { %v3196_v57 = vmul.f32 %v3188_v29, %v6158_v18 }
 0xb43   : > { %v6618_v30 = vsub.f32 %v6597_v12, %v3196_v57 }
 0xb45   : > { %v3204_v9 = vmul.f32 %v6618_v30, %v6618_v30 }
 0xb47   : > { %v3210_v45 = vsel %vm7667_vm1, %v3204_v9, 0.0 }
 0xb48   : > { %3211 = vadd.xlane.f32.xlu1 %v3210_v45 }
 0xb64   : > { %v3191_v43 = vpop.xlane.xlu0 %3190 }
 0xb65   : > { %v3197_v44 = vmul.f32 %v3191_v43, %v6158_v18 }
 0xb67   : > { %v6625_v27 = vsub.f32 %v6604_v4, %v3197_v44 }
 0xb69   : > { %v3205_v32 = vmul.f32 %v6625_v27, %v6625_v27 }
 0xb6b   : > { %v3213_v17 = vsel %vm7667_vm1, %v3205_v32, 0.0 }
 0xb6c   : > { %3214 = vadd.xlane.f32.xlu1 %v3213_v17  ;;  %v3194_v35 = vpop.xlane.xlu1 %3193 }
 0xb6d   : > { %v3198_v36 = vmul.f32 %v3194_v35, %v6158_v18 }
 0xb6f   : > { %v6632_v38 = vsub.f32 %v6609_v48, %v3198_v36 }
 0xb71   : > { %v3206_v39 = vmul.f32 %v6632_v38, %v6632_v38 }
 0xb73   : > { %v3216_v31 = vsel %vm7667_vm1, %v3206_v39, 0.0 }
 0xb74   : > { %3217 = vadd.xlane.f32.xlu1 %v3216_v31 }
 0xbb3   : > { %v3209_v52 = vpop.xlane.xlu1 %3208 }
 0xbb4   : > { %v3219_v53 = vmul.f32 %v3209_v52, %v6158_v18 }
 0xbb6   : > { %v3223_v54 = vadd.f32 1e-05, %v3219_v53 }
 0xbb8   : > { %5685 = vrsqrt.f32 %v3223_v54  ;;  %vm3233_vm14 = vweird.f32 %v3223_v54 }
 0xbbb   : > { %v3212_v33 = vpop.xlane.xlu1 %3211 }
 0xbbc   : > { %v3220_v55 = vmul.f32 %v3212_v33, %v6158_v18 }
 0xbbe   : > { %v5686_v3 = vpop.eup %5685  ;;  %v3224_v58 = vadd.f32 1e-05, %v3220_v55 }
 0xbbf   : > { %v3228_v59 = vmul.f32 %v5686_v3, %v3223_v54  ;;  %vm3234_vm13 = vweird.f32 %v5686_v3 }
 0xbc0   : > { %5687 = vrsqrt.f32 %v3224_v58  ;;  %vm3235_vm12 = vmor %vm3233_vm14, %vm3234_vm13  ;;  %vm3243_vm0 = vweird.f32 %v3224_v58 }
 0xbc1   : > { %v3229_v60 = vmul.f32 %v5686_v3, %v3228_v59 }
 0xbc3   : > { %v3230_v61 = vmul.f32 0.5, %v3229_v60 }
 0xbc5   : > { %v3231_v62 = vsub.f32 1.5, %v3230_v61 }
 0xbc6   : > { %v5688_v2 = vpop.eup %5687 }
 0xbc7   : > { %v3232_v34 = vmul.f32 %v5686_v3, %v3231_v62  ;;  %v3238_v10 = vmul.f32 %v5688_v2, %v3224_v58  ;;  %vm3244_vm15 = vweird.f32 %v5688_v2 }
 0xbc8   : > { %vm3245_vm2 = vmor %vm3243_vm0, %vm3244_vm15 }
 0xbc9   : > { %v3236_v42 = vsel %vm3235_vm12, %v5686_v3, %v3232_v34  ;;  %v3239_v14 = vmul.f32 %v5688_v2, %v3238_v10 }
 0xbca   : > { %v3267_v56 = vmul.f32 %v3236_v42, %v3199_v5 }
 0xbcb   : > { %v3240_v0 = vmul.f32 0.5, %v3239_v14 }
 0xbcc   : > { %v3274_v11 = vmul.f32 %v5573_v24, %v3267_v56 }
 0xbcd   : > { %v3241_v19 = vsub.f32 1.5, %v3240_v0 }
 0xbce   : > { %v3281_v20 = vadd.f32 %v5574_v47, %v3274_v11 }
 0xbcf   : > { %v3242_v15 = vmul.f32 %v5688_v2, %v3241_v19  ;;  %v6679_v19 = vld [vmem:[%s7802_s27] sm:$0xff] }
 0xbd0   : > { %5399 = vmatmul.msk.f32.vlgmr.msrb.gmra.mxu3 %vm7667_vm1, %v3281_v20  ;;  %5403 = vmatmul.msk.f32.vlgmr.msra.gmra.mxu1 %vm7667_vm1, %v3281_v20  ;;  %v3441_v20 = vlaneseq }
 0xbd1   : > { %v3246_v21 = vsel %vm3245_vm2, %v5688_v2, %v3242_v15 }
 0xbd2   : > { %v3268_v13 = vmul.f32 %v3246_v21, %v6618_v30 }
 0xbd4   : > { %v3275_v8 = vmul.f32 %v5573_v24, %v3268_v13 }
 0xbd6   : > { %v3282_v25 = vadd.f32 %v5574_v47, %v3275_v8  ;;  %v6682_v8 = vperm.slane %v6679_v19, 0 }
 0xbd8   : > { %5400 = vmatmul.msk.f32.gmra.mxu3 %vm7667_vm1, %v3282_v25  ;;  %5404 = vmatmul.msk.f32.gmra.mxu1 %vm7667_vm1, %v3282_v25  ;;  %v6685_v25 = vperm.slane %v6679_v19, 1 }
 0xbdf   : > { %v3215_v23 = vpop.xlane.xlu1 %3214 }
 0xbe0   : > { %v3221_v40 = vmul.f32 %v3215_v23, %v6158_v18 }
 0xbe2   : > { %v3225_v26 = vadd.f32 1e-05, %v3221_v40 }
 0xbe4   : > { %5689 = vrsqrt.f32 %v3225_v26  ;;  %vm3253_vm4 = vweird.f32 %v3225_v26 }
 0xbe7   : > { %v3218_v16 = vpop.xlane.xlu1 %3217 }
 0xbe8   : > { %v3222_v49 = vmul.f32 %v3218_v16, %v6158_v18  ;;  %v3172_v16 = vld [vmem:[%s7802_s27 + $0x8] sm:$0xff] }
 0xbea   : > { %v5690_v5 = vpop.eup %5689  ;;  %v3226_v6 = vadd.f32 1e-05, %v3222_v49 }
 0xbeb   : > { %v3248_v28 = vmul.f32 %v5690_v5, %v3225_v26  ;;  %vm3254_vm3 = vweird.f32 %v5690_v5 }
 0xbec   : > { %5691 = vrsqrt.f32 %v3226_v6  ;;  %vm3255_vm5 = vmor %vm3253_vm4, %vm3254_vm3  ;;  %vm3263_vm7 = vweird.f32 %v3226_v6 }
 0xbed   : > { %v3249_v29 = vmul.f32 %v5690_v5, %v3248_v28 }
 0xbef   : > { %v3250_v57 = vmul.f32 0.5, %v3249_v29 }
 0xbf1   : > { %v3251_v30 = vsub.f32 1.5, %v3250_v57  ;;  %v6697_v57 = vshrl.u32 %v3441_v20, 7 }
 0xbf2   : > { %v5692_v9 = vpop.eup %5691 }
 0xbf3   : > { %v3252_v45 = vmul.f32 %v5690_v5, %v3251_v30  ;;  %v3258_v43 = vmul.f32 %v5692_v9, %v3226_v6  ;;  %vm3264_vm6 = vweird.f32 %v5692_v9  ;;  %vm3498_vm2 = vcmp.lt.s32.totalorder %v6697_v57, 7 }
 0xbf4   : > { %vm3265_vm8 = vmor %vm3263_vm7, %vm3264_vm6  ;;  %vm3532_vm3 = vcmp.lt.s32.totalorder %v6697_v57, 6  ;;  %vm7683_vm4 = vcmp.lt.s32.totalorder %v6697_v57, 5  ;;  %vm7684_vm6 = vcmp.lt.s32.totalorder %v6697_v57, 3  ;;  %vm7673_vm7 = vcmp.lt.s32.totalorder %v6697_v57, 2 }
 0xbf5   : > { %v3256_v44 = vsel %vm3255_vm5, %v5690_v5, %v3252_v45  ;;  %v3259_v32 = vmul.f32 %v5692_v9, %v3258_v43  ;;  %v3554_v45 = vmul.f32 0.0, %v6685_v25  ;;  %v6704_v43 = vperm.slane %v6679_v19, 2 }
 0xbf6   : > { %v3269_v17 = vmul.f32 %v3256_v44, %v6625_v27  ;;  %v6669_v27 = vld [vmem:[%s7800_s19] ss:$0 sm:$0xff]  ;;  %v6706_v44 = vperm.slane %v3172_v16, 7  ;;  %vm3600_vm5 = vcmp.lt.s32.totalorder %v6697_v57, 4 }
 0xbf7   : > { %v3260_v35 = vmul.f32 0.5, %v3259_v32 }
 0xbf8   : > { %v3276_v36 = vmul.f32 %v5573_v24, %v3269_v17  ;;  %v6709_v17 = vperm.slane %v6679_v19, 7 }
 0xbf9   : > { %v3261_v39 = vsub.f32 1.5, %v3260_v35 }
 0xbfa   : > { %v3283_v31 = vadd.f32 %v5574_v47, %v3276_v36  ;;  %v6712_v36 = vperm.slane %v3172_v16, 0 }
 0xbfb   : > { %v3262_v1 = vmul.f32 %v5692_v9, %v3261_v39  ;;  %v6714_v39 = vperm.slane %v3172_v16, 1 }
 0xbfc   : > { %5401 = vmatmul.msk.f32.gmra.mxu3 %vm7667_vm1, %v3283_v31  ;;  %5405 = vmatmul.msk.f32.gmra.mxu1 %vm7667_vm1, %v3283_v31 }
 0xbfd   : > { %v3266_v22 = vsel %vm3265_vm8, %v5692_v9, %v3262_v1  ;;  %v3520_v9 = vmul.f32 0.0, %v6682_v8  ;;  %vm7672_vm8 = vcmp.lt.s32.totalorder %v6697_v57, 1 }
 0xbfe   : > { %v3270_v37 = vmul.f32 %v3266_v22, %v6632_v38  ;;  %v6720_v22 = vperm.slane %v3172_v16, 2 }
 0xc00   : > { %v3277_v46 = vmul.f32 %v5573_v24, %v3270_v37  ;;  %v6722_v37 = vperm.slane %v3172_v16, 3 }
 0xc02   : > { %v3284_v41 = vadd.f32 %v5574_v47, %v3277_v46  ;;  %v6676_v47 = vld [vmem:[%s7803_s4] ss:$0 sm:$0xff] }
 0xc04   : > { %5402 = vmatmul.msk.f32.gmra.mxu3 %vm7667_vm1, %v3284_v41  ;;  %5406 = vmatmul.msk.f32.gmra.mxu1 %vm7667_vm1, %v3284_v41 }
 0xc4d   : > { %v3349_v7 = vpop.f32.mrf.mxu1 }
 0xc4e   : > { %v3350_v50 = vadd.f32 %v6669_v27, %v3349_v7  ;;  %v3558_v7 = vadd.f32 %v3554_v45, %v3520_v9  ;;  %v3443_v45 = vadd.s32 8, %v6697_v57 }
 0xc50   : > { %v5407_v51 = vmul.f32 -1.442695, %v3350_v50  ;;  %v3588_v50 = vmul.f32 0.0, %v6704_v43 }
 0xc52   : > { %5693 = vpow2.f32 %v5407_v51  ;;  %v6728_v51 = vperm.slane %v6679_v19, 3 }
 0xc53   : > { %v3317_v10 = vpop.f32.mrf.mxu3 }
 0xc54   : > { %v3318_v23 = vadd.f32 %v6676_v47, %v3317_v10  ;;  %v6755_v10 = vperm.slane %v3172_v16, 5 }
 0xc55   : > { %v3352_v52 = vpop.f32.mrf.mxu1 }
 0xc56   : > { %v3353_v53 = vadd.f32 %v6669_v27, %v3352_v52 }
 0xc58   : > { %v5694_v54 = vpop.eup %5693  ;;  %v5408_v33 = vmul.f32 -1.442695, %v3353_v53 }
 0xc59   : > { %v3373_v38 = vadd.f32 1.0, %v5694_v54 }
 0xc5a   : > { %5695 = vpow2.f32 %v5408_v33 }
 0xc5b   : > { %5697 = vrcp.f32 %v3373_v38  ;;  %v3388_v42 = vand.u32 2147483648, %v3373_v38  ;;  %vm3382_vm10 = vweird.f32 %v3373_v38  ;;  %v3386_v14 = vand.u32 2147483647, %v3373_v38  ;;  %v3320_v6 = vpop.f32.mrf.mxu3 }
 0xc5c   : > { %v3321_v35 = vadd.f32 %v6676_v47, %v3320_v6 }
 0xc5d   : > { %v3389_v11 = vor.u32 1.1754944e-38, %v3388_v42  ;;  %vm3387_vm13 = vcmp.eq.f32.partialorder %v3386_v14, 8.507059e+37  ;;  %v3179_v42 = vld [vmem:[%s6115_s8 + $0x8] sm:$0xff]  ;;  %v3592_v14 = vadd.f32 %v3588_v50, %v3558_v7  ;;  %v3444_v7 = vadd.s32 16, %v6697_v57 }
 0xc60   : > { %v5696_v55 = vpop.eup %5695 }
 0xc61   : > { %v3374_v3 = vadd.f32 1.0, %v5696_v55  ;;  %v5698_v58 = vpop.eup %5697 }
 0xc62   : > { %v3378_v59 = vmul.f32 %v5698_v58, %v3373_v38  ;;  %vm3383_vm9 = vweird.f32 %v5698_v58 }
 0xc63   : > { %5699 = vrcp.f32 %v3374_v3  ;;  %vm3384_vm11 = vmor %vm3382_vm10, %vm3383_vm9  ;;  %v3403_v40 = vand.u32 2147483648, %v3374_v3  ;;  %vm3397_vm12 = vweird.f32 %v3374_v3  ;;  %v3401_v49 = vand.u32 2147483647, %v3374_v3 }
 0xc64   : > { %v3379_v61 = vsub.f32 1.0, %v3378_v59  ;;  %v6745_v59 = vld [vmem:[%s7802_s27 + $0x10] sm:$0xff] }
 0xc65   : > { %v3404_v32 = vor.u32 1.1754944e-38, %v3403_v40  ;;  %vm3402_vm0 = vcmp.eq.f32.partialorder %v3401_v49, 8.507059e+37  ;;  %v6768_v20 = vperm.slane %v6745_v59, 0  ;;  %v6782_v6 = vperm.slane %v6745_v59, 1 }
 0xc66   : > { %v3380_v2 = vmul.f32 %v5698_v58, %v3379_v61  ;;  %v6789_v9 = vperm.slane %v6745_v59, 2 }
 0xc67   : > { %7807 = vst [vmem:[#allocation56_spill] sm:$0xff] %v6782_v6 }
 0xc68   : > { %v3381_v24 = vadd.f32 %v5698_v58, %v3380_v2  ;;  %7808 = vst [vmem:[#allocation57_spill] sm:$0xff] %v6789_v9 }
 0xc69   : > { %v5700_v60 = vpop.eup %5699 }
 0xc6a   : > { %v3393_v62 = vmul.f32 %v5700_v60, %v3374_v3  ;;  %v3385_v0 = vsel %vm3384_vm11, %v5698_v58, %v3381_v24  ;;  %vm3398_vm14 = vweird.f32 %v5700_v60  ;;  %v3181_v3 = vld [vmem:[%s6115_s8 + $0x18] sm:$0xff]  ;;  %v3180_v58 = vld [vmem:[%s6115_s8 + $0x10] sm:$0xff] }
 0xc6b   : > { %v3390_v15 = vsel %vm3387_vm13, %v3389_v11, %v3385_v0  ;;  %vm6693_vm15 = vmor %vm3397_vm12, %vm3398_vm14  ;;  %4460 = vmatpush.msrb.mxu0 %v3181_v3  ;;  %v6762_v0 = vperm.slane %v6679_v19, 4  ;;  %v6765_v11 = vperm.slane %v3172_v16, 6 }
 0xc6c   : > { %v3394_v34 = vsub.f32 1.0, %v3393_v62  ;;  %v6690_v5 = vmul.f32 %v3390_v15, %v3318_v23  ;;  %v6771_v15 = vperm.slane %v6745_v59, 7 }
 0xc6d   : > { %4461 = vmatpush.msrb.mxu0 %v3180_v58 }
 0xc6e   : > { %v3395_v56 = vmul.f32 %v5700_v60, %v3394_v34  ;;  %v7651_v31 = vrot.slane %v6690_v5, 1  ;;  %v7649_v46 = vrot.slane %v6690_v5, 2  ;;  %v7648_v52 = vrot.slane %v6690_v5, 3  ;;  %7806 = vst [vmem:[#allocation55_spill] sm:$0xff] %v6771_v15 }
 0xc6f   : > { %v7647_v53 = vrot.slane %v6690_v5, 4  ;;  %v7650_v54 = vrot.slane %v6690_v5, 5  ;;  %v6738_v38 = vmul.f32 %v6706_v44, %v6690_v5  ;;  %v7658_v61 = vrot.slane %v6690_v5, 7  ;;  %4462 = vmatpush.msrb.mxu0 %v3179_v42 }
 0xc70   : > { %v3396_v21 = vadd.f32 %v5700_v60, %v3395_v56  ;;  %v6753_v34 = vperm.slane %v3172_v16, 4  ;;  %v3622_v56 = vmul.f32 0.0, %v6728_v51 }
 0xc72   : > { %v3400_v30 = vsel %vm6693_vm15, %v5700_v60, %v3396_v21  ;;  %v7653_v60 = vrot.slane %v6690_v5, 6  ;;  %v3626_v28 = vadd.f32 %v3622_v56, %v3592_v14 }
 0xc73   : > { %v3405_v1 = vsel %vm3402_vm0, %v3404_v32, %v3400_v30  ;;  %v6786_v30 = vperm.slane %v6679_v19, 5  ;;  %v3445_v32 = vadd.s32 24, %v6697_v57 }
 0xc74   : > { %v6740_v55 = vmul.f32 %v3405_v1, %v3321_v35  ;;  %v6794_v35 = vperm.slane %v6745_v59, 3  ;;  %v6797_v1 = vperm.slane %v6745_v59, 4 }
 0xc76   : > { %v7660_v21 = vrot.slane %v6740_v55, 1  ;;  %v7657_v23 = vrot.slane %v6740_v55, 2  ;;  %v7656_v40 = vrot.slane %v6740_v55, 3  ;;  %v7652_v16 = vrot.slane %v6740_v55, 5  ;;  %7809 = vst [vmem:[#allocation58_spill] sm:$0xff] %v6794_v35 }
 0xc77   : > { %v7654_v49 = vrot.slane %v6740_v55, 6  ;;  %7810 = vst [vmem:[#allocation59_spill] sm:$0xff] %v6797_v1  ;;  %v7659_v14 = vrot.slane %v6740_v55, 7 }
 0xc78   : > { %v3501_v50 = vsel %vm3498_vm2, %v7651_v31, %v7660_v21  ;;  %v3569_v3 = vsel %vm7683_vm4, %v7648_v52, %v7656_v40  ;;  %v3690_v52 = vmul.f32 0.0, %v6786_v30  ;;  %v6847_v31 = vand.u32 15, %v6697_v57 }
 0xc79   : > { %v3355_v13 = vpop.f32.mrf.mxu1  ;;  %v6836_v42 = vsel %vm7673_vm7, %v7653_v60, %v7654_v49  ;;  %v6851_v60 = vand.u32 15, %v3445_v32  ;;  %v6854_v49 = vand.u32 15, %v3444_v7  ;;  %v6872_v32 = vmul.f32 %v6720_v22, %v3569_v3 }
 0xc7a   : > { %v3356_v26 = vadd.f32 %v6669_v27, %v3355_v13  ;;  %v3178_v13 = vld [vmem:[%s6115_s8] sm:$0xff]  ;;  %v6907_v48 = vmul.f32 %v6789_v9, %v3569_v3 }
 0xc7b   : > { %4463 = vmatpush.msrb.mxu0 %v3178_v13  ;;  %vm3506_vm10 = vcmp.ge.s32.totalorder %v6851_v60, 15  ;;  %vm3540_vm11 = vcmp.ge.s32.totalorder %v6851_v60, 14  ;;  %vm3574_vm13 = vcmp.ge.s32.totalorder %v6851_v60, 13  ;;  %vm3608_vm12 = vcmp.ge.s32.totalorder %v6851_v60, 12 }
 0xc7c   : > { %v5409_v29 = vmul.f32 -1.442695, %v3356_v26  ;;  %v7655_v26 = vrot.slane %v6740_v55, 4  ;;  %7817 = vst [vmem:[#allocation66_spill] sm:$0xff] %v6907_v48 }
 0xc7e   : > { %5701 = vpow2.f32 %v5409_v29  ;;  %v3656_v29 = vmul.f32 0.0, %v6762_v0 }
 0xc81   : > { %v3358_v41 = vpop.f32.mrf.mxu1 }
 0xc82   : > { %v3359_v33 = vadd.f32 %v6669_v27, %v3358_v41  ;;  %v6751_v27 = vmul.f32 %v6709_v17, %v6690_v5  ;;  %v3323_v41 = vpop.f32.mrf.mxu3 }
 0xc84   : > { %v5702_v62 = vpop.eup %5701  ;;  %v5410_v2 = vmul.f32 -1.442695, %v3359_v33  ;;  %v3535_v33 = vsel %vm3532_vm3, %v7649_v46, %v7657_v23  ;;  %v6843_v46 = vperm.slane %v6679_v19, 6  ;;  %v3324_v19 = vadd.f32 %v6676_v47, %v3323_v41 }
 0xc85   : > { %v6757_v24 = vadd.f32 1.0, %v5702_v62  ;;  %v3603_v62 = vsel %vm3600_vm5, %v7647_v53, %v7655_v26  ;;  %v3660_v53 = vadd.f32 %v3656_v29, %v3626_v28  ;;  %v6857_v28 = vmul.f32 %v6712_v36, %v3501_v50 }
 0xc86   : > { %5703 = vpow2.f32 %v5410_v2  ;;  %v3637_v2 = vsel %vm7684_vm6, %v7650_v54, %v7652_v16  ;;  %v6849_v16 = vand.u32 15, %v3443_v45  ;;  %v6860_v29 = vmul.f32 %v6714_v39, %v3535_v33 }
 0xc87   : > { %5705 = vrcp.f32 %v6757_v24  ;;  %v6869_v45 = vsel %vm7672_vm8, %v7658_v61, %v7659_v14  ;;  %v3418_v7 = vand.u32 2147483648, %v6757_v24  ;;  %v3694_v26 = vadd.f32 %v3690_v52, %v3660_v53 }
 0xc88   : > { %v3724_v40 = vmul.f32 0.0, %v6843_v46  ;;  %v6877_v23 = vmul.f32 %v6722_v37, %v3603_v62  ;;  %v3416_v41 = vand.u32 2147483647, %v6757_v24  ;;  %v6883_v61 = vmul.f32 %v6753_v34, %v3637_v2 }
 0xc89   : > { %v6888_v52 = vmul.f32 %v6755_v10, %v6836_v42  ;;  %v6892_v53 = vmul.f32 %v6765_v11, %v6869_v45  ;;  %v6899_v14 = vmul.f32 %v6768_v20, %v3501_v50  ;;  %vm3412_vm14 = vweird.f32 %v6757_v24 }
 0xc8a   : > { %7811 = vst [vmem:[#allocation60_spill] sm:$0xff] %v6883_v61  ;;  %v6904_v18 = vmul.f32 %v6782_v6, %v3535_v33  ;;  %v3419_v12 = vor.u32 1.1754944e-38, %v3418_v7  ;;  %v3326_v63 = vpop.f32.mrf.mxu3  ;;  %v3728_v50 = vadd.f32 %v3724_v40, %v3694_v26  ;;  %vm3417_vm1 = vcmp.eq.f32.partialorder %v3416_v41, 8.507059e+37 }
 0xc8b   : > { %7812 = vst [vmem:[#allocation61_spill] sm:$0xff] %v6888_v52  ;;  %v6917_v3 = vmul.f32 %v6797_v1, %v3637_v2  ;;  %v6921_v7 = vperm.slane %v6745_v59, 5  ;;  %v6924_v40 = vperm.slane %v6745_v59, 6  ;;  %v6932_v2 = vmul.f32 %v6771_v15, %v6740_v55 }
 0xc8c   : > { %v5704_v58 = vpop.eup %5703  ;;  %7813 = vst [vmem:[#allocation62_spill] sm:$0xff] %v6892_v53  ;;  %vm3538_vm8 = vcmp.ge.s32.totalorder %v6849_v16, 14  ;;  %vm3640_vm7 = vcmp.ge.s32.totalorder %v6849_v16, 11  ;;  %v7854_v61 = vrot.slane %v6690_v5, 7 }
 0xc8d   : > { %v5706_v56 = vpop.eup %5705  ;;  %v6839_v13 = vadd.f32 1.0, %v5704_v58  ;;  %7815 = vst [vmem:[#allocation64_spill] sm:$0xff] %v6899_v14 }
 0xc8e   : > { %v3408_v54 = vmul.f32 %v5706_v56, %v6757_v24  ;;  %vm3413_vm9 = vweird.f32 %v5706_v56  ;;  %7816 = vst [vmem:[#allocation65_spill] sm:$0xff] %v6904_v18  ;;  %v6913_v24 = vmul.f32 %v6794_v35, %v3603_v62  ;;  %v3327_v62 = vadd.f32 %v6676_v47, %v3326_v63 }
 0xc8f   : > { %5707 = vrcp.f32 %v6839_v13  ;;  %vm3414_vm15 = vmor %vm3412_vm14, %vm3413_vm9  ;;  %7819 = vst [vmem:[#allocation68_spill] sm:$0xff] %v6917_v3  ;;  %v3431_v6 = vand.u32 2147483647, %v6839_v13  ;;  %v7836_v35 = vrot.slane %v6740_v55, 7 }
 0xc90   : > { %v3409_v58 = vsub.f32 1.0, %v3408_v54  ;;  %7818 = vst [vmem:[#allocation67_spill] sm:$0xff] %v6913_v24 }
 0xc91   : > { %7820 = vst [vmem:[#allocation69_spill] sm:$0xff] %v6932_v2  ;;  %vm6943_vm9 = vcmp.eq.f32.partialorder %v3431_v6, 8.507059e+37 }
 0xc92   : > { %v3410_v54 = vmul.f32 %v5706_v56, %v3409_v58  ;;  %v6896_v58 = vmul.f32 %v6706_v44, %v6740_v55 }
 0xc94   : > { %7814 = vst [vmem:[#allocation63_spill] sm:$0xff] %v6896_v58  ;;  %v3411_v21 = vadd.f32 %v5706_v56, %v3410_v54  ;;  %v3749_v54 = vmul.f32 0.0, %v6709_v17 }
 0xc95   : > { %v5708_v4 = vpop.eup %5707 }
 0xc96   : > { %v3415_v58 = vsel %vm3414_vm15, %v5706_v56, %v3411_v21  ;;  %v3423_v33 = vmul.f32 %v5708_v4, %v6839_v13  ;;  %vm3428_vm14 = vweird.f32 %v5708_v4  ;;  %v6936_v56 = vadd.f32 %v3749_v54, %v3728_v50 }
 0xc97   : > { %v3420_v9 = vsel %vm3417_vm1, %v3419_v12, %v3415_v58  ;;  %vm3427_vm1 = vweird.f32 %v6839_v13  ;;  %v3433_v12 = vand.u32 2147483648, %v6839_v13  ;;  %vm3504_vm15 = vcmp.ge.s32.totalorder %v6849_v16, 15 }
 0xc98   : > { %v6926_v26 = vmul.f32 %v3420_v9, %v3324_v19  ;;  %v3424_v21 = vsub.f32 1.0, %v3423_v33  ;;  %v7823_v33 = vrot.slane %v6740_v55, 1  ;;  %vm3429_vm0 = vmor %vm3427_vm1, %vm3428_vm14  ;;  %v7827_v58 = vrot.slane %v6740_v55, 4 }
 0xc99   : > { %vm3757_vm1 = vcmp.ge.s32.totalorder %v6847_v31, 7  ;;  %vm3782_vm14 = vcmp.ge.s32.totalorder %v6847_v31, 6 }
 0xc9a   : > { %v7674_v59 = vrot.slane %v6926_v26, 1  ;;  %v3425_v9 = vmul.f32 %v5708_v4, %v3424_v21  ;;  %v7675_v63 = vrot.slane %v6926_v26, 2  ;;  %v7676_v47 = vrot.slane %v6926_v26, 3 }
 0xc9b   : > { %v7824_v21 = vrot.slane %v6740_v55, 2 }
 0xc9c   : > { %v3426_v54 = vadd.f32 %v5708_v4, %v3425_v9  ;;  %v6958_v6 = vsel %vm3498_vm2, %v7823_v33, %v7674_v59  ;;  %v7825_v9 = vrot.slane %v6740_v55, 3  ;;  %v3434_v33 = vor.u32 1.1754944e-38, %v3433_v12 }
 0xc9d   : > { %v6966_v41 = vsel %vm3532_vm3, %v7824_v21, %v7675_v63  ;;  %v3518_v59 = vsel %vm3506_vm10, %v6958_v6, 0.0  ;;  %v7826_v63 = vrot.slane %v6926_v26, 4  ;;  %vm3674_vm10 = vcmp.ge.s32.totalorder %v6849_v16, 10 }
 0xc9e   : > { %v6974_v50 = vsel %vm7683_vm4, %v7825_v9, %v7676_v47  ;;  %v3552_v21 = vsel %vm3540_vm11, %v6966_v41, 0.0  ;;  %v3430_v13 = vsel %vm3429_vm0, %v5708_v4, %v3426_v54  ;;  %v3523_v12 = vmul.f32 %v6682_v8, %v3518_v59 }
 0xc9f   : > { %v6991_v9 = vsel %vm3600_vm5, %v7827_v58, %v7826_v63  ;;  %v3557_v47 = vmul.f32 %v6685_v25, %v3552_v21  ;;  %v3586_v15 = vsel %vm3574_vm13, %v6974_v50, 0.0  ;;  %v3435_v2 = vsel %vm6943_vm9, %v3434_v33, %v3430_v13 }
 0xca0   : > { %v3620_v1 = vsel %vm3608_vm12, %v6991_v9, 0.0  ;;  %v7828_v63 = vrot.slane %v6926_v26, 5  ;;  %v7829_v58 = vrot.slane %v6740_v55, 5  ;;  %vm3710_vm11 = vcmp.ge.s32.totalorder %v6851_v60, 9 }
 0xca1   : > { %v7015_v19 = vmul.f32 %v3435_v2, %v3327_v62  ;;  %v3561_v54 = vadd.f32 %v3557_v47, %v3523_v12  ;;  %vm7830_vm13 = vcmp.ge.s32.totalorder %v6851_v60, 11  ;;  %v7831_v21 = vrot.slane %v6926_v26, 6 }
 0xca2   : > { %v7010_v4 = vsel %vm7684_vm6, %v7829_v58, %v7828_v63  ;;  %v7832_v13 = vrot.slane %v6740_v55, 6  ;;  %vm7833_vm12 = vcmp.lt.s32.totalorder %v6697_v57, 2  ;;  %vm3759_vm0 = vcmp.ge.s32.totalorder %v6854_v49, 7 }
 0xca3   : > { %v3654_v33 = vsel %vm7830_vm13, %v7010_v4, 0.0  ;;  %v3591_v58 = vmul.f32 %v6704_v43, %v3586_v15  ;;  %v3625_v62 = vmul.f32 %v6728_v51, %v3620_v1  ;;  %v3497_v47 = vrot.slane %v7015_v19, 1 }
 0xca4   : > { %v7026_v63 = vsel %vm7833_vm12, %v7832_v13, %v7831_v21  ;;  %v3659_v2 = vmul.f32 %v6762_v0, %v3654_v33  ;;  %v3531_v12 = vrot.slane %v7015_v19, 2  ;;  %vm3784_vm13 = vcmp.ge.s32.totalorder %v6854_v49, 6 }
 0xca5   : > { %v3595_v1 = vadd.f32 %v3591_v58, %v3561_v54  ;;  %vm7834_vm12 = vcmp.ge.s32.totalorder %v6851_v60, 10  ;;  %v7835_v13 = vrot.slane %v6926_v26, 7  ;;  %vm7837_vm9 = vcmp.lt.s32.totalorder %v6697_v57, 1 }
 0xca6   : > { %v3688_v33 = vsel %vm7834_vm12, %v7026_v63, 0.0  ;;  %v7838_v21 = vrot.slane %v6690_v5, 1  ;;  %v7839_v54 = vrot.slane %v6690_v5, 2  ;;  %v7067_v55 = vmul.f32 %v6709_v17, %v6926_v26 }
 0xca7   : > { %v7050_v59 = vsel %vm7837_vm9, %v7836_v35, %v7835_v13  ;;  %vm3807_vm9 = vcmp.ge.s32.totalorder %v6847_v31, 5  ;;  %v7841_v13 = vrot.slane %v6690_v5, 3  ;;  %v7843_v17 = vrot.slane %v6690_v5, 4 }
 0xca8   : > { %v7056_v3 = vsel %vm3498_vm2, %v3497_v47, %v7838_v21  ;;  %v7062_v58 = vsel %vm3532_vm3, %v3531_v12, %v7839_v54  ;;  %v7842_v54 = vrot.slane %v7015_v19, 3  ;;  %v7844_v24 = vrot.slane %v7015_v19, 4 }
 0xca9   : > { %7840 = vst [vmem:[#allocation70_spill] sm:$0xff] %v7062_v58  ;;  %v3516_v35 = vsel %vm3504_vm15, %v7056_v3, 0.0  ;;  %v3550_v21 = vsel %vm3538_vm8, %v7062_v58, 0.0  ;;  %vm3809_vm15 = vcmp.ge.s32.totalorder %v6854_v49, 5  ;;  %vm7845_vm8 = vcmp.ge.s32.totalorder %v6849_v16, 13 }
 0xcaa   : > { %v7082_v15 = vsel %vm7683_vm4, %v7842_v54, %v7841_v13  ;;  %v7090_v48 = vsel %vm3600_vm5, %v7844_v24, %v7843_v17  ;;  %v3521_v53 = vmul.f32 %v6682_v8, %v3516_v35  ;;  %v3555_v18 = vmul.f32 %v6685_v25, %v3550_v21 }
 0xcab   : > { %v3584_v52 = vsel %vm7845_vm8, %v7082_v15, 0.0  ;;  %vm7846_vm12 = vcmp.ge.s32.totalorder %v6849_v16, 12  ;;  %vm3832_vm4 = vcmp.ge.s32.totalorder %v6847_v31, 4  ;;  %v3629_v24 = vadd.f32 %v3625_v62, %v3595_v1 }
 0xcac   : > { %v3618_v13 = vsel %vm7846_vm12, %v7090_v48, 0.0  ;;  %v3589_v54 = vmul.f32 %v6704_v43, %v3584_v52  ;;  %v7847_v17 = vrot.slane %v6690_v5, 5  ;;  %v7848_v14 = vrot.slane %v7015_v19, 5 }
 0xcad   : > { %v3693_v25 = vmul.f32 %v6786_v30, %v3688_v33  ;;  %vm3834_vm8 = vcmp.ge.s32.totalorder %v6854_v49, 4  ;;  %v3559_v35 = vadd.f32 %v3555_v18, %v3521_v53  ;;  %v7849_v43 = vrot.slane %v6690_v5, 6 }
 0xcae   : > { %v7109_v8 = vsel %vm7684_vm6, %v7848_v14, %v7847_v17  ;;  %v7850_v52 = vrot.slane %v7015_v19, 6  ;;  %vm7851_vm12 = vcmp.lt.s32.totalorder %v6697_v57, 2  ;;  %vm3857_vm6 = vcmp.ge.s32.totalorder %v6847_v31, 3 }
 0xcaf   : > { %v3652_v21 = vsel %vm3640_vm7, %v7109_v8, 0.0  ;;  %v7852_v1 = vrot.slane %v6926_v26, 1  ;;  %v7853_v53 = vrot.slane %v6926_v26, 2  ;;  %v3623_v17 = vmul.f32 %v6728_v51, %v3618_v13 }
 0xcb0   : > { %v7122_v62 = vsel %vm7851_vm12, %v7850_v52, %v7849_v43  ;;  %v3663_v43 = vadd.f32 %v3659_v2, %v3629_v24  ;;  %vm3859_vm7 = vcmp.ge.s32.totalorder %v6854_v49, 3  ;;  %v3593_v52 = vadd.f32 %v3589_v54, %v3559_v35 }
 0xcb1   : > { %v7130_v18 = vsel %vm3498_vm2, %v7852_v1, %v3497_v47  ;;  %v7136_v33 = vsel %vm3532_vm3, %v7853_v53, %v3531_v12  ;;  %v3686_v14 = vsel %vm3674_vm10, %v7122_v62, 0.0  ;;  %v7855_v47 = vrot.slane %v7015_v19, 7 }
 0xcb2   : > { %vm7856_vm2 = vcmp.lt.s32.totalorder %v6697_v57, 1  ;;  %v3722_v51 = vsel %vm3710_vm11, %v7050_v59, 0.0  ;;  %vm3884_vm3 = vcmp.ge.s32.totalorder %v6854_v49, 2  ;;  %v3657_v2 = vmul.f32 %v6762_v0, %v3652_v21 }
 0xcb3   : > { %v7149_v1 = vsel %vm7856_vm2, %v7855_v47, %v7854_v61  ;;  %v3697_v12 = vadd.f32 %v3693_v25, %v3663_v43  ;;  %v3769_v13 = vsel %vm3757_vm1, %v7056_v3, 0.0  ;;  %v3771_v5 = vsel %vm3759_vm0, %v6958_v6, 0.0 }
 0xcb4   : > { %v3627_v54 = vadd.f32 %v3623_v17, %v3593_v52  ;;  %vm7857_vm10 = vcmp.ge.s32.totalorder %v6849_v16, 9  ;;  %v3774_v24 = vmul.f32 %v6712_v36, %v3769_v13  ;;  %v3776_v35 = vmul.f32 %v6712_v36, %v3771_v5 }
 0xcb5   : > { %v3720_v61 = vsel %vm7857_vm10, %v7149_v1, 0.0  ;;  %vm3909_vm11 = vcmp.ge.s32.totalorder %v6854_v49, 1  ;;  %v3691_v0 = vmul.f32 %v6786_v30, %v3686_v14  ;;  %v3727_v25 = vmul.f32 %v6843_v46, %v3722_v51 }
 0xcb6   : > { %v3794_v21 = vsel %vm3782_vm14, %v7062_v58, 0.0  ;;  %v3796_v53 = vsel %vm3784_vm13, %v6966_v41, 0.0  ;;  %v3661_v17 = vadd.f32 %v3657_v2, %v3627_v54  ;;  %v3778_v43 = vadd.f32 %v3774_v24, %v6936_v56 }
 0xcb7   : > { %v3780_v52 = vadd.f32 %v3776_v35, %v6936_v56  ;;  %v3799_v47 = vmul.f32 %v6714_v39, %v3794_v21  ;;  %v3725_v13 = vmul.f32 %v6843_v46, %v3720_v61  ;;  %v3731_v30 = vadd.f32 %v3727_v25, %v3697_v12 }
 0xcb8   : > { %v3801_v14 = vmul.f32 %v6714_v39, %v3796_v53  ;;  %v3819_v51 = vsel %vm3807_vm9, %v7082_v15, 0.0  ;;  %v3695_v5 = vadd.f32 %v3691_v0, %v3661_v17  ;;  %v3821_v2 = vsel %vm3809_vm15, %v6974_v50, 0.0 }
 0xcb9   : > { %v3803_v58 = vadd.f32 %v3799_v47, %v3778_v43  ;;  %v3824_v54 = vmul.f32 %v6720_v22, %v3819_v51  ;;  %v3777_v56 = vmul.f32 %v6712_v36, %v7130_v18  ;;  %v3826_v46 = vmul.f32 %v6720_v22, %v3821_v2  ;;  %v3174_v2 = vld [vmem:[%s7802_s27 + $0x18] sm:$0x7f] }
 0xcba   : > { %v3805_v24 = vadd.f32 %v3801_v14, %v3780_v52  ;;  %v3844_v12 = vsel %vm3832_vm4, %v7090_v48, 0.0  ;;  %v3729_v61 = vadd.f32 %v3725_v13, %v3695_v5  ;;  %v3846_v0 = vsel %vm3834_vm8, %v6991_v9, 0.0 }
 0xcbb   : > { %v3828_v35 = vadd.f32 %v3824_v54, %v3803_v58  ;;  %v3849_v25 = vmul.f32 %v6722_v37, %v3844_v12  ;;  %v3756_v21 = vadd.f32 %v7067_v55, %v3731_v30  ;;  %v3851_v36 = vmul.f32 %v6722_v37, %v3846_v0 }
 0xcbc   : > { %v3830_v53 = vadd.f32 %v3826_v46, %v3805_v24  ;;  %v3869_v17 = vsel %vm3857_vm6, %v7109_v8, 0.0  ;;  %v3754_v43 = vadd.f32 %v6751_v27, %v3729_v61  ;;  %v3871_v58 = vsel %vm3859_vm7, %v7010_v4, 0.0 }
 0xcbd   : > { %v3853_v52 = vadd.f32 %v3849_v25, %v3828_v35  ;;  %v3874_v47 = vmul.f32 %v6753_v34, %v3869_v17  ;;  %v3876_v55 = vmul.f32 %v6753_v34, %v3871_v58  ;;  %vm3882_vm4 = vcmp.ge.s32.totalorder %v6847_v31, 2 }
 0xcbe   : > { %v3855_v13 = vadd.f32 %v3851_v36, %v3830_v53  ;;  %v3896_v30 = vsel %vm3884_vm3, %v7026_v63, 0.0  ;;  %v3779_v14 = vadd.f32 %v6857_v28, %v3754_v43  ;;  %v3894_v27 = vsel %vm3882_vm4, %v7122_v62, 0.0 }
 0xcbf   : > { %v3878_v51 = vadd.f32 %v3874_v47, %v3853_v52  ;;  %v3901_v5 = vmul.f32 %v6755_v10, %v3896_v30  ;;  %v3899_v24 = vmul.f32 %v6755_v10, %v3894_v27  ;;  %vm3907_vm6 = vcmp.ge.s32.totalorder %v6847_v31, 1  ;;  %v7858_v30 = vld [vmem:[#allocation60_spill] sm:$0xff] }
 0xcc0   : > { %v3880_v54 = vadd.f32 %v3876_v55, %v3855_v13  ;;  %v3921_v46 = vsel %vm3909_vm11, %v7050_v59, 0.0  ;;  %v3781_v12 = vadd.f32 %v3777_v56, %v3756_v21  ;;  %v3802_v61 = vmul.f32 %v6714_v39, %v7136_v33  ;;  %v7859_v27 = vld [vmem:[#allocation64_spill] sm:$0xff] }
 0xcc1   : > { %v3804_v28 = vadd.f32 %v6860_v29, %v3779_v14  ;;  %v3919_v35 = vsel %vm3907_vm6, %v7149_v1, 0.0  ;;  %v3903_v0 = vadd.f32 %v3899_v24, %v3878_v51  ;;  %v3926_v36 = vmul.f32 %v6765_v11, %v3921_v46  ;;  %v7860_v24 = vld [vmem:[#allocation61_spill] sm:$0xff] }
 0xcc2   : > { %v3905_v25 = vadd.f32 %v3901_v5, %v3880_v54  ;;  %v3924_v53 = vmul.f32 %v6765_v11, %v3919_v35  ;;  %vm4161_vm0 = vcmp.lt.s32.totalorder %v6847_v31, 7  ;;  %v7230_v43 = vperm.slane %v3174_v2, 0 }
 0xcc3   : > { %v3829_v17 = vadd.f32 %v6872_v32, %v3804_v28  ;;  %vm4186_vm1 = vcmp.lt.s32.totalorder %v6847_v31, 6  ;;  %v4099_v29 = vmul.f32 %v6921_v7, %v6836_v42  ;;  %v4169_v21 = vsel %vm4161_vm0, %v6958_v6, 0.0 }
 0xcc4   : > { %v3928_v56 = vadd.f32 %v3924_v53, %v3903_v0  ;;  %v3930_v39 = vadd.f32 %v3926_v36, %v3905_v25  ;;  %v7236_v52 = vadd.f32 %v3802_v61, %v3781_v12  ;;  %v4124_v32 = vmul.f32 %v6924_v40, %v6869_v45  ;;  %v7861_v61 = vld [vmem:[#allocation65_spill] sm:$0xff]  ;;  %v7862_v25 = vld [vmem:[#allocation62_spill] sm:$0xff] }
 0xcc5   : > { %v3854_v58 = vadd.f32 %v6877_v23, %v3829_v17  ;;  %vm4211_vm14 = vcmp.lt.s32.totalorder %v6847_v31, 5  ;;  %v3951_v47 = vmul.f32 %v6706_v44, %v6926_v26  ;;  %v3976_v55 = vmul.f32 %v6768_v20, %v7130_v18 }
 0xcc6   : > { %v3953_v13 = vadd.f32 %v6738_v38, %v3928_v56  ;;  %v4194_v42 = vsel %vm4186_vm1, %v6966_v41, 0.0  ;;  %v7250_v51 = vmul.f32 %v7230_v43, %v4169_v21  ;;  %v7252_v23 = vperm.slane %v3174_v2, 1  ;;  %v7863_v21 = vld [vmem:[#allocation66_spill] sm:$0xff] }
 0xcc7   : > { %v3879_v14 = vadd.f32 %v7858_v30, %v3854_v58  ;;  %vm4236_vm13 = vcmp.lt.s32.totalorder %v6847_v31, 4  ;;  %v3955_v45 = vadd.f32 %v3951_v47, %v3930_v39  ;;  %v4219_v54 = vsel %vm4211_vm14, %v6974_v50, 0.0 }
 0xcc8   : > { %v3978_v5 = vadd.f32 %v7859_v27, %v3953_v13  ;;  %v7257_v38 = vperm.slane %v3174_v2, 2  ;;  %v4244_v46 = vsel %vm4236_vm13, %v6991_v9, 0.0  ;;  %v7261_v12 = vperm.slane %v3174_v2, 3 }
 0xcc9   : > { %v3904_v18 = vadd.f32 %v7860_v24, %v3879_v14  ;;  %vm4261_vm9 = vcmp.lt.s32.totalorder %v6847_v31, 3  ;;  %v7265_v35 = vperm.slane %v3174_v2, 4  ;;  %vm4286_vm15 = vcmp.lt.s32.totalorder %v6847_v31, 2  ;;  %v7867_v24 = vld [vmem:[#allocation68_spill] sm:$0xff] }
 0xcca   : > { %v4003_v28 = vadd.f32 %v7861_v61, %v3978_v5  ;;  %v7268_v0 = vperm.slane %v3174_v2, 5  ;;  %v4199_v36 = vmul.f32 %v7252_v23, %v4194_v42  ;;  %v4269_v17 = vsel %vm4261_vm9, %v7010_v4, 0.0  ;;  %v7864_v42 = vld [vmem:[#allocation67_spill] sm:$0xff] }
 0xccb   : > { %v3929_v53 = vadd.f32 %v7862_v25, %v3904_v18  ;;  %v4294_v56 = vsel %vm4286_vm15, %v7026_v63, 0.0  ;;  %v3980_v39 = vadd.f32 %v3976_v55, %v3955_v45  ;;  %v4224_v47 = vmul.f32 %v7257_v38, %v4219_v54 }
 0xccc   : > { %v4028_v58 = vadd.f32 %v7863_v21, %v4003_v28  ;;  %vm4311_vm8 = vcmp.lt.s32.totalorder %v6847_v31, 1  ;;  %v7278_v13 = vmul.f32 %v7261_v12, %v4244_v46  ;;  %vm3962_vm12 = vcmp.lt.s32.totalorder %v6849_v16, 15  ;;  %v7866_v31 = vld [vmem:[#allocation63_spill] sm:$0xff] }
 0xccd   : > { %vm3987_vm7 = vcmp.lt.s32.totalorder %v6849_v16, 14  ;;  %vm4012_vm2 = vcmp.lt.s32.totalorder %v6849_v16, 13  ;;  %v7285_v14 = vmul.f32 %v7265_v35, %v4269_v17  ;;  %v7288_v55 = vmul.f32 %v7268_v0, %v4294_v56  ;;  %v7868_v17 = vld [vmem:[#allocation56_spill] sm:$0xff]  ;;  %v7869_v56 = vld [vmem:[#allocation57_spill] sm:$0xff] }
 0xcce   : > { %v4053_v30 = vadd.f32 %v7864_v42, %v4028_v58  ;;  %v7290_v45 = vperm.slane %v3174_v2, 6  ;;  %v3954_v27 = vadd.f32 %v7866_v31, %v3929_v53  ;;  %v4319_v5 = vsel %vm4311_vm8, %v7050_v59, 0.0  ;;  %v7873_v42 = vld [vmem:[#allocation58_spill] sm:$0xff]  ;;  %v7874_v31 = vld [vmem:[#allocation59_spill] sm:$0xff] }
 0xccf   : > { %v3970_v54 = vsel %vm3962_vm12, %v6958_v6, 0.0  ;;  %vm4037_vm3 = vcmp.lt.s32.totalorder %v6849_v16, 12  ;;  %v3995_v46 = vsel %vm3987_vm7, %v6966_v41, 0.0  ;;  %v4020_v61 = vsel %vm4012_vm2, %v6974_v50, 0.0 }
 0xcd0   : > { %7865 = vst [vmem:[#allocation60_spill] sm:$0xff] %v7290_v45  ;;  %v4078_v18 = vadd.f32 %v7867_v24, %v4053_v30  ;;  %vm4062_vm10 = vcmp.lt.s32.totalorder %v6849_v16, 11  ;;  %v4045_v28 = vsel %vm4037_vm3, %v6991_v9, 0.0  ;;  %vm4087_vm11 = vcmp.lt.s32.totalorder %v6849_v16, 10 }
 0xcd1   : > { %v4070_v2 = vsel %vm4062_vm10, %v7010_v4, 0.0  ;;  %vm4112_vm4 = vcmp.lt.s32.totalorder %v6849_v16, 9  ;;  %v7305_v6 = vmul.f32 %v7290_v45, %v4319_v5  ;;  %v3975_v53 = vmul.f32 %v6768_v20, %v3970_v54 }
 0xcd2   : > { %v4103_v25 = vadd.f32 %v4099_v29, %v4078_v18  ;;  %v4095_v41 = vsel %vm4087_vm11, %v7026_v63, 0.0  ;;  %v4000_v50 = vmul.f32 %v7868_v17, %v3995_v46  ;;  %v4025_v21 = vmul.f32 %v7869_v56, %v4020_v61 }
 0xcd3   : > { %v4120_v9 = vsel %vm4112_vm4, %v7050_v59, 0.0  ;;  %v7870_v4 = vrot.slane %v7015_v19, 3  ;;  %v7871_v58 = vrot.slane %v6926_v26, 3  ;;  %vm7872_vm6 = vcmp.lt.s32.totalorder %v6697_v57, 5 }
 0xcd4   : > { %v4128_v29 = vadd.f32 %v4124_v32, %v4103_v25  ;;  %v4050_v30 = vmul.f32 %v7873_v42, %v4045_v28  ;;  %v4075_v5 = vmul.f32 %v7874_v31, %v4070_v2  ;;  %v7875_v63 = vrot.slane %v7015_v19, 4 }
 0xcd5   : > { %v3567_v16 = vsel %vm7872_vm6, %v7871_v58, %v7870_v4  ;;  %v7876_v54 = vrot.slane %v6926_v26, 4  ;;  %v7327_v59 = vmul.f32 %v6921_v7, %v4095_v41  ;;  %v7877_v18 = vrot.slane %v7015_v19, 5  ;;  %v7883_v4 = vld [vmem:[#allocation69_spill] sm:$0xff] }
 0xcd6   : > { %v7878_v46 = vrot.slane %v6926_v26, 5  ;;  %vm7879_vm0 = vcmp.lt.s32.totalorder %v6697_v57, 3  ;;  %v7880_v61 = vrot.slane %v7015_v19, 6  ;;  %v7881_v28 = vrot.slane %v6926_v26, 6 }
 0xcd7   : > { %v3601_v24 = vsel %vm3600_vm5, %v7876_v54, %v7875_v63  ;;  %vm7882_vm1 = vcmp.lt.s32.totalorder %v6697_v57, 2  ;;  %v3827_v25 = vmul.f32 %v6720_v22, %v3567_v16  ;;  %v4153_v58 = vadd.f32 %v7883_v4, %v4128_v29 }
 0xcd8   : > { %v3635_v32 = vsel %vm7879_vm0, %v7878_v46, %v7877_v18  ;;  %v3669_v2 = vsel %vm7882_vm1, %v7881_v28, %v7880_v61  ;;  %v7344_v41 = vmul.f32 %v6924_v40, %v4120_v9  ;;  %v7884_v63 = vrot.slane %v7015_v19, 7 }
 0xcd9   : > { %v7885_v54 = vrot.slane %v6926_v26, 7  ;;  %vm7886_vm5 = vcmp.lt.s32.totalorder %v6697_v57, 1  ;;  %vm3964_vm14 = vcmp.lt.s32.totalorder %v6851_v60, 15  ;;  %v3979_v46 = vadd.f32 %v3975_v53, %v3954_v27 }
 0xcda   : > { %v3831_v45 = vadd.f32 %v3827_v25, %v7236_v52  ;;  %v3852_v61 = vmul.f32 %v6722_v37, %v3601_v24  ;;  %v4001_v22 = vmul.f32 %v7868_v17, %v7136_v33  ;;  %v4178_v9 = vadd.f32 %v7250_v51, %v4153_v58 }
 0xcdb   : > { %v3703_v18 = vsel %vm7886_vm5, %v7885_v54, %v7884_v63  ;;  %v3877_v29 = vmul.f32 %v6753_v34, %v3635_v32  ;;  %v3902_v28 = vmul.f32 %v6755_v10, %v3669_v2  ;;  %v3972_v26 = vsel %vm3964_vm14, %v7056_v3, 0.0 }
 0xcdc   : > { %v4004_v57 = vadd.f32 %v4000_v50, %v3979_v46  ;;  %v3856_v4 = vadd.f32 %v3852_v61, %v3831_v45  ;;  %v4005_v63 = vadd.f32 %v4001_v22, %v3980_v39  ;;  %v4026_v27 = vmul.f32 %v7869_v56, %v3567_v16 }
 0xcdd   : > { %v4203_v53 = vadd.f32 %v4199_v36, %v4178_v9  ;;  %v3927_v52 = vmul.f32 %v6765_v11, %v3703_v18  ;;  %v3952_v37 = vmul.f32 %v6706_v44, %v7015_v19  ;;  %v4051_v33 = vmul.f32 %v7873_v42, %v3601_v24  ;;  %v7887_v24 = vld [vmem:[#allocation70_spill] sm:$0xff] }
 0xcde   : > { %v3881_v51 = vadd.f32 %v3877_v29, %v3856_v4  ;;  %v4030_v25 = vadd.f32 %v4026_v27, %v4005_v63  ;;  %vm4163_vm13 = vcmp.lt.s32.totalorder %v6854_v49, 7  ;;  %vm4188_vm9 = vcmp.lt.s32.totalorder %v6854_v49, 6 }
 0xcdf   : > { %v4228_v34 = vadd.f32 %v4224_v47, %v4203_v53  ;;  %v4029_v10 = vadd.f32 %v4025_v21, %v4004_v57  ;;  %v3977_v39 = vmul.f32 %v6768_v20, %v3972_v26  ;;  %v4076_v45 = vmul.f32 %v7874_v31, %v3635_v32 }
 0xce0   : > { %v3906_v36 = vadd.f32 %v3902_v28, %v3881_v51  ;;  %v4055_v50 = vadd.f32 %v4051_v33, %v4030_v25  ;;  %v4101_v11 = vmul.f32 %v6921_v7, %v3669_v2  ;;  %v4171_v44 = vsel %vm4163_vm13, %v7056_v3, 0.0  ;;  %v7888_v2 = vld [vmem:[#allocation55_spill] sm:$0xff] }
 0xce1   : > { %v4253_v16 = vadd.f32 %v7278_v13, %v4228_v34  ;;  %v4196_v58 = vsel %vm4188_vm9, %v7887_v24, 0.0  ;;  %vm4213_vm15 = vcmp.lt.s32.totalorder %v6854_v49, 5  ;;  %vm4238_vm8 = vcmp.lt.s32.totalorder %v6854_v49, 4 }
 0xce2   : > { %v4054_v47 = vadd.f32 %v4050_v30, %v4029_v10  ;;  %v3931_v21 = vadd.f32 %v3927_v52, %v3906_v36  ;;  %v4080_v54 = vadd.f32 %v4076_v45, %v4055_v50  ;;  %vm4263_vm12 = vcmp.lt.s32.totalorder %v6854_v49, 3  ;;  %v7421_v10 = vld [vmem:[%s1491_s6] ss:$0 sm:$0xff] }
 0xce3   : > { %v4278_v20 = vadd.f32 %v7285_v14, %v4253_v16  ;;  %v4126_v32 = vmul.f32 %v6924_v40, %v3703_v18  ;;  %v4151_v3 = vmul.f32 %v7888_v2, %v7015_v19  ;;  %v4176_v13 = vmul.f32 %v7230_v43, %v4171_v44 }
 0xce4   : > { %v3956_v46 = vadd.f32 %v3952_v37, %v3931_v21  ;;  %v4105_v61 = vadd.f32 %v4101_v11, %v4080_v54  ;;  %v4221_v22 = vsel %vm4213_vm15, %v7082_v15, 0.0  ;;  %v4246_v30 = vsel %vm4238_vm8, %v7090_v48, 0.0 }
 0xce5   : > { %v4303_v9 = vadd.f32 %v7288_v55, %v4278_v20  ;;  %v4079_v29 = vadd.f32 %v4075_v5, %v4054_v47  ;;  %v4201_v14 = vmul.f32 %v7252_v23, %v4196_v58  ;;  %v4271_v18 = vsel %vm4263_vm12, %v7109_v8, 0.0  ;;  %v7398_v55 = vld [vmem:[%s1485_s30] ss:$0 sm:$0xff] }
 0xce6   : > { %v7388_v28 = vmul.f32 0.0, %v7888_v2  ;;  %v7391_v19 = vmul.f32 0.0, %v7230_v43  ;;  %v4130_v26 = vadd.f32 %v4126_v32, %v4105_v61  ;;  %vm4288_vm7 = vcmp.lt.s32.totalorder %v6854_v49, 2 }
 0xce7   : > { %v4328_v57 = vadd.f32 %v7305_v6, %v4303_v9  ;;  %v4226_v5 = vmul.f32 %v7257_v38, %v4221_v22  ;;  %v4251_v4 = vmul.f32 %v7261_v12, %v4246_v30  ;;  %vm3989_vm2 = vcmp.lt.s32.totalorder %v6851_v60, 14  ;;  %v7409_v6 = vld [vmem:[%s1488_s3] ss:$0 sm:$0xff]  ;;  %v7892_v30 = vld [vmem:[#allocation60_spill] sm:$0xff] }
 0xce8   : > { %v4104_v63 = vadd.f32 %v7327_v59, %v4079_v29  ;;  %v3981_v43 = vadd.f32 %v3977_v39, %v3956_v46  ;;  %v4155_v27 = vadd.f32 %v4151_v3, %v4130_v26  ;;  %v4276_v53 = vmul.f32 %v7265_v35, %v4271_v18 }
 0xce9   : > { %v4335_v52 = vadd.f32 %v7398_v55, %v4328_v57  ;;  %v4296_v37 = vsel %vm4288_vm7, %v7122_v62, 0.0  ;;  %v3997_v33 = vsel %vm3989_vm2, %v7887_v24, 0.0  ;;  %vm4014_vm3 = vcmp.lt.s32.totalorder %v6851_v60, 13 }
 0xcea   : > { %v4129_v51 = vadd.f32 %v7344_v41, %v4104_v63  ;;  %v4200_v25 = vmul.f32 0.0, %v7252_v23  ;;  %v4180_v59 = vadd.f32 %v4176_v13, %v4155_v27  ;;  %vm4313_vm10 = vcmp.lt.s32.totalorder %v6854_v49, 1 }
 0xceb   : > { %v4342_v34 = vmul.f32 %v7409_v6, %v4335_v52  ;;  %v4002_v39 = vmul.f32 %v7868_v17, %v3997_v33  ;;  %v4022_v45 = vsel %vm4014_vm3, %v7082_v15, 0.0  ;;  %vm4039_vm11 = vcmp.lt.s32.totalorder %v6851_v60, 12 }
 0xcec   : > { %v4154_v36 = vadd.f32 %v7388_v28, %v4129_v51  ;;  %v4225_v41 = vmul.f32 0.0, %v7257_v38  ;;  %v4205_v50 = vadd.f32 %v4201_v14, %v4180_v59  ;;  %v4301_v23 = vmul.f32 %v7268_v0, %v4296_v37 }
 0xced   : > { %v7430_v49 = vadd.f32 %v7421_v10, %v4342_v34  ;;  %v4321_v11 = vsel %vm4313_vm10, %v7149_v1, 0.0  ;;  %v4006_v44 = vadd.f32 %v4002_v39, %v3981_v43  ;;  %v4027_v16 = vmul.f32 %v7869_v56, %v4022_v45 }
 0xcee   : > { %v4179_v17 = vadd.f32 %v7391_v19, %v4154_v36  ;;  %v4230_v15 = vadd.f32 %v4226_v5, %v4205_v50  ;;  %v4047_v24 = vsel %vm4039_vm11, %v7090_v48, 0.0  ;;  %vm4064_vm4 = vcmp.lt.s32.totalorder %v6851_v60, 11 }
 0xcef   : > { %v5411_v38 = vmul.f32 -1.442695, %v7430_v49  ;;  %v4031_v58 = vadd.f32 %v4027_v16, %v4006_v44  ;;  %v4052_v47 = vmul.f32 %v7873_v42, %v4047_v24  ;;  %v4072_v21 = vsel %vm4064_vm4, %v7109_v8, 0.0 }
 0xcf0   : > { %v4204_v54 = vadd.f32 %v4200_v25, %v4179_v17  ;;  %v4255_v20 = vadd.f32 %v4251_v4, %v4230_v15  ;;  %v4077_v32 = vmul.f32 %v7874_v31, %v4072_v21  ;;  %vm4089_vm6 = vcmp.lt.s32.totalorder %v6851_v60, 10 }
 0xcf1   : > { %5709 = vpow2.f32 %v5411_v38  ;;  %v4056_v56 = vadd.f32 %v4052_v47, %v4031_v58  ;;  %v4097_v2 = vsel %vm4089_vm6, %v7122_v62, 0.0  ;;  %vm4114_vm0 = vcmp.lt.s32.totalorder %v6851_v60, 9 }
 0xcf2   : > { %v4229_v48 = vadd.f32 %v4225_v41, %v4204_v54  ;;  %v4250_v3 = vmul.f32 0.0, %v7261_v12  ;;  %v4280_v13 = vadd.f32 %v4276_v53, %v4255_v20  ;;  %v4122_v42 = vsel %vm4114_vm0, %v7149_v1, 0.0 }
 0xcf3   : > { %v4081_v46 = vadd.f32 %v4077_v32, %v4056_v56  ;;  %v4102_v8 = vmul.f32 %v6921_v7, %v4097_v2  ;;  %v4275_v31 = vmul.f32 0.0, %v7265_v35  ;;  %v4326_v9 = vmul.f32 %v7892_v30, %v4321_v11 }
 0xcf4   : > { %v4254_v61 = vadd.f32 %v4250_v3, %v4229_v48  ;;  %v4305_v22 = vadd.f32 %v4301_v23, %v4280_v13  ;;  %v4127_v62 = vmul.f32 %v6924_v40, %v4122_v42  ;;  %v4300_v60 = vmul.f32 0.0, %v7268_v0 }
 0xcf5   : > { %v4106_v29 = vadd.f32 %v4102_v8, %v4081_v46  ;;  %v4325_v7 = vmul.f32 0.0, %v7892_v30  ;;  %vm7893_vm9 = vcmask 261120  }
 0xcf6   : > { %v4279_v14 = vadd.f32 %v4275_v31, %v4254_v61  ;;  %v4330_v18 = vadd.f32 %v4326_v9, %v4305_v22  ;;  %vm7894_vm11 = vmmov %vm7893_vm9 }
 0xcf7   : > { %v5710_v12 = vpop.eup %5709  ;;  %v4131_v26 = vadd.f32 %v4127_v62, %v4106_v29  ;;  %vm7896_vm0 = vmmov %vm7893_vm9 }
 0xcf8   : > { %v4365_v57 = vadd.f32 1.0, %v5710_v12  ;;  %v4304_v1 = vadd.f32 %v4300_v60, %v4279_v14  ;;  %v4337_v5 = vadd.f32 %v7398_v55, %v4330_v18 }
 0xcf9   : > { %v4156_v35 = vadd.f32 %v7388_v28, %v4131_v26 }
 0xcfa   : > { %5711 = vrcp.f32 %v4365_v57  ;;  %v4329_v4 = vadd.f32 %v4325_v7, %v4304_v1  ;;  %v4344_v63 = vmul.f32 %v7409_v6, %v4337_v5  ;;  %v4378_v50 = vand.u32 2147483647, %v4365_v57 }
 0xcfb   : > { %v4181_v40 = vadd.f32 %v7391_v19, %v4156_v35  ;;  %v4380_v19 = vand.u32 2147483648, %v4365_v57  ;;  %vm4374_vm5 = vweird.f32 %v4365_v57 }
 0xcfc   : > { %v4336_v43 = vadd.f32 %v7398_v55, %v4329_v4  ;;  %v7458_v0 = vadd.f32 %v7421_v10, %v4344_v63  ;;  %vm4379_vm13 = vcmp.eq.f32.partialorder %v4378_v50, 8.507059e+37  ;;  %v7902_v50 = vld [vmem:[#allocation53_spill] sm:$0xff] }
 0xcfd   : > { %v4206_v27 = vadd.f32 %v4200_v25, %v4181_v40 }
 0xcfe   : > { %v4343_v53 = vmul.f32 %v7409_v6, %v4336_v43  ;;  %v5413_v52 = vmul.f32 -1.442695, %v7458_v0 }
 0xcff   : > { %v4231_v37 = vadd.f32 %v4225_v41, %v4206_v27  ;;  %v4381_v41 = vor.u32 1.1754944e-38, %v4380_v19 }
 0xd00   : > { %v5712_v33 = vpop.eup %5711  ;;  %v4350_v28 = vadd.f32 %v7421_v10, %v4343_v53  ;;  %5713 = vpow2.f32 %v5413_v52  ;;  %v5580_v53 = vld [vmem:[%s1499_s12] ss:$0 sm:$0xff] }
 0xd01   : > { %v4370_v51 = vmul.f32 %v5712_v33, %v4365_v57  ;;  %v4256_v59 = vadd.f32 %v4250_v3, %v4231_v37  ;;  %vm4375_vm1 = vweird.f32 %v5712_v33 }
 0xd02   : > { %v5412_v39 = vmul.f32 -1.442695, %v4350_v28  ;;  %vm4376_vm14 = vmor %vm4374_vm5, %vm4375_vm1 }
 0xd03   : > { %v4371_v34 = vsub.f32 1.0, %v4370_v51  ;;  %v4281_v45 = vadd.f32 %v4275_v31, %v4256_v59 }
 0xd04   : > { %5715 = vpow2.f32 %v5412_v39 }
 0xd05   : > { %v4372_v36 = vmul.f32 %v5712_v33, %v4371_v34  ;;  %v4306_v25 = vadd.f32 %v4300_v60, %v4281_v45  ;;  %v7900_v34 = vld [vmem:[#allocation52_spill] sm:$0xff] }
 0xd06   : > { %v5714_v23 = vpop.eup %5713 }
 0xd07   : > { %v4373_v11 = vadd.f32 %v5712_v33, %v4372_v36  ;;  %v4367_v44 = vadd.f32 1.0, %v5714_v23  ;;  %v4331_v16 = vadd.f32 %v4325_v7, %v4306_v25 }
 0xd09   : > { %v4377_v17 = vsel %vm4376_vm14, %v5712_v33, %v4373_v11  ;;  %5717 = vrcp.f32 %v4367_v44  ;;  %v4338_v58 = vadd.f32 %v7398_v55, %v4331_v16  ;;  %v4410_v9 = vand.u32 2147483648, %v4367_v44 }
 0xd0a   : > { %v4382_v15 = vsel %vm4379_vm13, %v4381_v41, %v4377_v17  ;;  %v5716_v24 = vpop.eup %5715  ;;  %vm4404_vm3 = vweird.f32 %v4367_v44  ;;  %v4408_v62 = vand.u32 2147483647, %v4367_v44  ;;  %vm7897_vm13 = vmmov %vm7896_vm0 }
 0xd0b   : > { %v4429_v38 = vmul.f32 %v4382_v15, %v7430_v49  ;;  %v4366_v47 = vadd.f32 1.0, %v5716_v24  ;;  %v4345_v21 = vmul.f32 %v7409_v6, %v4338_v58  ;;  %v4411_v18 = vor.u32 1.1754944e-38, %v4410_v9  ;;  %v7906_v24 = vld [vmem:[#allocation50_spill] sm:$0xff]  ;;  %v4485_v9 = vld [vmem:[%s6124_s15 + $0x10] sm:$0xff] }
 0xd0c   : > { %vm4409_vm4 = vcmp.eq.f32.partialorder %v4408_v62, 8.507059e+37 }
 0xd0d   : > { %5415 = vmatmul.msk.f32.vlgmr.msrb.gmra.mxu0 %vm7893_vm9, %v4429_v38  ;;  %5719 = vrcp.f32 %v4366_v47  ;;  %v4352_v54 = vadd.f32 %v7421_v10, %v4345_v21  ;;  %v4395_v42 = vand.u32 2147483648, %v4366_v47  ;;  %v4393_v55 = vand.u32 2147483647, %v4366_v47  ;;  %vm7899_vm9 = vmmov %vm7896_vm0 }
 0xd0e   : > { %vm4389_vm8 = vweird.f32 %v4366_v47 }
 0xd0f   : > { %v5718_v20 = vpop.eup %5717  ;;  %v5414_v56 = vmul.f32 -1.442695, %v4352_v54  ;;  %v4396_v6 = vor.u32 1.1754944e-38, %v4395_v42  ;;  %vm4394_vm7 = vcmp.eq.f32.partialorder %v4393_v55, 8.507059e+37 }
 0xd10   : > { %v4400_v32 = vmul.f32 %v5718_v20, %v4367_v44  ;;  %vm4405_vm2 = vweird.f32 %v5718_v20  ;;  %v7904_v44 = vld [vmem:[#allocation54_spill] sm:$0xff] }
 0xd11   : > { %5721 = vpow2.f32 %v5414_v56  ;;  %vm4406_vm10 = vmor %vm4404_vm3, %vm4405_vm2 }
 0xd12   : > { %v4401_v3 = vsub.f32 1.0, %v4400_v32  ;;  %vm7908_vm2 = vmmov %vm7896_vm0 }
 0xd13   : > { %v5720_v2 = vpop.eup %5719  ;;  %vm7909_vm3 = vmmov %vm7896_vm0 }
 0xd14   : > { %v4385_v48 = vmul.f32 %v5720_v2, %v4366_v47  ;;  %vm4390_vm15 = vweird.f32 %v5720_v2  ;;  %v4402_v8 = vmul.f32 %v5718_v20, %v4401_v3 }
 0xd15   : > { %vm4391_vm12 = vmor %vm4389_vm8, %vm4390_vm15 }
 0xd16   : > { %v4386_v13 = vsub.f32 1.0, %v4385_v48  ;;  %v4403_v22 = vadd.f32 %v5718_v20, %v4402_v8  ;;  %vm7901_vm15 = vmmov %vm7896_vm0 }
 0xd17   : > { %v5722_v49 = vpop.eup %5721  ;;  %vm7903_vm8 = vmmov %vm7896_vm0 }
 0xd18   : > { %v4387_v46 = vmul.f32 %v5720_v2, %v4386_v13  ;;  %v4368_v61 = vadd.f32 1.0, %v5722_v49  ;;  %v4407_v14 = vsel %vm4406_vm10, %v5718_v20, %v4403_v22  ;;  %vm7910_vm10 = vmmov %vm7896_vm0 }
 0xd19   : > { %v4412_v26 = vsel %vm4409_vm4, %v4411_v18, %v4407_v14 }
 0xd1a   : > { %v4388_v31 = vadd.f32 %v5720_v2, %v4387_v46  ;;  %5723 = vrcp.f32 %v4368_v61  ;;  %v4425_v1 = vand.u32 2147483648, %v4368_v61  ;;  %v4431_v5 = vmul.f32 %v4412_v26, %v7458_v0  ;;  %v7898_v0 = vld [vmem:[#allocation51_spill] sm:$0xff]  ;;  %v4483_v26 = vld [vmem:[%s6124_s15] sm:$0xff] }
 0xd1b   : > { %v4423_v35 = vand.u32 2147483647, %v4368_v61  ;;  %vm4419_vm1 = vweird.f32 %v4368_v61 }
 0xd1c   : > { %v4392_v10 = vsel %vm4391_vm12, %v5720_v2, %v4388_v31  ;;  %v4426_v63 = vor.u32 1.1754944e-38, %v4425_v1  ;;  %vm7905_vm12 = vmmov %vm7896_vm0 }
 0xd1d   : > { %v4397_v30 = vsel %vm4394_vm7, %v4396_v6, %v4392_v10  ;;  %vm4424_vm14 = vcmp.eq.f32.partialorder %v4423_v35, 8.507059e+37  ;;  %vm7907_vm7 = vmmov %vm7896_vm0  ;;  %v4486_v6 = vld [vmem:[%s6124_s15 + $0x18] sm:$0xff] }
 0xd1e   : > { %v4430_v29 = vmul.f32 %v4397_v30, %v4350_v28  ;;  %4634 = vmatpush.msrb.mxu2 %v4486_v6  ;;  %v7543_v6 = vld [vmem:[%s1513_s26] ss:$0 sm:$0xff] }
 0xd20   : > { %5416 = vmatmul.msk.f32.gmra.mxu0 %vm7894_vm11, %v4430_v29  ;;  %v5724_v60 = vpop.eup %5723  ;;  %4635 = vmatpush.msrb.mxu2 %v4485_v9 }
 0xd21   : > { %v4415_v12 = vmul.f32 %v5724_v60, %v4368_v61  ;;  %vm4420_vm6 = vweird.f32 %v5724_v60 }
 0xd22   : > { %vm4421_vm5 = vmor %vm4419_vm1, %vm4420_vm6 }
 0xd23   : > { %v4416_v57 = vsub.f32 1.0, %v4415_v12  ;;  %v4484_v12 = vld [vmem:[%s6124_s15 + $0x8] sm:$0xff] }
 0xd24   : > { %4636 = vmatpush.msrb.mxu2 %v4484_v12 }
 0xd25   : > { %v4417_v7 = vmul.f32 %v5724_v60, %v4416_v57 }
 0xd26   : > { %4637 = vmatpush.msrb.mxu2 %v4483_v26  ;;  %v4496_v26 = vld [vmem:[%s6129_s1 + $0x40] sm:$0xff] }
 0xd27   : > { %v4418_v4 = vadd.f32 %v5724_v60, %v4417_v7 }
 0xd28   : > { %5417 = vmatmul.msk.f32.gmra.mxu0 %vm7896_vm0, %v4431_v5  ;;  %v5581_v5 = vld [vmem:[%s1502_s22] ss:$0 sm:$0xff]  ;;  %s5858_s22 = smov [#allocation2]  }
 0xd29   : > { %v4422_v40 = vsel %vm4421_vm5, %v5724_v60, %v4418_v4  ;;  %s4887_s26 = sshll.u32 %s5858_s22, 4  ;;  %s4888_s26 = int_to_ptr.vmem [resolvable:$true] %s4887_s26 }
 0xd2a   : > { %v4427_v43 = vsel %vm4424_vm14, %v4426_v63, %v4422_v40  ;;  %v5582_v40 = vld [vmem:[%s1505_s14] ss:$0 sm:$0xff] }
 0xd2b   : > { %v4432_v27 = vmul.f32 %v4427_v43, %v4352_v54 }
 0xd30   : > { %5418 = vmatmul.msk.f32.gmra.mxu0 %vm7897_vm13, %v4432_v27 }
 0xd8a   : > { %v4465_v52 = vpop.f32.mrf.mxu0 }
 0xd8b   : > { %v4466_v37 = vadd.f32 %v5580_v53, %v4465_v52 }
 0xd8d   : > { %v7476_v33 = vadd.f32 %v4466_v37, %v7898_v0 }
 0xd8f   : > { %v4505_v51 = vsel %vm7899_vm9, %v7476_v33, 0.0 }
 0xd90   : > { %4506 = vadd.xlane.f32.xlu2 %v4505_v51 }
 0xd9d   : > { %v4468_v28 = vpop.f32.mrf.mxu0 }
 0xd9e   : > { %v4469_v59 = vadd.f32 %v5580_v53, %v4468_v28 }
 0xda0   : > { %v7481_v39 = vadd.f32 %v4469_v59, %v7900_v34 }
 0xda2   : > { %v4508_v19 = vsel %vm7901_vm15, %v7481_v39, 0.0 }
 0xda3   : > { %4509 = vadd.xlane.f32.xlu0 %v4508_v19 }
 0xda5   : > { %v4471_v45 = vpop.f32.mrf.mxu0 }
 0xda6   : > { %v4472_v36 = vadd.f32 %v5580_v53, %v4471_v45 }
 0xda8   : > { %v7486_v25 = vadd.f32 %v4472_v36, %v7902_v50 }
 0xdaa   : > { %v4511_v23 = vsel %vm7903_vm8, %v7486_v25, 0.0  ;;  %vm7913_vm8 = vmmov %vm7896_vm0 }
 0xdab   : > { %4512 = vadd.xlane.f32.xlu1 %v4511_v23 }
 0xdad   : > { %v4474_v11 = vpop.f32.mrf.mxu0 }
 0xdae   : > { %v4475_v41 = vadd.f32 %v5580_v53, %v4474_v11 }
 0xdb0   : > { %v7491_v16 = vadd.f32 %v4475_v41, %v7904_v44 }
 0xdb2   : > { %v4514_v17 = vsel %vm7905_vm12, %v7491_v16, 0.0 }
 0xdb3   : > { %4515 = vadd.xlane.f32.xlu2 %v4514_v17 }
 0xe03   : > { %v4507_v15 = vpop.xlane.xlu2 %4506 }
 0xe04   : > { %v4517_v38 = vmul.f32 %v4507_v15, %v7906_v24 }
 0xe06   : > { %v4521_v58 = vsub.f32 %v7476_v33, %v4517_v38 }
 0xe08   : > { %v4525_v47 = vmul.f32 %v4521_v58, %v4521_v58 }
 0xe0a   : > { %v4529_v21 = vsel %vm7907_vm7, %v4525_v47, 0.0 }
 0xe0b   : > { %4530 = vadd.xlane.f32.xlu0 %v4529_v21 }
 0xe16   : > { %v4510_v54 = vpop.xlane.xlu0 %4509 }
 0xe17   : > { %v4518_v20 = vmul.f32 %v4510_v54, %v7906_v24 }
 0xe19   : > { %v7500_v32 = vsub.f32 %v7481_v39, %v4518_v20 }
 0xe1b   : > { %v4526_v56 = vmul.f32 %v7500_v32, %v7500_v32 }
 0xe1d   : > { %v4532_v2 = vsel %vm7908_vm2, %v4526_v56, 0.0 }
 0xe1e   : > { %4533 = vadd.xlane.f32.xlu1 %v4532_v2  ;;  %v4513_v48 = vpop.xlane.xlu1 %4512 }
 0xe1f   : > { %v4519_v3 = vmul.f32 %v4513_v48, %v7906_v24 }
 0xe21   : > { %v7507_v13 = vsub.f32 %v7486_v25, %v4519_v3 }
 0xe23   : > { %v4527_v42 = vmul.f32 %v7507_v13, %v7507_v13 }
 0xe25   : > { %v4535_v49 = vsel %vm7909_vm3, %v4527_v42, 0.0  ;;  %vm7915_vm3 = vmmov %vm7896_vm0 }
 0xe26   : > { %4536 = vadd.xlane.f32.xlu2 %v4535_v49  ;;  %v4516_v46 = vpop.xlane.xlu2 %4515 }
 0xe27   : > { %v4520_v55 = vmul.f32 %v4516_v46, %v7906_v24 }
 0xe29   : > { %v7514_v8 = vsub.f32 %v7491_v16, %v4520_v55 }
 0xe2b   : > { %v4528_v61 = vmul.f32 %v7514_v8, %v7514_v8 }
 0xe2d   : > { %v4538_v31 = vsel %vm7910_vm10, %v4528_v61, 0.0  ;;  %vm7916_vm10 = vmmov %vm7896_vm0 }
 0xe2e   : > { %4539 = vadd.xlane.f32.xlu0 %v4538_v31 }
 0xe7e   : > { %v4531_v10 = vpop.xlane.xlu0 %4530 }
 0xe7f   : > { %v4541_v22 = vmul.f32 %v4531_v10, %v7906_v24  ;;  %v4503_v10 = vld [vmem:[%s6129_s1 + $0x78] sm:$0xff] }
 0xe80   : > { %4734 = vmatpush.msra.mxu3 %v4503_v10 }
 0xe81   : > { %v4545_v30 = vadd.f32 1e-05, %v4541_v22  ;;  %v4502_v22 = vld [vmem:[%s6129_s1 + $0x70] sm:$0xff] }
 0xe82   : > { %4735 = vmatpush.msra.mxu3 %v4502_v22 }
 0xe83   : > { %5725 = vrsqrt.f32 %v4545_v30  ;;  %vm4555_vm4 = vweird.f32 %v4545_v30 }
 0xe89   : > { %v5726_v29 = vpop.eup %5725 }
 0xe8a   : > { %v4550_v62 = vmul.f32 %v5726_v29, %v4545_v30  ;;  %vm4556_vm11 = vweird.f32 %v5726_v29 }
 0xe8b   : > { %vm4557_vm6 = vmor %vm4555_vm4, %vm4556_vm11 }
 0xe8c   : > { %v4551_v14 = vmul.f32 %v5726_v29, %v4550_v62  ;;  %v4500_v62 = vld [vmem:[%s6129_s1 + $0x60] sm:$0xff] }
 0xe8e   : > { %v4552_v60 = vmul.f32 0.5, %v4551_v14  ;;  %v4499_v14 = vld [vmem:[%s6129_s1 + $0x58] sm:$0xff] }
 0xe90   : > { %v4553_v18 = vsub.f32 1.5, %v4552_v60  ;;  %v4498_v60 = vld [vmem:[%s6129_s1 + $0x50] sm:$0xff] }
 0xe91   : > { %v4534_v1 = vpop.xlane.xlu1 %4533 }
 0xe92   : > { %v4554_v57 = vmul.f32 %v5726_v29, %v4553_v18  ;;  %v4542_v7 = vmul.f32 %v4534_v1, %v7906_v24  ;;  %v4497_v18 = vld [vmem:[%s6129_s1 + $0x48] sm:$0xff]  ;;  %v4495_v1 = vld [vmem:[%s6129_s1 + $0x38] sm:$0xff] }
 0xe94   : > { %v4558_v35 = vsel %vm4557_vm6, %v5726_v29, %v4554_v57  ;;  %v4546_v63 = vadd.f32 1e-05, %v4542_v7  ;;  %v4501_v29 = vld [vmem:[%s6129_s1 + $0x68] sm:$0xff] }
 0xe95   : > { %v4589_v4 = vmul.f32 %v4558_v35, %v4521_v58  ;;  %4736 = vmatpush.msra.mxu3 %v4501_v29  ;;  %v4493_v7 = vld [vmem:[%s6129_s1 + $0x28] sm:$0xff]  ;;  %v4492_v35 = vld [vmem:[%s6129_s1 + $0x20] sm:$0xff] }
 0xe96   : > { %5727 = vrsqrt.f32 %v4546_v63  ;;  %vm4565_vm5 = vweird.f32 %v4546_v63 }
 0xe97   : > { %v4596_v43 = vmul.f32 %v5581_v5, %v4589_v4  ;;  %4737 = vmatpush.msra.mxu3 %v4500_v62 }
 0xe99   : > { %v4603_v27 = vadd.f32 %v5582_v40, %v4596_v43  ;;  %v4537_v53 = vpop.xlane.xlu2 %4536  ;;  %4738 = vmatpush.msra.mxu3 %v4499_v14 }
 0xe9a   : > { %v4543_v52 = vmul.f32 %v4537_v53, %v7906_v24 }
 0xe9b   : > { %5419 = vmatmul.msk.f32.vlgmr.msrb.gmra.mxu2 %vm7896_vm0, %v4603_v27  ;;  %4739 = vmatpush.msra.mxu3 %v4498_v60  ;;  %v4491_v27 = vld [vmem:[%s6129_s1 + $0x18] sm:$0xff] }
 0xe9c   : > { %v5728_v37 = vpop.eup %5727  ;;  %v4547_v0 = vadd.f32 1e-05, %v4543_v52 }
 0xe9d   : > { %v4560_v51 = vmul.f32 %v5728_v37, %v4546_v63  ;;  %vm4566_vm1 = vweird.f32 %v5728_v37  ;;  %4740 = vmatpush.msra.mxu3 %v4497_v18 }
 0xe9e   : > { %5729 = vrsqrt.f32 %v4547_v0  ;;  %vm4567_vm14 = vmor %vm4565_vm5, %vm4566_vm1  ;;  %vm4575_vm9 = vweird.f32 %v4547_v0 }
 0xe9f   : > { %v4561_v28 = vmul.f32 %v5728_v37, %v4560_v51  ;;  %4741 = vmatpush.msra.mxu3 %v4496_v26 }
 0xea1   : > { %v4562_v59 = vmul.f32 0.5, %v4561_v28  ;;  %v4540_v34 = vpop.xlane.xlu0 %4539  ;;  %4742 = vmatpush.msra.mxu3 %v4495_v1 }
 0xea2   : > { %v4544_v19 = vmul.f32 %v4540_v34, %v7906_v24 }
 0xea3   : > { %v4563_v45 = vsub.f32 1.5, %v4562_v59  ;;  %v4489_v59 = vld [vmem:[%s6129_s1 + $0x8] sm:$0xff] }
 0xea4   : > { %v5730_v36 = vpop.eup %5729  ;;  %v4548_v50 = vadd.f32 1e-05, %v4544_v19  ;;  %v4488_v19 = vld [vmem:[%s6129_s1] sm:$0xff] }
 0xea5   : > { %v4564_v23 = vmul.f32 %v5728_v37, %v4563_v45  ;;  %v4570_v11 = vmul.f32 %v5730_v36, %v4547_v0  ;;  %vm4576_vm13 = vweird.f32 %v5730_v36 }
 0xea6   : > { %5731 = vrsqrt.f32 %v4548_v50  ;;  %vm4577_vm15 = vmor %vm4575_vm9, %vm4576_vm13  ;;  %vm4585_vm7 = vweird.f32 %v4548_v50 }
 0xea7   : > { %v4568_v41 = vsel %vm4567_vm14, %v5728_v37, %v4564_v23  ;;  %v4571_v44 = vmul.f32 %v5730_v36, %v4570_v11  ;;  %v4490_v37 = vld [vmem:[%s6129_s1 + $0x10] sm:$0xff] }
 0xea8   : > { %v4590_v17 = vmul.f32 %v4568_v41, %v7500_v32 }
 0xea9   : > { %v4572_v15 = vmul.f32 0.5, %v4571_v44 }
 0xeaa   : > { %v4597_v38 = vmul.f32 %v5581_v5, %v4590_v17 }
 0xeab   : > { %v4573_v58 = vsub.f32 1.5, %v4572_v15 }
 0xeac   : > { %v5732_v47 = vpop.eup %5731  ;;  %v4604_v21 = vadd.f32 %v5582_v40, %v4597_v38 }
 0xead   : > { %v4574_v54 = vmul.f32 %v5730_v36, %v4573_v58  ;;  %v4580_v20 = vmul.f32 %v5732_v47, %v4548_v50  ;;  %vm4586_vm12 = vweird.f32 %v5732_v47 }
 0xeae   : > { %5420 = vmatmul.msk.f32.gmra.mxu2 %vm7913_vm8, %v4604_v21  ;;  %vm4587_vm2 = vmor %vm4585_vm7, %vm4586_vm12 }
 0xeaf   : > { %v4578_v56 = vsel %vm4577_vm15, %v5730_v36, %v4574_v54  ;;  %v4581_v2 = vmul.f32 %v5732_v47, %v4580_v20 }
 0xeb0   : > { %v4591_v48 = vmul.f32 %v4578_v56, %v7507_v13 }
 0xeb1   : > { %v4582_v32 = vmul.f32 0.5, %v4581_v2 }
 0xeb2   : > { %v4598_v3 = vmul.f32 %v5581_v5, %v4591_v48 }
 0xeb3   : > { %v4583_v42 = vsub.f32 1.5, %v4582_v32 }
 0xeb4   : > { %v4605_v49 = vadd.f32 %v5582_v40, %v4598_v3 }
 0xeb5   : > { %v4584_v46 = vmul.f32 %v5732_v47, %v4583_v42 }
 0xeb6   : > { %5421 = vmatmul.msk.f32.gmra.mxu2 %vm7915_vm3, %v4605_v49 }
 0xeb7   : > { %v4588_v55 = vsel %vm4587_vm2, %v5732_v47, %v4584_v46 }
 0xeb8   : > { %v4592_v61 = vmul.f32 %v4588_v55, %v7514_v8 }
 0xeba   : > { %v4599_v31 = vmul.f32 %v5581_v5, %v4592_v61  ;;  %v4494_v5 = vld [vmem:[%s6129_s1 + $0x30] sm:$0xff] }
 0xebb   : > { %4743 = vmatpush.msra.mxu3 %v4494_v5 }
 0xebc   : > { %v4606_v13 = vadd.f32 %v5582_v40, %v4599_v31 }
 0xebd   : > { %4744 = vmatpush.msra.mxu3 %v4493_v7 }
 0xebe   : > { %5422 = vmatmul.msk.f32.gmra.mxu2 %vm7916_vm10, %v4606_v13 }
 0xebf   : > { %4745 = vmatpush.msra.mxu3 %v4492_v35 }
 0xec1   : > { %4746 = vmatpush.msra.mxu3 %v4491_v27  ;;  %v5584_v27 = vld [vmem:[%s1521_s24] ss:$0 sm:$0xff] }
 0xec3   : > { %4747 = vmatpush.msra.mxu3 %v4490_v37 }
 0xec5   : > { %4748 = vmatpush.msra.mxu3 %v4489_v59 }
 0xec7   : > { %4749 = vmatpush.msra.mxu3 %v4488_v19 }
 0xf1e   : > { %v4639_v30 = vpop.f32.mrf.mxu2 }
 0xf1f   : > { %v4640_v9 = vadd.f32 %v7543_v6, %v4639_v30 }
 0xf21   : > { %v5423_v8 = vmul.f32 -1.442695, %v4640_v9 }
 0xf23   : > { %5733 = vpow2.f32 %v5423_v8 }
 0xf29   : > { %v5734_v12 = vpop.eup %5733 }
 0xf2a   : > { %v4663_v57 = vadd.f32 1.0, %v5734_v12 }
 0xf2c   : > { %5735 = vrcp.f32 %v4663_v57  ;;  %v4678_v0 = vand.u32 2147483648, %v4663_v57  ;;  %v4676_v28 = vand.u32 2147483647, %v4663_v57  ;;  %vm4672_vm4 = vweird.f32 %v4663_v57 }
 0xf2e   : > { %v4679_v45 = vor.u32 1.1754944e-38, %v4678_v0  ;;  %vm4677_vm0 = vcmp.eq.f32.partialorder %v4676_v28, 8.507059e+37 }
 0xf31   : > { %v4642_v63 = vpop.f32.mrf.mxu2 }
 0xf32   : > { %v5736_v4 = vpop.eup %5735  ;;  %v4643_v43 = vadd.f32 %v7543_v6, %v4642_v63 }
 0xf33   : > { %v4668_v40 = vmul.f32 %v5736_v4, %v4663_v57  ;;  %vm4673_vm11 = vweird.f32 %v5736_v4 }
 0xf34   : > { %v5424_v52 = vmul.f32 -1.442695, %v4643_v43  ;;  %vm4674_vm6 = vmor %vm4672_vm4, %vm4673_vm11  ;;  %vm7918_vm11 = vcmask 261120  }
 0xf35   : > { %v4669_v53 = vsub.f32 1.0, %v4668_v40  ;;  %vm7919_vm4 = vmmov %vm7918_vm11 }
 0xf36   : > { %5737 = vpow2.f32 %v5424_v52 }
 0xf37   : > { %v4670_v51 = vmul.f32 %v5736_v4, %v4669_v53 }
 0xf39   : > { %v4671_v34 = vadd.f32 %v5736_v4, %v4670_v51  ;;  %v4645_v36 = vpop.f32.mrf.mxu2 }
 0xf3a   : > { %v4646_v23 = vadd.f32 %v7543_v6, %v4645_v36 }
 0xf3b   : > { %v4675_v50 = vsel %vm4674_vm6, %v5736_v4, %v4671_v34  ;;  %vm7920_vm6 = vmmov %vm7919_vm4 }
 0xf3c   : > { %v4680_v11 = vsel %vm4677_vm0, %v4679_v45, %v4675_v50  ;;  %v5738_v41 = vpop.eup %5737  ;;  %v5425_v17 = vmul.f32 -1.442695, %v4646_v23  ;;  %vm7921_vm0 = vmmov %vm7919_vm4 }
 0xf3d   : > { %v4727_v44 = vmul.f32 %v4680_v11, %v4640_v9  ;;  %v4664_v15 = vadd.f32 1.0, %v5738_v41 }
 0xf3e   : > { %5739 = vpow2.f32 %v5425_v17 }
 0xf3f   : > { %4750 = vmatmul.f32.vlgmr.msra.gmra.mxu3 %v4727_v44  ;;  %5741 = vrcp.f32 %v4664_v15  ;;  %v4693_v48 = vand.u32 2147483648, %v4664_v15  ;;  %v4691_v3 = vand.u32 2147483647, %v4664_v15  ;;  %vm4687_vm5 = vweird.f32 %v4664_v15 }
 0xf41   : > { %v4648_v38 = vpop.f32.mrf.mxu2  ;;  %v4694_v61 = vor.u32 1.1754944e-38, %v4693_v48  ;;  %vm4692_vm13 = vcmp.eq.f32.partialorder %v4691_v3, 8.507059e+37 }
 0xf42   : > { %v4649_v58 = vadd.f32 %v7543_v6, %v4648_v38 }
 0xf44   : > { %v5740_v47 = vpop.eup %5739  ;;  %v5426_v21 = vmul.f32 -1.442695, %v4649_v58 }
 0xf45   : > { %v5742_v54 = vpop.eup %5741  ;;  %v4665_v20 = vadd.f32 1.0, %v5740_v47 }
 0xf46   : > { %5743 = vpow2.f32 %v5426_v21  ;;  %v4683_v56 = vmul.f32 %v5742_v54, %v4664_v15  ;;  %vm4688_vm1 = vweird.f32 %v5742_v54 }
 0xf47   : > { %5745 = vrcp.f32 %v4665_v20  ;;  %vm4689_vm14 = vmor %vm4687_vm5, %vm4688_vm1  ;;  %v4708_v30 = vand.u32 2147483648, %v4665_v20  ;;  %v4706_v29 = vand.u32 2147483647, %v4665_v20  ;;  %vm4702_vm15 = vweird.f32 %v4665_v20 }
 0xf48   : > { %v4684_v2 = vsub.f32 1.0, %v4683_v56  ;;  %vm7922_vm1 = vmmov %vm7921_vm0 }
 0xf49   : > { %v4709_v14 = vor.u32 1.1754944e-38, %v4708_v30  ;;  %vm4707_vm12 = vcmp.eq.f32.partialorder %v4706_v29, 8.507059e+37  ;;  %vm7923_vm5 = vmmov %vm7921_vm0 }
 0xf4a   : > { %v4685_v32 = vmul.f32 %v5742_v54, %v4684_v2 }
 0xf4c   : > { %v5744_v42 = vpop.eup %5743  ;;  %v4686_v49 = vadd.f32 %v5742_v54, %v4685_v32 }
 0xf4d   : > { %v5746_v46 = vpop.eup %5745  ;;  %v4666_v55 = vadd.f32 1.0, %v5744_v42 }
 0xf4e   : > { %v4690_v31 = vsel %vm4689_vm14, %v5742_v54, %v4686_v49  ;;  %v4698_v13 = vmul.f32 %v5746_v46, %v4665_v20  ;;  %vm4703_vm9 = vweird.f32 %v5746_v46  ;;  %vm7924_vm14 = vmmov %vm7921_vm0 }
 0xf4f   : > { %5747 = vrcp.f32 %v4666_v55  ;;  %v4695_v6 = vsel %vm4692_vm13, %v4694_v61, %v4690_v31  ;;  %vm4704_vm8 = vmor %vm4702_vm15, %vm4703_vm9  ;;  %v4723_v1 = vand.u32 2147483648, %v4666_v55  ;;  %v4721_v7 = vand.u32 2147483647, %v4666_v55 }
 0xf50   : > { %v4728_v10 = vmul.f32 %v4695_v6, %v4643_v43  ;;  %v4699_v22 = vsub.f32 1.0, %v4698_v13  ;;  %vm4717_vm2 = vweird.f32 %v4666_v55  ;;  %vm7925_vm13 = vmmov %vm7921_vm0 }
 0xf51   : > { %v4724_v4 = vor.u32 1.1754944e-38, %v4723_v1  ;;  %vm4722_vm10 = vcmp.eq.f32.partialorder %v4721_v7, 8.507059e+37 }
 0xf52   : > { %4753 = vmatmul.f32.gmra.mxu3 %v4728_v10  ;;  %v4700_v9 = vmul.f32 %v5746_v46, %v4699_v22 }
 0xf54   : > { %v4701_v8 = vadd.f32 %v5746_v46, %v4700_v9 }
 0xf55   : > { %v5748_v62 = vpop.eup %5747 }
 0xf56   : > { %v4705_v60 = vsel %vm4704_vm8, %v5746_v46, %v4701_v8  ;;  %v4713_v18 = vmul.f32 %v5748_v62, %v4666_v55  ;;  %vm4718_vm7 = vweird.f32 %v5748_v62 }
 0xf57   : > { %v4710_v12 = vsel %vm4707_vm12, %v4709_v14, %v4705_v60  ;;  %vm4719_vm3 = vmor %vm4717_vm2, %vm4718_vm7 }
 0xf58   : > { %v4729_v26 = vmul.f32 %v4710_v12, %v4646_v23  ;;  %v4714_v57 = vsub.f32 1.0, %v4713_v18  ;;  %v5585_v18 = vld [vmem:[%s1524_s0] ss:$0 sm:$0xff]  ;;  %vm7928_vm12 = vmmov %vm7921_vm0  ;;  %s7933_s0 = sadd.s32 4294967295, %s7931_s16  }
 0xf59   : > { %p7610_p6 = scmp.eq.s32.totalorder %s7933_s0, 1 }
 0xf5a   : > { %4756 = vmatmul.f32.gmra.mxu3 %v4729_v26  ;;  %v4715_v5 = vmul.f32 %v5748_v62, %v4714_v57  ;;  %v5586_v57 = vld [vmem:[%s1527_s25] ss:$0 sm:$0xff]  ;;  %s7930_s25 = sld [smem:[#allocation38_spill]] }
 0xf5c   : > { %v4716_v35 = vadd.f32 %v5748_v62, %v4715_v5 }
 0xf5e   : > { %v4720_v63 = vsel %vm4719_vm3, %v5748_v62, %v4716_v35 }
 0xf5f   : > { %v4725_v40 = vsel %vm4722_vm10, %v4724_v4, %v4720_v63 }
 0xf60   : > { %v4730_v43 = vmul.f32 %v4725_v40, %v4649_v58  ;;  %s4889_s1 = sshll.u32 %s7930_s25, 4  ;;  %s5777_s10 = scalar_lea.hbm %s7930_s25, 32  ;;  %s4890_s1 = int_to_ptr.hbm [resolvable:$true] %s4889_s1 }
 0xf61   : > { %s5771_s28 = sshra.s32 %s4890_s1, 4  ;;  %s5772_s28 = int_to_ptr.hbm [resolvable:$true] %s5771_s28 }
 0xf62   : > { %4759 = vmatmul.f32.gmra.mxu3 %v4730_v43  ;;  %s5773_s2 = scalar_lea.hbm %s5772_s28, 32  ;;  %p5778_p10 = scmp.lt.s32.totalorder %s5772_s28, %s7930_s25 }
 0xf63   : > { %p5774_p7 = scmp.ne.s32.totalorder %s5772_s28, %s5773_s2  ;;  %p5779_p11 = scmp.lt.s32.totalorder %s5777_s10, %s5773_s2 }
 0xf65   : > { %p5775_p8 = pnand %p5774_p7, %p7610_p6  ;;  %p5780_p12 = por %p5779_p11, %p5778_p10 }
 0xf67   : > { %p5776_p9 = pneg %p5775_p8 }
 0xf69   : > { %p5781_p13 = pnand %p5780_p12, %p5776_p9 }
 0xfc2   : > { %v4751_v53 = vpop.f32.mrf.mxu3 }
 0xfc3   : > { %v4752_v52 = vadd.f32 %v5584_v27, %v4751_v53 }
 0xfc5   : > { %v4763_v37 = vmul.f32 0.5, %v4752_v52 }
 0xfc7   : > { %v4767_v0 = vadd.f32 %v4763_v37, %v7476_v33 }
 0xfc9   : > { %v4773_v51 = vsel %vm7918_vm11, %v4767_v0, 0.0 }
 0xfca   : > { %4774 = vadd.xlane.f32.xlu1 %v4773_v51 }
 0xfd5   : > { %v4754_v28 = vpop.f32.mrf.mxu3 }
 0xfd6   : > { %v4755_v59 = vadd.f32 %v5584_v27, %v4754_v28 }
 0xfd8   : > { %v4764_v34 = vmul.f32 0.5, %v4755_v59 }
 0xfda   : > { %v4768_v19 = vadd.f32 %v4764_v34, %v7481_v39 }
 0xfdc   : > { %v4776_v45 = vsel %vm7919_vm4, %v4768_v19, 0.0  ;;  %vm7929_vm4 = vmmov %vm7921_vm0 }
 0xfdd   : > { %4777 = vadd.xlane.f32.xlu2 %v4776_v45  ;;  %v4757_v36 = vpop.f32.mrf.mxu3 }
 0xfde   : > { %v4758_v50 = vadd.f32 %v5584_v27, %v4757_v36 }
 0xfe0   : > { %v4765_v23 = vmul.f32 0.5, %v4758_v50 }
 0xfe2   : > { %v4769_v11 = vadd.f32 %v4765_v23, %v7486_v25 }
 0xfe4   : > { %v4779_v41 = vsel %vm7920_vm6, %v4769_v11, 0.0 }
 0xfe5   : > { %v4760_v44 = vpop.f32.mrf.mxu3  ;;  %4780 = vadd.xlane.f32.xlu0 %v4779_v41 }
 0xfe6   : > { %v4761_v33 = vadd.f32 %v5584_v27, %v4760_v44 }
 0xfe8   : > { %v4766_v17 = vmul.f32 0.5, %v4761_v33 }
 0xfea   : > { %v4770_v15 = vadd.f32 %v4766_v17, %v7491_v16 }
 0xfec   : > { %v4782_v38 = vsel %vm7921_vm0, %v4770_v15, 0.0 }
 0xfed   : > { %4783 = vadd.xlane.f32.xlu1 %v4782_v38 }
0x103d   : > { %v4775_v39 = vpop.xlane.xlu1 %4774 }
0x103e   : > { %v4785_v58 = vmul.f32 %v4775_v39, %v7906_v24 }
0x1040   : > { %v4789_v47 = vsub.f32 %v4767_v0, %v4785_v58 }
0x1042   : > { %v4793_v21 = vmul.f32 %v4789_v47, %v4789_v47 }
0x1044   : > { %v4797_v54 = vsel %vm7922_vm1, %v4793_v21, 0.0 }
0x1045   : > { %4798 = vadd.xlane.f32.xlu2 %v4797_v54 }
0x1050   : > { %v4778_v25 = vpop.xlane.xlu2 %4777 }
0x1051   : > { %v4786_v20 = vmul.f32 %v4778_v25, %v7906_v24 }
0x1053   : > { %v4790_v56 = vsub.f32 %v4768_v19, %v4786_v20 }
0x1055   : > { %v4794_v2 = vmul.f32 %v4790_v56, %v4790_v56 }
0x1057   : > { %v4800_v48 = vsel %vm7923_vm5, %v4794_v2, 0.0  ;;  %vm7932_vm5 = vmmov %vm7929_vm4 }
0x1058   : > { %v4781_v32 = vpop.xlane.xlu0 %4780  ;;  %4801 = vadd.xlane.f32.xlu0 %v4800_v48 }
0x1059   : > { %v4787_v16 = vmul.f32 %v4781_v32, %v7906_v24 }
0x105b   : > { %v7581_v3 = vsub.f32 %v4769_v11, %v4787_v16 }
0x105d   : > { %v4795_v42 = vmul.f32 %v7581_v3, %v7581_v3 }
0x105f   : > { %v4803_v49 = vsel %vm7924_vm14, %v4795_v42, 0.0 }
0x1060   : > { %v4784_v46 = vpop.xlane.xlu1 %4783  ;;  %4804 = vadd.xlane.f32.xlu1 %v4803_v49 }
0x1061   : > { %v4788_v55 = vmul.f32 %v4784_v46, %v7906_v24 }
0x1063   : > { %v7587_v61 = vsub.f32 %v4770_v15, %v4788_v55 }
0x1065   : > { %v4796_v31 = vmul.f32 %v7587_v61, %v7587_v61 }
0x1067   : > { %v4806_v13 = vsel %vm7925_vm13, %v4796_v31, 0.0  ;;  %vm7935_vm13 = vmmov %vm7929_vm4 }
0x1068   : > { %4807 = vadd.xlane.f32.xlu2 %v4806_v13 }
0x10b8   : > { %v4799_v6 = vpop.xlane.xlu2 %4798 }
0x10b9   : > { %v4809_v10 = vmul.f32 %v4799_v6, %v7906_v24 }
0x10bb   : > { %v4813_v22 = vadd.f32 1e-05, %v4809_v10 }
0x10bd   : > { %5749 = vrsqrt.f32 %v4813_v22  ;;  %vm4823_vm15 = vweird.f32 %v4813_v22 }
0x10c3   : > { %v5750_v30 = vpop.eup %5749 }
0x10c4   : > { %v4818_v9 = vmul.f32 %v5750_v30, %v4813_v22  ;;  %vm4824_vm9 = vweird.f32 %v5750_v30 }
0x10c5   : > { %vm4825_vm8 = vmor %vm4823_vm15, %vm4824_vm9 }
0x10c6   : > { %v4819_v29 = vmul.f32 %v5750_v30, %v4818_v9 }
0x10c8   : > { %v4820_v8 = vmul.f32 0.5, %v4819_v29 }
0x10ca   : > { %v4821_v62 = vsub.f32 1.5, %v4820_v8 }
0x10cb   : > { %v4802_v60 = vpop.xlane.xlu0 %4801 }
0x10cc   : > { %v4822_v14 = vmul.f32 %v5750_v30, %v4821_v62  ;;  %v4810_v12 = vmul.f32 %v4802_v60, %v7906_v24 }
0x10ce   : > { %v4826_v26 = vsel %vm4825_vm8, %v5750_v30, %v4822_v14  ;;  %v4814_v5 = vadd.f32 1e-05, %v4810_v12 }
0x10cf   : > { %v4857_v1 = vmul.f32 %v4826_v26, %v4789_v47 }
0x10d0   : > { %5751 = vrsqrt.f32 %v4814_v5  ;;  %vm4833_vm2 = vweird.f32 %v4814_v5 }
0x10d1   : > { %v4864_v7 = vmul.f32 %v5585_v18, %v4857_v1 }
0x10d3   : > { %v4871_v35 = vadd.f32 %v5586_v57, %v4864_v7  ;;  %v4805_v4 = vpop.xlane.xlu1 %4804 }
0x10d4   : > { %v4811_v63 = vmul.f32 %v4805_v4, %v7906_v24 }
0x10d5   : > { %4875 = vst.msk [vmem:[#allocation2] sm:$0xff] %vm7928_vm12, %v4871_v35 }
0x10d6   : > { %v5752_v40 = vpop.eup %5751  ;;  %v4815_v43 = vadd.f32 1e-05, %v4811_v63 }
0x10d7   : > { %v4828_v27 = vmul.f32 %v5752_v40, %v4814_v5  ;;  %vm4834_vm7 = vweird.f32 %v5752_v40 }
0x10d8   : > { %5753 = vrsqrt.f32 %v4815_v43  ;;  %vm4835_vm3 = vmor %vm4833_vm2, %vm4834_vm7  ;;  %vm4843_vm11 = vweird.f32 %v4815_v43 }
0x10d9   : > { %v4829_v53 = vmul.f32 %v5752_v40, %v4828_v27 }
0x10db   : > { %v4830_v52 = vmul.f32 0.5, %v4829_v53  ;;  %v4808_v37 = vpop.xlane.xlu2 %4807 }
0x10dc   : > { %v4812_v0 = vmul.f32 %v4808_v37, %v7906_v24 }
0x10dd   : > { %v4831_v51 = vsub.f32 1.5, %v4830_v52 }
0x10de   : > { %v5754_v28 = vpop.eup %5753  ;;  %v4816_v59 = vadd.f32 1e-05, %v4812_v0 }
0x10df   : > { %v4832_v34 = vmul.f32 %v5752_v40, %v4831_v51  ;;  %v4838_v19 = vmul.f32 %v5754_v28, %v4815_v43  ;;  %vm4844_vm10 = vweird.f32 %v5754_v28 }
0x10e0   : > { %5755 = vrsqrt.f32 %v4816_v59  ;;  %vm4845_vm6 = vmor %vm4843_vm11, %vm4844_vm10  ;;  %vm4853_vm1 = vweird.f32 %v4816_v59 }
0x10e1   : > { %v4836_v45 = vsel %vm4835_vm3, %v5752_v40, %v4832_v34  ;;  %v4839_v36 = vmul.f32 %v5754_v28, %v4838_v19 }
0x10e2   : > { %v4858_v50 = vmul.f32 %v4836_v45, %v4790_v56 }
0x10e3   : > { %v4840_v23 = vmul.f32 0.5, %v4839_v36 }
0x10e4   : > { %v4865_v11 = vmul.f32 %v5585_v18, %v4858_v50 }
0x10e5   : > { %v4841_v41 = vsub.f32 1.5, %v4840_v23 }
0x10e6   : > { %v5756_v44 = vpop.eup %5755  ;;  %v4872_v33 = vadd.f32 %v5586_v57, %v4865_v11 }
0x10e7   : > { %v4842_v17 = vmul.f32 %v5754_v28, %v4841_v41  ;;  %v4848_v24 = vmul.f32 %v5756_v44, %v4816_v59  ;;  %vm4854_vm0 = vweird.f32 %v5756_v44 }
0x10e8   : > { %4876 = vst.msk [vmem:[#allocation2 + $0x8] sm:$0xff] %vm7929_vm4, %v4872_v33  ;;  %vm4855_vm14 = vmor %vm4853_vm1, %vm4854_vm0 }
0x10e9   : > { %v4846_v15 = vsel %vm4845_vm6, %v5754_v28, %v4842_v17  ;;  %v4849_v38 = vmul.f32 %v5756_v44, %v4848_v24 }
0x10ea   : > { %v4859_v39 = vmul.f32 %v4846_v15, %v7581_v3 }
0x10eb   : > { %v4850_v58 = vmul.f32 0.5, %v4849_v38 }
0x10ec   : > { %v4866_v47 = vmul.f32 %v5585_v18, %v4859_v39 }
0x10ed   : > { %v4851_v21 = vsub.f32 1.5, %v4850_v58 }
0x10ee   : > { %v4873_v54 = vadd.f32 %v5586_v57, %v4866_v47 }
0x10ef   : > { %v4852_v25 = vmul.f32 %v5756_v44, %v4851_v21 }
0x10f0   : > { %4877 = vst.msk [vmem:[#allocation2 + $0x10] sm:$0xff] %vm7932_vm5, %v4873_v54 }
0x10f1   : > { %v4856_v20 = vsel %vm4855_vm14, %v5756_v44, %v4852_v25 }
0x10f2   : > { %v4860_v56 = vmul.f32 %v4856_v20, %v7587_v61 }
0x10f4   : > { %v4867_v2 = vmul.f32 %v5585_v18, %v4860_v56 }
0x10f6   : > { %v4874_v48 = vadd.f32 %v5586_v57, %v4867_v2 }
0x10f8   : > { %4878 = vst.msk [vmem:[#allocation2 + $0x18] sm:$0xff] %vm7935_vm13, %v4874_v48 }
0x10f9   : > { %5784 = shalt.err (!%p5781_p13)
}
0x10fa   : > { %s5859_s5 = smov 128   ;;  %s5860_s9 = smov 8  }
0x10fb   : > { %5448 = dma.vmem_to_hbm [thread:$0]  (%p7610_p6), %s4888_s26, 512, %s4890_s1, [#allocation3], %s5859_s5, %s5859_s5, %s5860_s9  }
0x10fc   : > { %5798 = dma.done.wait (%p7610_p6), [#allocation3], 512  }
0x10fd   : > { %5800 = vsyncadd (%p7610_p6), [#allocation3], 4294966784 }
0x10fe PF: > { %s7936_s13 = sld [smem:[#allocation41_spill]] }
0x10ff   : > { %s7937_s7 = sld [smem:[#allocation40_spill]] }
0x1100   : > { %s7938_s10 = sld [smem:[#allocation42_spill]] }
0x1104   : > { %s78_s11 = sadd.s32 1, %s7936_s13  }
0x1105   : > { %p75_p0 = scmp.ge.s32.totalorder %s78_s11, 4  }
0x1107   :  { %77 = sbr.rel (!%p75_p0) target bundleno = 79 (0x4f), region = 313 }
0x110c   :  { %4906 = vsyncpa [#allocation3], 1 }
0x110d   :  { %4908 = vsyncpa [#allocation3 + $0x1], 1 }

</bundles_post_ra>
